<compile_context>
chip_gen: v5e
topology: v5e:2x2
jax: 0.10.0
libtpu: 0.0.40
codegen_flags: <defaults>
</compile_context>

<pallas_src>
import jax
import jax.numpy as jnp
from jax import lax
from jax.experimental import pallas as pl
from jax.experimental.pallas import tpu as pltpu


def _decoder_kernel(num_layers, hidden_dim, t_chunk):
    L, H, TC = num_layers, hidden_dim, t_chunk

    def kernel(g0_ref, w_ih_ref, w_hh_ref, b_ref, w_out_ref, w_c_ref, b_c_ref,
               h0_ref, c0_ref, pi_ref, val_ref, h_state, c_state):
        c_idx = pl.program_id(1)   # time-chunk index ("arbitrary", sequential)

        # Load the initial LSTM state once per batch tile; it is then carried
        # across time chunks in VMEM scratch.
        @pl.when(c_idx == 0)
        def _():
            h_state[...] = h0_ref[...].reshape(h_state.shape)
            c_state[...] = c0_ref[...].reshape(c_state.shape)

        def step(i, carry):
            # Layer-0 input gates (x_t @ W_ih[0] + b[0]) precomputed in wrapper.
            gates_in = g0_ref[0, i]                               # (bt, 4H) f32
            x_bf = None
            for l in range(L):
                h_prev = h_state[l]                               # (bt, H) f32
                c_prev = c_state[l]
                rec = jnp.dot(h_prev.astype(jnp.bfloat16), w_hh_ref[l],
                              preferred_element_type=jnp.float32)
                if l == 0:
                    gates = gates_in + rec
                else:
                    gates = (jnp.dot(x_bf, w_ih_ref[l - 1],
                                     preferred_element_type=jnp.float32)
                             + rec + b_ref[l])
                # PyTorch gate order [i, f, g, o]; elementwise kept in f32.
                i_g = jax.nn.sigmoid(gates[:, 0 * H:1 * H])
                f_g = jax.nn.sigmoid(gates[:, 1 * H:2 * H])
                g_g = jnp.tanh(gates[:, 2 * H:3 * H])
                o_g = jax.nn.sigmoid(gates[:, 3 * H:4 * H])
                c_new = f_g * c_prev + i_g * g_g
                h_new = o_g * jnp.tanh(c_new)
                h_state[l] = h_new
                c_state[l] = c_new
                x_bf = h_new.astype(jnp.bfloat16)

            # output_layer (no bias) -> pre-softmax "output"
            raw = jnp.dot(x_bf, w_out_ref[...],
                          preferred_element_type=jnp.float32)     # (bt, V)
            m = jnp.max(raw, axis=-1, keepdims=True)
            e = jnp.exp(raw - m)
            # softmax via EUP approximate reciprocal (frees VALU divide slots)
            pi = e * pl.reciprocal(jnp.sum(e, axis=-1, keepdims=True),
                                   approx=True)
            q = (jnp.dot(raw.astype(jnp.bfloat16), w_c_ref[...],
                         preferred_element_type=jnp.float32)
                 + b_c_ref[...])

            pi_ref[0, i] = pi.astype(pi_ref.dtype)
            # fused per-step value: sum(Q * pi, -1); stored into the lane-dense
            # (TC, bt) chunk block (single HBM writeback per chunk).
            val_ref[0, 0, pl.ds(i, 1)] = (
                jnp.sum(q * pi, axis=-1)[None, :].astype(val_ref.dtype))
            return carry

        lax.fori_loop(0, TC, step, 0, unroll=True)

    return kernel


def decoder_forward(params, encoder_outputs, encoder_hidden, actions,
                    *, t_chunk=None, batch_tile=None):
    """Teacher-forced forward of BaseDecoderNetwork (is_attention=False).

    Returns (decoder_action, logits(=pi, matching the PyTorch module), values).
    """
    if actions is None:
        # TODO(synk): actions=None requires in-kernel Categorical sampling
        # (Gumbel-max with pltpu.prng_random_bits); only teacher forcing here.
        raise NotImplementedError("actions=None (sampling path) not implemented")

    h0, c0 = encoder_hidden                                   # each (L, B, H)
    B, T, _ = encoder_outputs.shape
    emb = params["embedding"].astype(jnp.float32)
    V, H = emb.shape
    L = params["w_ih"].shape[0]
    bf16 = jnp.bfloat16

    # Time chunk (inner unrolled loop length) and batch tile ("parallel" axis —
    # lets the v7x second TensorCore pick up independent batch tiles).
    if t_chunk is None:
        t_chunk = next(c for c in (32, 16, 8, 4, 2, 1) if T % c == 0)
    TC = t_chunk
    assert T % TC == 0
    NC = T // TC
    bt = B if batch_tile is None else batch_tile
    assert B % bt == 0
    NB = B // bt

    actions = actions.astype(jnp.int32)
    # decoder_input starts at index 0, then becomes the teacher-forced action.
    prev = jnp.concatenate([jnp.zeros((B, 1), jnp.int32), actions[:, :-1]],
                           axis=1)                            # (B, T)

    # Precompute layer-0 input gates for every step with ONE big bf16 matmul
    # (replaces the one-hot lookup + per-step layer-0 input dot in the kernel).
    x0 = jnp.take(emb, prev, axis=0)                          # (B, T, H) f32
    g0 = jnp.dot(x0.reshape(B * T, H).astype(bf16),
                 params["w_ih"][0].astype(bf16),
                 preferred_element_type=jnp.float32)          # (B*T, 4H) f32
    g0 = g0.reshape(B, T, 4 * H) + params["b"][0].astype(jnp.float32)
    g0 = jnp.transpose(g0.reshape(NB, bt, T, 4 * H), (0, 2, 1, 3))  # (NB,T,bt,4H)

    # Resident weights in bf16 (native MXU path; halves weight VMEM/DMA).
    w_hh = params["w_hh"].astype(bf16)                        # (L, H, 4H)
    if L > 1:
        w_ih_rest = params["w_ih"][1:].astype(bf16)           # (L-1, H, 4H)
    else:
        w_ih_rest = jnp.zeros((1, H, 4 * H), bf16)            # dummy, unused
    b_all = params["b"].astype(jnp.float32)                   # (L, 1, 4H)
    w_out = params["w_out"].astype(bf16)                      # (H, V)
    w_c = params["w_c"].astype(bf16)                          # (V, V)
    b_c = params["b_c"].astype(jnp.float32)                   # (1, V)
    h0_t = h0.astype(jnp.float32).reshape(L, NB, bt, H)
    c0_t = c0.astype(jnp.float32).reshape(L, NB, bt, H)

    LR = max(L - 1, 1)
    const3 = lambda b, c: (0, 0, 0)
    const2 = lambda b, c: (0, 0)
    single = pl.Buffered(1)   # constant/init blocks: no double-buffering

    # Explicit per-core VMEM budget (generous margin, capped below v7x 64 MiB).
    est_bytes = (2 * (w_hh.size + w_ih_rest.size + w_out.size + w_c.size)
                 + 4 * (b_all.size + b_c.size)
                 + 4 * 4 * L * bt * H
                 + 2 * 4 * TC * bt * (4 * H + V + 1))
    vmem_limit = int(min(64 * 1024 * 1024, max(16 * 1024 * 1024, 4 * est_bytes)))

    pi_out, val_out = pl.pallas_call(
        _decoder_kernel(L, H, TC),
        out_shape=(
            jax.ShapeDtypeStruct((NB, T, bt, V), jnp.float32),
            jax.ShapeDtypeStruct((NB, NC, TC, bt), jnp.float32),
        ),
        grid_spec=pltpu.PrefetchScalarGridSpec(
            num_scalar_prefetch=0,
            grid=(NB, NC),                              # (batch tiles, time chunks)
            in_specs=[
                pl.BlockSpec((1, TC, bt, 4 * H), lambda b, c: (b, c, 0, 0)),
                pl.BlockSpec((LR, H, 4 * H), const3, pipeline_mode=single),
                pl.BlockSpec((L, H, 4 * H), const3, pipeline_mode=single),
                pl.BlockSpec((L, 1, 4 * H), const3, pipeline_mode=single),
                pl.BlockSpec((H, V), const2, pipeline_mode=single),
                pl.BlockSpec((V, V), const2, pipeline_mode=single),
                pl.BlockSpec((1, V), const2, pipeline_mode=single),
                pl.BlockSpec((L, 1, bt, H), lambda b, c: (0, b, 0, 0),
                             pipeline_mode=single),     # h0 per batch tile
                pl.BlockSpec((L, 1, bt, H), lambda b, c: (0, b, 0, 0),
                             pipeline_mode=single),     # c0 per batch tile
            ],
            out_specs=[
                pl.BlockSpec((1, TC, bt, V), lambda b, c: (b, c, 0, 0)),
                pl.BlockSpec((1, 1, TC, bt), lambda b, c: (b, c, 0, 0)),
            ],
            scratch_shapes=[
                pltpu.VMEM((L, bt, H), jnp.float32),    # h state (carried)
                pltpu.VMEM((L, bt, H), jnp.float32),    # c state (carried)
            ],
        ),
        compiler_params=pltpu.CompilerParams(
            dimension_semantics=("parallel", "arbitrary"),
            vmem_limit_bytes=vmem_limit),
    )(g0, w_ih_rest, w_hh, b_all, w_out, w_c, b_c, h0_t, c0_t)

    # (NB, T, bt, V) -> (B, T, V);  (NB, NC, TC, bt) -> (B, T)
    logits = jnp.transpose(pi_out, (1, 0, 2, 3)).reshape(T, B, V)
    logits = jnp.transpose(logits, (1, 0, 2))
    values = jnp.transpose(val_out.reshape(NB, T, bt), (1, 0, 2)).reshape(T, B).T
    decoder_action = actions.astype(jnp.float32)              # teacher forcing
    return decoder_action, logits, values


def decoder_forward_ref(params, encoder_outputs, encoder_hidden, actions):
    """Pure-JAX reference mirroring the PyTorch forward (teacher forced).

    Uses the same bf16-weight / f32-accumulate matmul convention as the kernel
    so the comparison isolates kernel bugs rather than dtype rounding.
    """
    bf16 = jnp.bfloat16

    def bdot(a, w):
        return jnp.dot(a.astype(bf16), w.astype(bf16),
                       preferred_element_type=jnp.float32)

    h, c = encoder_hidden
    h = h.astype(jnp.float32)
    c = c.astype(jnp.float32)
    B, T, _ = encoder_outputs.shape
    emb = params["embedding"].astype(jnp.float32)
    V, H = emb.shape
    L = params["w_ih"].shape[0]

    prev = jnp.zeros((B,), jnp.int32)
    logits_list, values_list = [], []
    for t in range(T):
        x = emb[prev]                                    # (B, H)
        new_h, new_c = [], []
        for l in range(L):
            gates = (bdot(x, params["w_ih"][l]) + bdot(h[l], params["w_hh"][l])
                     + params["b"][l])
            i_g = jax.nn.sigmoid(gates[:, 0 * H:1 * H])
            f_g = jax.nn.sigmoid(gates[:, 1 * H:2 * H])
            g_g = jnp.tanh(gates[:, 2 * H:3 * H])
            o_g = jax.nn.sigmoid(gates[:, 3 * H:4 * H])
            c_l = f_g * c[l] + i_g * g_g
            h_l = o_g * jnp.tanh(c_l)
            new_h.append(h_l)
            new_c.append(c_l)
            x = h_l
        h = jnp.stack(new_h)
        c = jnp.stack(new_c)
        raw = bdot(x, params["w_out"])
        pi = jax.nn.softmax(raw, axis=-1)
        q = bdot(raw, params["w_c"]) + params["b_c"]
        logits_list.append(pi)
        values_list.append(jnp.sum(q * pi, axis=-1))
        prev = actions[:, t].astype(jnp.int32)
    logits = jnp.stack(logits_list, axis=1)              # (B, T, V)
    values = jnp.stack(values_list, axis=1)              # (B, T)
    return actions.astype(jnp.float32), logits, values


if __name__ == "__main__":
    B, T, H, V, L = 2, 8, 32, 4, 2   # batch, seq, hidden_dim, output_dim, layers

    key = jax.random.PRNGKey(0)
    keys = jax.random.split(key, 10)

    params = {
        "embedding": jax.random.uniform(keys[0], (V, H), jnp.float32, -1.0, 1.0),
        "w_ih": 0.1 * jax.random.normal(keys[1], (L, H, 4 * H), jnp.float32),
        "w_hh": 0.1 * jax.random.normal(keys[2], (L, H, 4 * H), jnp.float32),
        "b": jnp.zeros((L, 1, 4 * H), jnp.float32),          # b_ih + b_hh (init 0)
        "w_out": 0.1 * jax.random.normal(keys[3], (H, V), jnp.float32),
        "w_c": 0.1 * jax.random.normal(keys[4], (V, V), jnp.float32),
        "b_c": jnp.zeros((1, V), jnp.float32),
    }

    encoder_outputs = jax.random.normal(keys[5], (B, T, H), jnp.float32)
    h0 = 0.5 * jax.random.normal(keys[6], (L, B, H), jnp.float32)
    c0 = 0.5 * jax.random.normal(keys[7], (L, B, H), jnp.float32)
    actions = jax.random.randint(keys[8], (B, T), 0, V, jnp.int32)

    dec_act, logits, values = decoder_forward(
        params, encoder_outputs, (h0, c0), actions)
    dec_act = jax.block_until_ready(dec_act)
    logits = jax.block_until_ready(logits)
    values = jax.block_until_ready(values)

    ref_act, ref_logits, ref_values = decoder_forward_ref(
        params, encoder_outputs, (h0, c0), actions)

    assert dec_act.shape == (B, T)
    assert logits.shape == (B, T, V)
    assert values.shape == (B, T)
    assert jnp.array_equal(dec_act, ref_act), "action mismatch"
    # bf16 MXU + approx EUP reciprocal -> allow a few e-3 of deviation.
    assert jnp.allclose(logits, ref_logits, atol=5e-3, rtol=5e-3), "pi mismatch"
    assert jnp.allclose(values, ref_values, atol=5e-3, rtol=5e-3), "value mismatch"

    print("KERNEL_OK")
</pallas_src>

<mosaic_0001>
module attributes {stable_mosaic.version = 11 : i64} {
  func.func @kernel(%arg0: i32, %arg1: i32, %arg2: memref<1x8x2x128xf32, #tpu.memory_space<vmem>>, %arg3: memref<1x32x128xbf16, #tpu.memory_space<vmem>>, %arg4: memref<2x32x128xbf16, #tpu.memory_space<vmem>>, %arg5: memref<2x1x128xf32, #tpu.memory_space<vmem>>, %arg6: memref<32x4xbf16, #tpu.memory_space<vmem>>, %arg7: memref<4x4xbf16, #tpu.memory_space<vmem>>, %arg8: memref<1x4xf32, #tpu.memory_space<vmem>>, %arg9: memref<2x1x2x32xf32, #tpu.memory_space<vmem>>, %arg10: memref<2x1x2x32xf32, #tpu.memory_space<vmem>>, %arg11: memref<1x8x2x4xf32, #tpu.memory_space<vmem>>, %arg12: memref<1x1x8x2xf32, #tpu.memory_space<vmem>>, %arg13: memref<2x2x32xf32, #tpu.memory_space<vmem>>, %arg14: memref<2x2x32xf32, #tpu.memory_space<vmem>>) attributes {dimension_semantics = [#tpu.dimension_semantics<parallel>, #tpu.dimension_semantics<arbitrary>], iteration_bounds = array<i64: 1, 1>, scalar_prefetch = 0 : i64, scratch_operands = 2 : i64, tpu.core_type = #tpu.core_type<tc>, window_params = [{transform_indices = @transform_0, window_bounds = array<i64: 1, 8, 2, 128>}, {pipeline_mode = #tpu.pipeline_mode<synchronous>, transform_indices = @transform_1, window_bounds = array<i64: 1, 32, 128>}, {pipeline_mode = #tpu.pipeline_mode<synchronous>, transform_indices = @transform_2, window_bounds = array<i64: 2, 32, 128>}, {pipeline_mode = #tpu.pipeline_mode<synchronous>, transform_indices = @transform_3, window_bounds = array<i64: 2, 1, 128>}, {pipeline_mode = #tpu.pipeline_mode<synchronous>, transform_indices = @transform_4, window_bounds = array<i64: 32, 4>}, {pipeline_mode = #tpu.pipeline_mode<synchronous>, transform_indices = @transform_5, window_bounds = array<i64: 4, 4>}, {pipeline_mode = #tpu.pipeline_mode<synchronous>, transform_indices = @transform_6, window_bounds = array<i64: 1, 4>}, {pipeline_mode = #tpu.pipeline_mode<synchronous>, transform_indices = @transform_7, window_bounds = array<i64: 2, 1, 2, 32>}, {pipeline_mode = #tpu.pipeline_mode<synchronous>, transform_indices = @transform_8, window_bounds = array<i64: 2, 1, 2, 32>}, {transform_indices = @transform_9, window_bounds = array<i64: 1, 8, 2, 4>}, {transform_indices = @transform_10, window_bounds = array<i64: 1, 1, 8, 2>}]} {
    %c0_i32 = arith.constant 0 : i32
    %0 = arith.cmpi eq, %arg1, %c0_i32 : i32
    %1 = arith.extui %0 : i1 to i32
    %c0_i32_0 = arith.constant 0 : i32
    %2 = arith.cmpi ne, %1, %c0_i32_0 : i32
    scf.if %2 {
      %c0_519 = arith.constant 0 : index
      %c0_520 = arith.constant 0 : index
      %c0_521 = arith.constant 0 : index
      %c0_522 = arith.constant 0 : index
      %971 = vector.load %arg9[%c0_519, %c0_520, %c0_521, %c0_522] : memref<2x1x2x32xf32, #tpu.memory_space<vmem>>, vector<2x1x2x32xf32>
      %972 = vector.shape_cast %971 : vector<2x1x2x32xf32> to vector<2x2x32xf32>
      %c0_523 = arith.constant 0 : index
      %c0_524 = arith.constant 0 : index
      %c0_525 = arith.constant 0 : index
      %973 = vector.load %arg13[%c0_523, %c0_524, %c0_525] : memref<2x2x32xf32, #tpu.memory_space<vmem>>, vector<2x2x32xf32>
      tpu.vector_store %arg13[%c0_523, %c0_524, %c0_525], %972 {strides = array<i32>} : memref<2x2x32xf32, #tpu.memory_space<vmem>>, vector<2x2x32xf32>,
      %c0_526 = arith.constant 0 : index
      %c0_527 = arith.constant 0 : index
      %c0_528 = arith.constant 0 : index
      %c0_529 = arith.constant 0 : index
      %974 = vector.load %arg10[%c0_526, %c0_527, %c0_528, %c0_529] : memref<2x1x2x32xf32, #tpu.memory_space<vmem>>, vector<2x1x2x32xf32>
      %975 = vector.shape_cast %974 : vector<2x1x2x32xf32> to vector<2x2x32xf32>
      %c0_530 = arith.constant 0 : index
      %c0_531 = arith.constant 0 : index
      %c0_532 = arith.constant 0 : index
      %976 = vector.load %arg14[%c0_530, %c0_531, %c0_532] : memref<2x2x32xf32, #tpu.memory_space<vmem>>, vector<2x2x32xf32>
      tpu.vector_store %arg14[%c0_530, %c0_531, %c0_532], %975 {strides = array<i32>} : memref<2x2x32xf32, #tpu.memory_space<vmem>>, vector<2x2x32xf32>,
    } else {
    }
    %c0_i32_1 = arith.constant 0 : i32
    %c0 = arith.constant 0 : index
    %3 = arith.index_cast %c0_i32_1 : i32 to index
    %c0_2 = arith.constant 0 : index
    %c0_3 = arith.constant 0 : index
    %4 = vector.load %arg2[%c0, %3, %c0_2, %c0_3] : memref<1x8x2x128xf32, #tpu.memory_space<vmem>>, vector<1x1x2x128xf32>
    %5 = vector.shape_cast %4 : vector<1x1x2x128xf32> to vector<2x128xf32>
    %c0_4 = arith.constant 0 : index
    %c0_5 = arith.constant 0 : index
    %c0_6 = arith.constant 0 : index
    %6 = vector.load %arg13[%c0_4, %c0_5, %c0_6] : memref<2x2x32xf32, #tpu.memory_space<vmem>>, vector<1x2x32xf32>
    %7 = vector.shape_cast %6 : vector<1x2x32xf32> to vector<2x32xf32>
    %c0_7 = arith.constant 0 : index
    %c0_8 = arith.constant 0 : index
    %c0_9 = arith.constant 0 : index
    %8 = vector.load %arg14[%c0_7, %c0_8, %c0_9] : memref<2x2x32xf32, #tpu.memory_space<vmem>>, vector<1x2x32xf32>
    %9 = vector.shape_cast %8 : vector<1x2x32xf32> to vector<2x32xf32>
    %10 = arith.truncf %7 : vector<2x32xf32> to vector<2x32xbf16>
    %c0_10 = arith.constant 0 : index
    %c0_11 = arith.constant 0 : index
    %c0_12 = arith.constant 0 : index
    %11 = vector.load %arg4[%c0_10, %c0_11, %c0_12] : memref<2x32x128xbf16, #tpu.memory_space<vmem>>, vector<1x32x128xbf16>
    %12 = vector.shape_cast %11 : vector<1x32x128xbf16> to vector<32x128xbf16>
    %cst = arith.constant dense<0.000000e+00> : vector<2x128xf32>
    %13 = tpu.matmul %10, %12, %cst {dimension_numbers = #tpu.dot_dimension_numbers<[1], [0], [0], [1], [0, 0, 1, 1], [], []>} : vector<2x32xbf16>, vector<32x128xbf16>, vector<2x128xf32> -> vector<2x128xf32>
    %14 = arith.addf %5, %13 : vector<2x128xf32>
    %15 = vector.extract_strided_slice %14 {offsets = [0, 0], sizes = [2, 32], strides = [1, 1]} : vector<2x128xf32> to vector<2x32xf32>
    %16 = arith.negf %15 : vector<2x32xf32>
    %17 = math.exp %16 : vector<2x32xf32>
    %cst_13 = arith.constant 1.000000e+00 : f32
    %18 = vector.broadcast %cst_13 : f32 to vector<2x32xf32>
    %19 = arith.addf %18, %17 : vector<2x32xf32>
    %20 = arith.divf %18, %19 : vector<2x32xf32>
    %21 = vector.extract_strided_slice %14 {offsets = [0, 32], sizes = [2, 32], strides = [1, 1]} : vector<2x128xf32> to vector<2x32xf32>
    %22 = arith.negf %21 : vector<2x32xf32>
    %23 = math.exp %22 : vector<2x32xf32>
    %cst_14 = arith.constant 1.000000e+00 : f32
    %24 = vector.broadcast %cst_14 : f32 to vector<2x32xf32>
    %25 = arith.addf %24, %23 : vector<2x32xf32>
    %26 = arith.divf %24, %25 : vector<2x32xf32>
    %27 = vector.extract_strided_slice %14 {offsets = [0, 64], sizes = [2, 32], strides = [1, 1]} : vector<2x128xf32> to vector<2x32xf32>
    %28 = math.tanh %27 : vector<2x32xf32>
    %29 = vector.extract_strided_slice %14 {offsets = [0, 96], sizes = [2, 32], strides = [1, 1]} : vector<2x128xf32> to vector<2x32xf32>
    %30 = arith.negf %29 : vector<2x32xf32>
    %31 = math.exp %30 : vector<2x32xf32>
    %cst_15 = arith.constant 1.000000e+00 : f32
    %32 = vector.broadcast %cst_15 : f32 to vector<2x32xf32>
    %33 = arith.addf %32, %31 : vector<2x32xf32>
    %34 = arith.divf %32, %33 : vector<2x32xf32>
    %35 = arith.mulf %26, %9 : vector<2x32xf32>
    %36 = arith.mulf %20, %28 : vector<2x32xf32>
    %37 = arith.addf %35, %36 : vector<2x32xf32>
    %38 = math.tanh %37 : vector<2x32xf32>
    %39 = arith.mulf %34, %38 : vector<2x32xf32>
    %c0_16 = arith.constant 0 : index
    %c0_17 = arith.constant 0 : index
    %c0_18 = arith.constant 0 : index
    %40 = vector.load %arg13[%c0_16, %c0_17, %c0_18] : memref<2x2x32xf32, #tpu.memory_space<vmem>>, vector<1x2x32xf32>
    %41 = vector.shape_cast %40 : vector<1x2x32xf32> to vector<2x32xf32>
    %42 = vector.shape_cast %39 : vector<2x32xf32> to vector<1x2x32xf32>
    tpu.vector_store %arg13[%c0_16, %c0_17, %c0_18], %42 {strides = array<i32>} : memref<2x2x32xf32, #tpu.memory_space<vmem>>, vector<1x2x32xf32>,
    %c0_19 = arith.constant 0 : index
    %c0_20 = arith.constant 0 : index
    %c0_21 = arith.constant 0 : index
    %43 = vector.load %arg14[%c0_19, %c0_20, %c0_21] : memref<2x2x32xf32, #tpu.memory_space<vmem>>, vector<1x2x32xf32>
    %44 = vector.shape_cast %43 : vector<1x2x32xf32> to vector<2x32xf32>
    %45 = vector.shape_cast %37 : vector<2x32xf32> to vector<1x2x32xf32>
    tpu.vector_store %arg14[%c0_19, %c0_20, %c0_21], %45 {strides = array<i32>} : memref<2x2x32xf32, #tpu.memory_space<vmem>>, vector<1x2x32xf32>,
    %46 = arith.truncf %39 : vector<2x32xf32> to vector<2x32xbf16>
    %c1 = arith.constant 1 : index
    %c0_22 = arith.constant 0 : index
    %c0_23 = arith.constant 0 : index
    %47 = vector.load %arg13[%c1, %c0_22, %c0_23] : memref<2x2x32xf32, #tpu.memory_space<vmem>>, vector<1x2x32xf32>
    %48 = vector.shape_cast %47 : vector<1x2x32xf32> to vector<2x32xf32>
    %c1_24 = arith.constant 1 : index
    %c0_25 = arith.constant 0 : index
    %c0_26 = arith.constant 0 : index
    %49 = vector.load %arg14[%c1_24, %c0_25, %c0_26] : memref<2x2x32xf32, #tpu.memory_space<vmem>>, vector<1x2x32xf32>
    %50 = vector.shape_cast %49 : vector<1x2x32xf32> to vector<2x32xf32>
    %51 = arith.truncf %48 : vector<2x32xf32> to vector<2x32xbf16>
    %c1_27 = arith.constant 1 : index
    %c0_28 = arith.constant 0 : index
    %c0_29 = arith.constant 0 : index
    %52 = vector.load %arg4[%c1_27, %c0_28, %c0_29] : memref<2x32x128xbf16, #tpu.memory_space<vmem>>, vector<1x32x128xbf16>
    %53 = vector.shape_cast %52 : vector<1x32x128xbf16> to vector<32x128xbf16>
    %cst_30 = arith.constant dense<0.000000e+00> : vector<2x128xf32>
    %54 = tpu.matmul %51, %53, %cst_30 {dimension_numbers = #tpu.dot_dimension_numbers<[1], [0], [0], [1], [0, 0, 1, 1], [], []>} : vector<2x32xbf16>, vector<32x128xbf16>, vector<2x128xf32> -> vector<2x128xf32>
    %c0_31 = arith.constant 0 : index
    %c0_32 = arith.constant 0 : index
    %c0_33 = arith.constant 0 : index
    %55 = vector.load %arg3[%c0_31, %c0_32, %c0_33] : memref<1x32x128xbf16, #tpu.memory_space<vmem>>, vector<1x32x128xbf16>
    %56 = vector.shape_cast %55 : vector<1x32x128xbf16> to vector<32x128xbf16>
    %cst_34 = arith.constant dense<0.000000e+00> : vector<2x128xf32>
    %57 = tpu.matmul %46, %56, %cst_34 {dimension_numbers = #tpu.dot_dimension_numbers<[1], [0], [0], [1], [0, 0, 1, 1], [], []>} : vector<2x32xbf16>, vector<32x128xbf16>, vector<2x128xf32> -> vector<2x128xf32>
    %58 = arith.addf %57, %54 : vector<2x128xf32>
    %c1_35 = arith.constant 1 : index
    %c0_36 = arith.constant 0 : index
    %c0_37 = arith.constant 0 : index
    %59 = vector.load %arg5[%c1_35, %c0_36, %c0_37] : memref<2x1x128xf32, #tpu.memory_space<vmem>>, vector<1x1x128xf32>
    %60 = vector.shape_cast %59 : vector<1x1x128xf32> to vector<1x128xf32>
    %61 = vector.broadcast %60 : vector<1x128xf32> to vector<2x128xf32>
    %62 = arith.addf %58, %61 : vector<2x128xf32>
    %63 = vector.extract_strided_slice %62 {offsets = [0, 0], sizes = [2, 32], strides = [1, 1]} : vector<2x128xf32> to vector<2x32xf32>
    %64 = arith.negf %63 : vector<2x32xf32>
    %65 = math.exp %64 : vector<2x32xf32>
    %cst_38 = arith.constant 1.000000e+00 : f32
    %66 = vector.broadcast %cst_38 : f32 to vector<2x32xf32>
    %67 = arith.addf %66, %65 : vector<2x32xf32>
    %68 = arith.divf %66, %67 : vector<2x32xf32>
    %69 = vector.extract_strided_slice %62 {offsets = [0, 32], sizes = [2, 32], strides = [1, 1]} : vector<2x128xf32> to vector<2x32xf32>
    %70 = arith.negf %69 : vector<2x32xf32>
    %71 = math.exp %70 : vector<2x32xf32>
    %cst_39 = arith.constant 1.000000e+00 : f32
    %72 = vector.broadcast %cst_39 : f32 to vector<2x32xf32>
    %73 = arith.addf %72, %71 : vector<2x32xf32>
    %74 = arith.divf %72, %73 : vector<2x32xf32>
    %75 = vector.extract_strided_slice %62 {offsets = [0, 64], sizes = [2, 32], strides = [1, 1]} : vector<2x128xf32> to vector<2x32xf32>
    %76 = math.tanh %75 : vector<2x32xf32>
    %77 = vector.extract_strided_slice %62 {offsets = [0, 96], sizes = [2, 32], strides = [1, 1]} : vector<2x128xf32> to vector<2x32xf32>
    %78 = arith.negf %77 : vector<2x32xf32>
    %79 = math.exp %78 : vector<2x32xf32>
    %cst_40 = arith.constant 1.000000e+00 : f32
    %80 = vector.broadcast %cst_40 : f32 to vector<2x32xf32>
    %81 = arith.addf %80, %79 : vector<2x32xf32>
    %82 = arith.divf %80, %81 : vector<2x32xf32>
    %83 = arith.mulf %74, %50 : vector<2x32xf32>
    %84 = arith.mulf %68, %76 : vector<2x32xf32>
    %85 = arith.addf %83, %84 : vector<2x32xf32>
    %86 = math.tanh %85 : vector<2x32xf32>
    %87 = arith.mulf %82, %86 : vector<2x32xf32>
    %c1_41 = arith.constant 1 : index
    %c0_42 = arith.constant 0 : index
    %c0_43 = arith.constant 0 : index
    %88 = vector.load %arg13[%c1_41, %c0_42, %c0_43] : memref<2x2x32xf32, #tpu.memory_space<vmem>>, vector<1x2x32xf32>
    %89 = vector.shape_cast %88 : vector<1x2x32xf32> to vector<2x32xf32>
    %90 = vector.shape_cast %87 : vector<2x32xf32> to vector<1x2x32xf32>
    tpu.vector_store %arg13[%c1_41, %c0_42, %c0_43], %90 {strides = array<i32>} : memref<2x2x32xf32, #tpu.memory_space<vmem>>, vector<1x2x32xf32>,
    %c1_44 = arith.constant 1 : index
    %c0_45 = arith.constant 0 : index
    %c0_46 = arith.constant 0 : index
    %91 = vector.load %arg14[%c1_44, %c0_45, %c0_46] : memref<2x2x32xf32, #tpu.memory_space<vmem>>, vector<1x2x32xf32>
    %92 = vector.shape_cast %91 : vector<1x2x32xf32> to vector<2x32xf32>
    %93 = vector.shape_cast %85 : vector<2x32xf32> to vector<1x2x32xf32>
    tpu.vector_store %arg14[%c1_44, %c0_45, %c0_46], %93 {strides = array<i32>} : memref<2x2x32xf32, #tpu.memory_space<vmem>>, vector<1x2x32xf32>,
    %94 = arith.truncf %87 : vector<2x32xf32> to vector<2x32xbf16>
    %c0_47 = arith.constant 0 : index
    %c0_48 = arith.constant 0 : index
    %95 = vector.load %arg6[%c0_47, %c0_48] : memref<32x4xbf16, #tpu.memory_space<vmem>>, vector<32x4xbf16>
    %cst_49 = arith.constant dense<0.000000e+00> : vector<2x4xf32>
    %96 = tpu.matmul %94, %95, %cst_49 {dimension_numbers = #tpu.dot_dimension_numbers<[1], [0], [0], [1], [0, 0, 1, 1], [], []>} : vector<2x32xbf16>, vector<32x4xbf16>, vector<2x4xf32> -> vector<2x4xf32>
    %cst_50 = arith.constant dense<0xFF800000> : vector<2xf32>
    %97 = vector.multi_reduction <maximumf>, %96, %cst_50 [1] : vector<2x4xf32> to vector<2xf32>
    %98 = vector.shape_cast %97 : vector<2xf32> to vector<2x1xf32>
    %99 = vector.broadcast %98 : vector<2x1xf32> to vector<2x4xf32>
    %100 = arith.subf %96, %99 : vector<2x4xf32>
    %101 = math.exp %100 : vector<2x4xf32>
    %cst_51 = arith.constant dense<0.000000e+00> : vector<2xf32>
    %102 = vector.multi_reduction <add>, %101, %cst_51 [1] : vector<2x4xf32> to vector<2xf32>
    %103 = vector.shape_cast %102 : vector<2xf32> to vector<2x1xf32>
    %104 = tpu.reciprocal %103 {approx = true} : vector<2x1xf32> -> vector<2x1xf32>
    %105 = vector.broadcast %104 : vector<2x1xf32> to vector<2x4xf32>
    %106 = arith.mulf %101, %105 : vector<2x4xf32>
    %107 = arith.truncf %96 : vector<2x4xf32> to vector<2x4xbf16>
    %c0_52 = arith.constant 0 : index
    %c0_53 = arith.constant 0 : index
    %108 = vector.load %arg7[%c0_52, %c0_53] : memref<4x4xbf16, #tpu.memory_space<vmem>>, vector<4x4xbf16>
    %cst_54 = arith.constant dense<0.000000e+00> : vector<2x4xf32>
    %109 = tpu.matmul %107, %108, %cst_54 {dimension_numbers = #tpu.dot_dimension_numbers<[1], [0], [0], [1], [0, 0, 1, 1], [], []>} : vector<2x4xbf16>, vector<4x4xbf16>, vector<2x4xf32> -> vector<2x4xf32>
    %c0_55 = arith.constant 0 : index
    %c0_56 = arith.constant 0 : index
    %110 = vector.load %arg8[%c0_55, %c0_56] : memref<1x4xf32, #tpu.memory_space<vmem>>, vector<1x4xf32>
    %111 = vector.broadcast %110 : vector<1x4xf32> to vector<2x4xf32>
    %112 = arith.addf %109, %111 : vector<2x4xf32>
    %c0_57 = arith.constant 0 : index
    %113 = arith.index_cast %c0_i32_1 : i32 to index
    %c0_58 = arith.constant 0 : index
    %c0_59 = arith.constant 0 : index
    %114 = vector.load %arg11[%c0_57, %113, %c0_58, %c0_59] : memref<1x8x2x4xf32, #tpu.memory_space<vmem>>, vector<1x1x2x4xf32>
    %115 = vector.shape_cast %114 : vector<1x1x2x4xf32> to vector<2x4xf32>
    %116 = vector.shape_cast %106 : vector<2x4xf32> to vector<1x1x2x4xf32>
    tpu.vector_store %arg11[%c0_57, %113, %c0_58, %c0_59], %116 {strides = array<i32>} : memref<1x8x2x4xf32, #tpu.memory_space<vmem>>, vector<1x1x2x4xf32>,
    %117 = arith.mulf %112, %106 : vector<2x4xf32>
    %cst_60 = arith.constant dense<0.000000e+00> : vector<2xf32>
    %118 = vector.multi_reduction <add>, %117, %cst_60 [1] : vector<2x4xf32> to vector<2xf32>
    %119 = vector.shape_cast %118 : vector<2xf32> to vector<1x2xf32>
    %c0_61 = arith.constant 0 : index
    %c0_62 = arith.constant 0 : index
    %120 = arith.index_cast %c0_i32_1 : i32 to index
    %c0_63 = arith.constant 0 : index
    %121 = vector.load %arg12[%c0_61, %c0_62, %120, %c0_63] : memref<1x1x8x2xf32, #tpu.memory_space<vmem>>, vector<1x1x1x2xf32>
    %122 = vector.shape_cast %121 : vector<1x1x1x2xf32> to vector<1x2xf32>
    %123 = vector.shape_cast %119 : vector<1x2xf32> to vector<1x1x1x2xf32>
    tpu.vector_store %arg12[%c0_61, %c0_62, %120, %c0_63], %123 {strides = array<i32>} : memref<1x1x8x2xf32, #tpu.memory_space<vmem>>, vector<1x1x1x2xf32>,
    %c1_i32 = arith.constant 1 : i32
    %c0_64 = arith.constant 0 : index
    %124 = arith.index_cast %c1_i32 : i32 to index
    %c0_65 = arith.constant 0 : index
    %c0_66 = arith.constant 0 : index
    %125 = vector.load %arg2[%c0_64, %124, %c0_65, %c0_66] : memref<1x8x2x128xf32, #tpu.memory_space<vmem>>, vector<1x1x2x128xf32>
    %126 = vector.shape_cast %125 : vector<1x1x2x128xf32> to vector<2x128xf32>
    %c0_67 = arith.constant 0 : index
    %c0_68 = arith.constant 0 : index
    %c0_69 = arith.constant 0 : index
    %127 = vector.load %arg13[%c0_67, %c0_68, %c0_69] : memref<2x2x32xf32, #tpu.memory_space<vmem>>, vector<1x2x32xf32>
    %128 = vector.shape_cast %127 : vector<1x2x32xf32> to vector<2x32xf32>
    %c0_70 = arith.constant 0 : index
    %c0_71 = arith.constant 0 : index
    %c0_72 = arith.constant 0 : index
    %129 = vector.load %arg14[%c0_70, %c0_71, %c0_72] : memref<2x2x32xf32, #tpu.memory_space<vmem>>, vector<1x2x32xf32>
    %130 = vector.shape_cast %129 : vector<1x2x32xf32> to vector<2x32xf32>
    %131 = arith.truncf %128 : vector<2x32xf32> to vector<2x32xbf16>
    %c0_73 = arith.constant 0 : index
    %c0_74 = arith.constant 0 : index
    %c0_75 = arith.constant 0 : index
    %132 = vector.load %arg4[%c0_73, %c0_74, %c0_75] : memref<2x32x128xbf16, #tpu.memory_space<vmem>>, vector<1x32x128xbf16>
    %133 = vector.shape_cast %132 : vector<1x32x128xbf16> to vector<32x128xbf16>
    %cst_76 = arith.constant dense<0.000000e+00> : vector<2x128xf32>
    %134 = tpu.matmul %131, %133, %cst_76 {dimension_numbers = #tpu.dot_dimension_numbers<[1], [0], [0], [1], [0, 0, 1, 1], [], []>} : vector<2x32xbf16>, vector<32x128xbf16>, vector<2x128xf32> -> vector<2x128xf32>
    %135 = arith.addf %126, %134 : vector<2x128xf32>
    %136 = vector.extract_strided_slice %135 {offsets = [0, 0], sizes = [2, 32], strides = [1, 1]} : vector<2x128xf32> to vector<2x32xf32>
    %137 = arith.negf %136 : vector<2x32xf32>
    %138 = math.exp %137 : vector<2x32xf32>
    %cst_77 = arith.constant 1.000000e+00 : f32
    %139 = vector.broadcast %cst_77 : f32 to vector<2x32xf32>
    %140 = arith.addf %139, %138 : vector<2x32xf32>
    %141 = arith.divf %139, %140 : vector<2x32xf32>
    %142 = vector.extract_strided_slice %135 {offsets = [0, 32], sizes = [2, 32], strides = [1, 1]} : vector<2x128xf32> to vector<2x32xf32>
    %143 = arith.negf %142 : vector<2x32xf32>
    %144 = math.exp %143 : vector<2x32xf32>
    %cst_78 = arith.constant 1.000000e+00 : f32
    %145 = vector.broadcast %cst_78 : f32 to vector<2x32xf32>
    %146 = arith.addf %145, %144 : vector<2x32xf32>
    %147 = arith.divf %145, %146 : vector<2x32xf32>
    %148 = vector.extract_strided_slice %135 {offsets = [0, 64], sizes = [2, 32], strides = [1, 1]} : vector<2x128xf32> to vector<2x32xf32>
    %149 = math.tanh %148 : vector<2x32xf32>
    %150 = vector.extract_strided_slice %135 {offsets = [0, 96], sizes = [2, 32], strides = [1, 1]} : vector<2x128xf32> to vector<2x32xf32>
    %151 = arith.negf %150 : vector<2x32xf32>
    %152 = math.exp %151 : vector<2x32xf32>
    %cst_79 = arith.constant 1.000000e+00 : f32
    %153 = vector.broadcast %cst_79 : f32 to vector<2x32xf32>
    %154 = arith.addf %153, %152 : vector<2x32xf32>
    %155 = arith.divf %153, %154 : vector<2x32xf32>
    %156 = arith.mulf %147, %130 : vector<2x32xf32>
    %157 = arith.mulf %141, %149 : vector<2x32xf32>
    %158 = arith.addf %156, %157 : vector<2x32xf32>
    %159 = math.tanh %158 : vector<2x32xf32>
    %160 = arith.mulf %155, %159 : vector<2x32xf32>
    %c0_80 = arith.constant 0 : index
    %c0_81 = arith.constant 0 : index
    %c0_82 = arith.constant 0 : index
    %161 = vector.load %arg13[%c0_80, %c0_81, %c0_82] : memref<2x2x32xf32, #tpu.memory_space<vmem>>, vector<1x2x32xf32>
    %162 = vector.shape_cast %161 : vector<1x2x32xf32> to vector<2x32xf32>
    %163 = vector.shape_cast %160 : vector<2x32xf32> to vector<1x2x32xf32>
    tpu.vector_store %arg13[%c0_80, %c0_81, %c0_82], %163 {strides = array<i32>} : memref<2x2x32xf32, #tpu.memory_space<vmem>>, vector<1x2x32xf32>,
    %c0_83 = arith.constant 0 : index
    %c0_84 = arith.constant 0 : index
    %c0_85 = arith.constant 0 : index
    %164 = vector.load %arg14[%c0_83, %c0_84, %c0_85] : memref<2x2x32xf32, #tpu.memory_space<vmem>>, vector<1x2x32xf32>
    %165 = vector.shape_cast %164 : vector<1x2x32xf32> to vector<2x32xf32>
    %166 = vector.shape_cast %158 : vector<2x32xf32> to vector<1x2x32xf32>
    tpu.vector_store %arg14[%c0_83, %c0_84, %c0_85], %166 {strides = array<i32>} : memref<2x2x32xf32, #tpu.memory_space<vmem>>, vector<1x2x32xf32>,
    %167 = arith.truncf %160 : vector<2x32xf32> to vector<2x32xbf16>
    %c1_86 = arith.constant 1 : index
    %c0_87 = arith.constant 0 : index
    %c0_88 = arith.constant 0 : index
    %168 = vector.load %arg13[%c1_86, %c0_87, %c0_88] : memref<2x2x32xf32, #tpu.memory_space<vmem>>, vector<1x2x32xf32>
    %169 = vector.shape_cast %168 : vector<1x2x32xf32> to vector<2x32xf32>
    %c1_89 = arith.constant 1 : index
    %c0_90 = arith.constant 0 : index
    %c0_91 = arith.constant 0 : index
    %170 = vector.load %arg14[%c1_89, %c0_90, %c0_91] : memref<2x2x32xf32, #tpu.memory_space<vmem>>, vector<1x2x32xf32>
    %171 = vector.shape_cast %170 : vector<1x2x32xf32> to vector<2x32xf32>
    %172 = arith.truncf %169 : vector<2x32xf32> to vector<2x32xbf16>
    %c1_92 = arith.constant 1 : index
    %c0_93 = arith.constant 0 : index
    %c0_94 = arith.constant 0 : index
    %173 = vector.load %arg4[%c1_92, %c0_93, %c0_94] : memref<2x32x128xbf16, #tpu.memory_space<vmem>>, vector<1x32x128xbf16>
    %174 = vector.shape_cast %173 : vector<1x32x128xbf16> to vector<32x128xbf16>
    %cst_95 = arith.constant dense<0.000000e+00> : vector<2x128xf32>
    %175 = tpu.matmul %172, %174, %cst_95 {dimension_numbers = #tpu.dot_dimension_numbers<[1], [0], [0], [1], [0, 0, 1, 1], [], []>} : vector<2x32xbf16>, vector<32x128xbf16>, vector<2x128xf32> -> vector<2x128xf32>
    %c0_96 = arith.constant 0 : index
    %c0_97 = arith.constant 0 : index
    %c0_98 = arith.constant 0 : index
    %176 = vector.load %arg3[%c0_96, %c0_97, %c0_98] : memref<1x32x128xbf16, #tpu.memory_space<vmem>>, vector<1x32x128xbf16>
    %177 = vector.shape_cast %176 : vector<1x32x128xbf16> to vector<32x128xbf16>
    %cst_99 = arith.constant dense<0.000000e+00> : vector<2x128xf32>
    %178 = tpu.matmul %167, %177, %cst_99 {dimension_numbers = #tpu.dot_dimension_numbers<[1], [0], [0], [1], [0, 0, 1, 1], [], []>} : vector<2x32xbf16>, vector<32x128xbf16>, vector<2x128xf32> -> vector<2x128xf32>
    %179 = arith.addf %178, %175 : vector<2x128xf32>
    %c1_100 = arith.constant 1 : index
    %c0_101 = arith.constant 0 : index
    %c0_102 = arith.constant 0 : index
    %180 = vector.load %arg5[%c1_100, %c0_101, %c0_102] : memref<2x1x128xf32, #tpu.memory_space<vmem>>, vector<1x1x128xf32>
    %181 = vector.shape_cast %180 : vector<1x1x128xf32> to vector<1x128xf32>
    %182 = vector.broadcast %181 : vector<1x128xf32> to vector<2x128xf32>
    %183 = arith.addf %179, %182 : vector<2x128xf32>
    %184 = vector.extract_strided_slice %183 {offsets = [0, 0], sizes = [2, 32], strides = [1, 1]} : vector<2x128xf32> to vector<2x32xf32>
    %185 = arith.negf %184 : vector<2x32xf32>
    %186 = math.exp %185 : vector<2x32xf32>
    %cst_103 = arith.constant 1.000000e+00 : f32
    %187 = vector.broadcast %cst_103 : f32 to vector<2x32xf32>
    %188 = arith.addf %187, %186 : vector<2x32xf32>
    %189 = arith.divf %187, %188 : vector<2x32xf32>
    %190 = vector.extract_strided_slice %183 {offsets = [0, 32], sizes = [2, 32], strides = [1, 1]} : vector<2x128xf32> to vector<2x32xf32>
    %191 = arith.negf %190 : vector<2x32xf32>
    %192 = math.exp %191 : vector<2x32xf32>
    %cst_104 = arith.constant 1.000000e+00 : f32
    %193 = vector.broadcast %cst_104 : f32 to vector<2x32xf32>
    %194 = arith.addf %193, %192 : vector<2x32xf32>
    %195 = arith.divf %193, %194 : vector<2x32xf32>
    %196 = vector.extract_strided_slice %183 {offsets = [0, 64], sizes = [2, 32], strides = [1, 1]} : vector<2x128xf32> to vector<2x32xf32>
    %197 = math.tanh %196 : vector<2x32xf32>
    %198 = vector.extract_strided_slice %183 {offsets = [0, 96], sizes = [2, 32], strides = [1, 1]} : vector<2x128xf32> to vector<2x32xf32>
    %199 = arith.negf %198 : vector<2x32xf32>
    %200 = math.exp %199 : vector<2x32xf32>
    %cst_105 = arith.constant 1.000000e+00 : f32
    %201 = vector.broadcast %cst_105 : f32 to vector<2x32xf32>
    %202 = arith.addf %201, %200 : vector<2x32xf32>
    %203 = arith.divf %201, %202 : vector<2x32xf32>
    %204 = arith.mulf %195, %171 : vector<2x32xf32>
    %205 = arith.mulf %189, %197 : vector<2x32xf32>
    %206 = arith.addf %204, %205 : vector<2x32xf32>
    %207 = math.tanh %206 : vector<2x32xf32>
    %208 = arith.mulf %203, %207 : vector<2x32xf32>
    %c1_106 = arith.constant 1 : index
    %c0_107 = arith.constant 0 : index
    %c0_108 = arith.constant 0 : index
    %209 = vector.load %arg13[%c1_106, %c0_107, %c0_108] : memref<2x2x32xf32, #tpu.memory_space<vmem>>, vector<1x2x32xf32>
    %210 = vector.shape_cast %209 : vector<1x2x32xf32> to vector<2x32xf32>
    %211 = vector.shape_cast %208 : vector<2x32xf32> to vector<1x2x32xf32>
    tpu.vector_store %arg13[%c1_106, %c0_107, %c0_108], %211 {strides = array<i32>} : memref<2x2x32xf32, #tpu.memory_space<vmem>>, vector<1x2x32xf32>,
    %c1_109 = arith.constant 1 : index
    %c0_110 = arith.constant 0 : index
    %c0_111 = arith.constant 0 : index
    %212 = vector.load %arg14[%c1_109, %c0_110, %c0_111] : memref<2x2x32xf32, #tpu.memory_space<vmem>>, vector<1x2x32xf32>
    %213 = vector.shape_cast %212 : vector<1x2x32xf32> to vector<2x32xf32>
    %214 = vector.shape_cast %206 : vector<2x32xf32> to vector<1x2x32xf32>
    tpu.vector_store %arg14[%c1_109, %c0_110, %c0_111], %214 {strides = array<i32>} : memref<2x2x32xf32, #tpu.memory_space<vmem>>, vector<1x2x32xf32>,
    %215 = arith.truncf %208 : vector<2x32xf32> to vector<2x32xbf16>
    %c0_112 = arith.constant 0 : index
    %c0_113 = arith.constant 0 : index
    %216 = vector.load %arg6[%c0_112, %c0_113] : memref<32x4xbf16, #tpu.memory_space<vmem>>, vector<32x4xbf16>
    %cst_114 = arith.constant dense<0.000000e+00> : vector<2x4xf32>
    %217 = tpu.matmul %215, %216, %cst_114 {dimension_numbers = #tpu.dot_dimension_numbers<[1], [0], [0], [1], [0, 0, 1, 1], [], []>} : vector<2x32xbf16>, vector<32x4xbf16>, vector<2x4xf32> -> vector<2x4xf32>
    %cst_115 = arith.constant dense<0xFF800000> : vector<2xf32>
    %218 = vector.multi_reduction <maximumf>, %217, %cst_115 [1] : vector<2x4xf32> to vector<2xf32>
    %219 = vector.shape_cast %218 : vector<2xf32> to vector<2x1xf32>
    %220 = vector.broadcast %219 : vector<2x1xf32> to vector<2x4xf32>
    %221 = arith.subf %217, %220 : vector<2x4xf32>
    %222 = math.exp %221 : vector<2x4xf32>
    %cst_116 = arith.constant dense<0.000000e+00> : vector<2xf32>
    %223 = vector.multi_reduction <add>, %222, %cst_116 [1] : vector<2x4xf32> to vector<2xf32>
    %224 = vector.shape_cast %223 : vector<2xf32> to vector<2x1xf32>
    %225 = tpu.reciprocal %224 {approx = true} : vector<2x1xf32> -> vector<2x1xf32>
    %226 = vector.broadcast %225 : vector<2x1xf32> to vector<2x4xf32>
    %227 = arith.mulf %222, %226 : vector<2x4xf32>
    %228 = arith.truncf %217 : vector<2x4xf32> to vector<2x4xbf16>
    %c0_117 = arith.constant 0 : index
    %c0_118 = arith.constant 0 : index
    %229 = vector.load %arg7[%c0_117, %c0_118] : memref<4x4xbf16, #tpu.memory_space<vmem>>, vector<4x4xbf16>
    %cst_119 = arith.constant dense<0.000000e+00> : vector<2x4xf32>
    %230 = tpu.matmul %228, %229, %cst_119 {dimension_numbers = #tpu.dot_dimension_numbers<[1], [0], [0], [1], [0, 0, 1, 1], [], []>} : vector<2x4xbf16>, vector<4x4xbf16>, vector<2x4xf32> -> vector<2x4xf32>
    %c0_120 = arith.constant 0 : index
    %c0_121 = arith.constant 0 : index
    %231 = vector.load %arg8[%c0_120, %c0_121] : memref<1x4xf32, #tpu.memory_space<vmem>>, vector<1x4xf32>
    %232 = vector.broadcast %231 : vector<1x4xf32> to vector<2x4xf32>
    %233 = arith.addf %230, %232 : vector<2x4xf32>
    %c0_122 = arith.constant 0 : index
    %234 = arith.index_cast %c1_i32 : i32 to index
    %c0_123 = arith.constant 0 : index
    %c0_124 = arith.constant 0 : index
    %235 = vector.load %arg11[%c0_122, %234, %c0_123, %c0_124] : memref<1x8x2x4xf32, #tpu.memory_space<vmem>>, vector<1x1x2x4xf32>
    %236 = vector.shape_cast %235 : vector<1x1x2x4xf32> to vector<2x4xf32>
    %237 = vector.shape_cast %227 : vector<2x4xf32> to vector<1x1x2x4xf32>
    tpu.vector_store %arg11[%c0_122, %234, %c0_123, %c0_124], %237 {strides = array<i32>} : memref<1x8x2x4xf32, #tpu.memory_space<vmem>>, vector<1x1x2x4xf32>,
    %238 = arith.mulf %233, %227 : vector<2x4xf32>
    %cst_125 = arith.constant dense<0.000000e+00> : vector<2xf32>
    %239 = vector.multi_reduction <add>, %238, %cst_125 [1] : vector<2x4xf32> to vector<2xf32>
    %240 = vector.shape_cast %239 : vector<2xf32> to vector<1x2xf32>
    %c0_126 = arith.constant 0 : index
    %c0_127 = arith.constant 0 : index
    %241 = arith.index_cast %c1_i32 : i32 to index
    %c0_128 = arith.constant 0 : index
    %242 = vector.load %arg12[%c0_126, %c0_127, %241, %c0_128] : memref<1x1x8x2xf32, #tpu.memory_space<vmem>>, vector<1x1x1x2xf32>
    %243 = vector.shape_cast %242 : vector<1x1x1x2xf32> to vector<1x2xf32>
    %244 = vector.shape_cast %240 : vector<1x2xf32> to vector<1x1x1x2xf32>
    tpu.vector_store %arg12[%c0_126, %c0_127, %241, %c0_128], %244 {strides = array<i32>} : memref<1x1x8x2xf32, #tpu.memory_space<vmem>>, vector<1x1x1x2xf32>,
    %c2_i32 = arith.constant 2 : i32
    %c0_129 = arith.constant 0 : index
    %245 = arith.index_cast %c2_i32 : i32 to index
    %c0_130 = arith.constant 0 : index
    %c0_131 = arith.constant 0 : index
    %246 = vector.load %arg2[%c0_129, %245, %c0_130, %c0_131] : memref<1x8x2x128xf32, #tpu.memory_space<vmem>>, vector<1x1x2x128xf32>
    %247 = vector.shape_cast %246 : vector<1x1x2x128xf32> to vector<2x128xf32>
    %c0_132 = arith.constant 0 : index
    %c0_133 = arith.constant 0 : index
    %c0_134 = arith.constant 0 : index
    %248 = vector.load %arg13[%c0_132, %c0_133, %c0_134] : memref<2x2x32xf32, #tpu.memory_space<vmem>>, vector<1x2x32xf32>
    %249 = vector.shape_cast %248 : vector<1x2x32xf32> to vector<2x32xf32>
    %c0_135 = arith.constant 0 : index
    %c0_136 = arith.constant 0 : index
    %c0_137 = arith.constant 0 : index
    %250 = vector.load %arg14[%c0_135, %c0_136, %c0_137] : memref<2x2x32xf32, #tpu.memory_space<vmem>>, vector<1x2x32xf32>
    %251 = vector.shape_cast %250 : vector<1x2x32xf32> to vector<2x32xf32>
    %252 = arith.truncf %249 : vector<2x32xf32> to vector<2x32xbf16>
    %c0_138 = arith.constant 0 : index
    %c0_139 = arith.constant 0 : index
    %c0_140 = arith.constant 0 : index
    %253 = vector.load %arg4[%c0_138, %c0_139, %c0_140] : memref<2x32x128xbf16, #tpu.memory_space<vmem>>, vector<1x32x128xbf16>
    %254 = vector.shape_cast %253 : vector<1x32x128xbf16> to vector<32x128xbf16>
    %cst_141 = arith.constant dense<0.000000e+00> : vector<2x128xf32>
    %255 = tpu.matmul %252, %254, %cst_141 {dimension_numbers = #tpu.dot_dimension_numbers<[1], [0], [0], [1], [0, 0, 1, 1], [], []>} : vector<2x32xbf16>, vector<32x128xbf16>, vector<2x128xf32> -> vector<2x128xf32>
    %256 = arith.addf %247, %255 : vector<2x128xf32>
    %257 = vector.extract_strided_slice %256 {offsets = [0, 0], sizes = [2, 32], strides = [1, 1]} : vector<2x128xf32> to vector<2x32xf32>
    %258 = arith.negf %257 : vector<2x32xf32>
    %259 = math.exp %258 : vector<2x32xf32>
    %cst_142 = arith.constant 1.000000e+00 : f32
    %260 = vector.broadcast %cst_142 : f32 to vector<2x32xf32>
    %261 = arith.addf %260, %259 : vector<2x32xf32>
    %262 = arith.divf %260, %261 : vector<2x32xf32>
    %263 = vector.extract_strided_slice %256 {offsets = [0, 32], sizes = [2, 32], strides = [1, 1]} : vector<2x128xf32> to vector<2x32xf32>
    %264 = arith.negf %263 : vector<2x32xf32>
    %265 = math.exp %264 : vector<2x32xf32>
    %cst_143 = arith.constant 1.000000e+00 : f32
    %266 = vector.broadcast %cst_143 : f32 to vector<2x32xf32>
    %267 = arith.addf %266, %265 : vector<2x32xf32>
    %268 = arith.divf %266, %267 : vector<2x32xf32>
    %269 = vector.extract_strided_slice %256 {offsets = [0, 64], sizes = [2, 32], strides = [1, 1]} : vector<2x128xf32> to vector<2x32xf32>
    %270 = math.tanh %269 : vector<2x32xf32>
    %271 = vector.extract_strided_slice %256 {offsets = [0, 96], sizes = [2, 32], strides = [1, 1]} : vector<2x128xf32> to vector<2x32xf32>
    %272 = arith.negf %271 : vector<2x32xf32>
    %273 = math.exp %272 : vector<2x32xf32>
    %cst_144 = arith.constant 1.000000e+00 : f32
    %274 = vector.broadcast %cst_144 : f32 to vector<2x32xf32>
    %275 = arith.addf %274, %273 : vector<2x32xf32>
    %276 = arith.divf %274, %275 : vector<2x32xf32>
    %277 = arith.mulf %268, %251 : vector<2x32xf32>
    %278 = arith.mulf %262, %270 : vector<2x32xf32>
    %279 = arith.addf %277, %278 : vector<2x32xf32>
    %280 = math.tanh %279 : vector<2x32xf32>
    %281 = arith.mulf %276, %280 : vector<2x32xf32>
    %c0_145 = arith.constant 0 : index
    %c0_146 = arith.constant 0 : index
    %c0_147 = arith.constant 0 : index
    %282 = vector.load %arg13[%c0_145, %c0_146, %c0_147] : memref<2x2x32xf32, #tpu.memory_space<vmem>>, vector<1x2x32xf32>
    %283 = vector.shape_cast %282 : vector<1x2x32xf32> to vector<2x32xf32>
    %284 = vector.shape_cast %281 : vector<2x32xf32> to vector<1x2x32xf32>
    tpu.vector_store %arg13[%c0_145, %c0_146, %c0_147], %284 {strides = array<i32>} : memref<2x2x32xf32, #tpu.memory_space<vmem>>, vector<1x2x32xf32>,
    %c0_148 = arith.constant 0 : index
    %c0_149 = arith.constant 0 : index
    %c0_150 = arith.constant 0 : index
    %285 = vector.load %arg14[%c0_148, %c0_149, %c0_150] : memref<2x2x32xf32, #tpu.memory_space<vmem>>, vector<1x2x32xf32>
    %286 = vector.shape_cast %285 : vector<1x2x32xf32> to vector<2x32xf32>
    %287 = vector.shape_cast %279 : vector<2x32xf32> to vector<1x2x32xf32>
    tpu.vector_store %arg14[%c0_148, %c0_149, %c0_150], %287 {strides = array<i32>} : memref<2x2x32xf32, #tpu.memory_space<vmem>>, vector<1x2x32xf32>,
    %288 = arith.truncf %281 : vector<2x32xf32> to vector<2x32xbf16>
    %c1_151 = arith.constant 1 : index
    %c0_152 = arith.constant 0 : index
    %c0_153 = arith.constant 0 : index
    %289 = vector.load %arg13[%c1_151, %c0_152, %c0_153] : memref<2x2x32xf32, #tpu.memory_space<vmem>>, vector<1x2x32xf32>
    %290 = vector.shape_cast %289 : vector<1x2x32xf32> to vector<2x32xf32>
    %c1_154 = arith.constant 1 : index
    %c0_155 = arith.constant 0 : index
    %c0_156 = arith.constant 0 : index
    %291 = vector.load %arg14[%c1_154, %c0_155, %c0_156] : memref<2x2x32xf32, #tpu.memory_space<vmem>>, vector<1x2x32xf32>
    %292 = vector.shape_cast %291 : vector<1x2x32xf32> to vector<2x32xf32>
    %293 = arith.truncf %290 : vector<2x32xf32> to vector<2x32xbf16>
    %c1_157 = arith.constant 1 : index
    %c0_158 = arith.constant 0 : index
    %c0_159 = arith.constant 0 : index
    %294 = vector.load %arg4[%c1_157, %c0_158, %c0_159] : memref<2x32x128xbf16, #tpu.memory_space<vmem>>, vector<1x32x128xbf16>
    %295 = vector.shape_cast %294 : vector<1x32x128xbf16> to vector<32x128xbf16>
    %cst_160 = arith.constant dense<0.000000e+00> : vector<2x128xf32>
    %296 = tpu.matmul %293, %295, %cst_160 {dimension_numbers = #tpu.dot_dimension_numbers<[1], [0], [0], [1], [0, 0, 1, 1], [], []>} : vector<2x32xbf16>, vector<32x128xbf16>, vector<2x128xf32> -> vector<2x128xf32>
    %c0_161 = arith.constant 0 : index
    %c0_162 = arith.constant 0 : index
    %c0_163 = arith.constant 0 : index
    %297 = vector.load %arg3[%c0_161, %c0_162, %c0_163] : memref<1x32x128xbf16, #tpu.memory_space<vmem>>, vector<1x32x128xbf16>
    %298 = vector.shape_cast %297 : vector<1x32x128xbf16> to vector<32x128xbf16>
    %cst_164 = arith.constant dense<0.000000e+00> : vector<2x128xf32>
    %299 = tpu.matmul %288, %298, %cst_164 {dimension_numbers = #tpu.dot_dimension_numbers<[1], [0], [0], [1], [0, 0, 1, 1], [], []>} : vector<2x32xbf16>, vector<32x128xbf16>, vector<2x128xf32> -> vector<2x128xf32>
    %300 = arith.addf %299, %296 : vector<2x128xf32>
    %c1_165 = arith.constant 1 : index
    %c0_166 = arith.constant 0 : index
    %c0_167 = arith.constant 0 : index
    %301 = vector.load %arg5[%c1_165, %c0_166, %c0_167] : memref<2x1x128xf32, #tpu.memory_space<vmem>>, vector<1x1x128xf32>
    %302 = vector.shape_cast %301 : vector<1x1x128xf32> to vector<1x128xf32>
    %303 = vector.broadcast %302 : vector<1x128xf32> to vector<2x128xf32>
    %304 = arith.addf %300, %303 : vector<2x128xf32>
    %305 = vector.extract_strided_slice %304 {offsets = [0, 0], sizes = [2, 32], strides = [1, 1]} : vector<2x128xf32> to vector<2x32xf32>
    %306 = arith.negf %305 : vector<2x32xf32>
    %307 = math.exp %306 : vector<2x32xf32>
    %cst_168 = arith.constant 1.000000e+00 : f32
    %308 = vector.broadcast %cst_168 : f32 to vector<2x32xf32>
    %309 = arith.addf %308, %307 : vector<2x32xf32>
    %310 = arith.divf %308, %309 : vector<2x32xf32>
    %311 = vector.extract_strided_slice %304 {offsets = [0, 32], sizes = [2, 32], strides = [1, 1]} : vector<2x128xf32> to vector<2x32xf32>
    %312 = arith.negf %311 : vector<2x32xf32>
    %313 = math.exp %312 : vector<2x32xf32>
    %cst_169 = arith.constant 1.000000e+00 : f32
    %314 = vector.broadcast %cst_169 : f32 to vector<2x32xf32>
    %315 = arith.addf %314, %313 : vector<2x32xf32>
    %316 = arith.divf %314, %315 : vector<2x32xf32>
    %317 = vector.extract_strided_slice %304 {offsets = [0, 64], sizes = [2, 32], strides = [1, 1]} : vector<2x128xf32> to vector<2x32xf32>
    %318 = math.tanh %317 : vector<2x32xf32>
    %319 = vector.extract_strided_slice %304 {offsets = [0, 96], sizes = [2, 32], strides = [1, 1]} : vector<2x128xf32> to vector<2x32xf32>
    %320 = arith.negf %319 : vector<2x32xf32>
    %321 = math.exp %320 : vector<2x32xf32>
    %cst_170 = arith.constant 1.000000e+00 : f32
    %322 = vector.broadcast %cst_170 : f32 to vector<2x32xf32>
    %323 = arith.addf %322, %321 : vector<2x32xf32>
    %324 = arith.divf %322, %323 : vector<2x32xf32>
    %325 = arith.mulf %316, %292 : vector<2x32xf32>
    %326 = arith.mulf %310, %318 : vector<2x32xf32>
    %327 = arith.addf %325, %326 : vector<2x32xf32>
    %328 = math.tanh %327 : vector<2x32xf32>
    %329 = arith.mulf %324, %328 : vector<2x32xf32>
    %c1_171 = arith.constant 1 : index
    %c0_172 = arith.constant 0 : index
    %c0_173 = arith.constant 0 : index
    %330 = vector.load %arg13[%c1_171, %c0_172, %c0_173] : memref<2x2x32xf32, #tpu.memory_space<vmem>>, vector<1x2x32xf32>
    %331 = vector.shape_cast %330 : vector<1x2x32xf32> to vector<2x32xf32>
    %332 = vector.shape_cast %329 : vector<2x32xf32> to vector<1x2x32xf32>
    tpu.vector_store %arg13[%c1_171, %c0_172, %c0_173], %332 {strides = array<i32>} : memref<2x2x32xf32, #tpu.memory_space<vmem>>, vector<1x2x32xf32>,
    %c1_174 = arith.constant 1 : index
    %c0_175 = arith.constant 0 : index
    %c0_176 = arith.constant 0 : index
    %333 = vector.load %arg14[%c1_174, %c0_175, %c0_176] : memref<2x2x32xf32, #tpu.memory_space<vmem>>, vector<1x2x32xf32>
    %334 = vector.shape_cast %333 : vector<1x2x32xf32> to vector<2x32xf32>
    %335 = vector.shape_cast %327 : vector<2x32xf32> to vector<1x2x32xf32>
    tpu.vector_store %arg14[%c1_174, %c0_175, %c0_176], %335 {strides = array<i32>} : memref<2x2x32xf32, #tpu.memory_space<vmem>>, vector<1x2x32xf32>,
    %336 = arith.truncf %329 : vector<2x32xf32> to vector<2x32xbf16>
    %c0_177 = arith.constant 0 : index
    %c0_178 = arith.constant 0 : index
    %337 = vector.load %arg6[%c0_177, %c0_178] : memref<32x4xbf16, #tpu.memory_space<vmem>>, vector<32x4xbf16>
    %cst_179 = arith.constant dense<0.000000e+00> : vector<2x4xf32>
    %338 = tpu.matmul %336, %337, %cst_179 {dimension_numbers = #tpu.dot_dimension_numbers<[1], [0], [0], [1], [0, 0, 1, 1], [], []>} : vector<2x32xbf16>, vector<32x4xbf16>, vector<2x4xf32> -> vector<2x4xf32>
    %cst_180 = arith.constant dense<0xFF800000> : vector<2xf32>
    %339 = vector.multi_reduction <maximumf>, %338, %cst_180 [1] : vector<2x4xf32> to vector<2xf32>
    %340 = vector.shape_cast %339 : vector<2xf32> to vector<2x1xf32>
    %341 = vector.broadcast %340 : vector<2x1xf32> to vector<2x4xf32>
    %342 = arith.subf %338, %341 : vector<2x4xf32>
    %343 = math.exp %342 : vector<2x4xf32>
    %cst_181 = arith.constant dense<0.000000e+00> : vector<2xf32>
    %344 = vector.multi_reduction <add>, %343, %cst_181 [1] : vector<2x4xf32> to vector<2xf32>
    %345 = vector.shape_cast %344 : vector<2xf32> to vector<2x1xf32>
    %346 = tpu.reciprocal %345 {approx = true} : vector<2x1xf32> -> vector<2x1xf32>
    %347 = vector.broadcast %346 : vector<2x1xf32> to vector<2x4xf32>
    %348 = arith.mulf %343, %347 : vector<2x4xf32>
    %349 = arith.truncf %338 : vector<2x4xf32> to vector<2x4xbf16>
    %c0_182 = arith.constant 0 : index
    %c0_183 = arith.constant 0 : index
    %350 = vector.load %arg7[%c0_182, %c0_183] : memref<4x4xbf16, #tpu.memory_space<vmem>>, vector<4x4xbf16>
    %cst_184 = arith.constant dense<0.000000e+00> : vector<2x4xf32>
    %351 = tpu.matmul %349, %350, %cst_184 {dimension_numbers = #tpu.dot_dimension_numbers<[1], [0], [0], [1], [0, 0, 1, 1], [], []>} : vector<2x4xbf16>, vector<4x4xbf16>, vector<2x4xf32> -> vector<2x4xf32>
    %c0_185 = arith.constant 0 : index
    %c0_186 = arith.constant 0 : index
    %352 = vector.load %arg8[%c0_185, %c0_186] : memref<1x4xf32, #tpu.memory_space<vmem>>, vector<1x4xf32>
    %353 = vector.broadcast %352 : vector<1x4xf32> to vector<2x4xf32>
    %354 = arith.addf %351, %353 : vector<2x4xf32>
    %c0_187 = arith.constant 0 : index
    %355 = arith.index_cast %c2_i32 : i32 to index
    %c0_188 = arith.constant 0 : index
    %c0_189 = arith.constant 0 : index
    %356 = vector.load %arg11[%c0_187, %355, %c0_188, %c0_189] : memref<1x8x2x4xf32, #tpu.memory_space<vmem>>, vector<1x1x2x4xf32>
    %357 = vector.shape_cast %356 : vector<1x1x2x4xf32> to vector<2x4xf32>
    %358 = vector.shape_cast %348 : vector<2x4xf32> to vector<1x1x2x4xf32>
    tpu.vector_store %arg11[%c0_187, %355, %c0_188, %c0_189], %358 {strides = array<i32>} : memref<1x8x2x4xf32, #tpu.memory_space<vmem>>, vector<1x1x2x4xf32>,
    %359 = arith.mulf %354, %348 : vector<2x4xf32>
    %cst_190 = arith.constant dense<0.000000e+00> : vector<2xf32>
    %360 = vector.multi_reduction <add>, %359, %cst_190 [1] : vector<2x4xf32> to vector<2xf32>
    %361 = vector.shape_cast %360 : vector<2xf32> to vector<1x2xf32>
    %c0_191 = arith.constant 0 : index
    %c0_192 = arith.constant 0 : index
    %362 = arith.index_cast %c2_i32 : i32 to index
    %c0_193 = arith.constant 0 : index
    %363 = vector.load %arg12[%c0_191, %c0_192, %362, %c0_193] : memref<1x1x8x2xf32, #tpu.memory_space<vmem>>, vector<1x1x1x2xf32>
    %364 = vector.shape_cast %363 : vector<1x1x1x2xf32> to vector<1x2xf32>
    %365 = vector.shape_cast %361 : vector<1x2xf32> to vector<1x1x1x2xf32>
    tpu.vector_store %arg12[%c0_191, %c0_192, %362, %c0_193], %365 {strides = array<i32>} : memref<1x1x8x2xf32, #tpu.memory_space<vmem>>, vector<1x1x1x2xf32>,
    %c3_i32 = arith.constant 3 : i32
    %c0_194 = arith.constant 0 : index
    %366 = arith.index_cast %c3_i32 : i32 to index
    %c0_195 = arith.constant 0 : index
    %c0_196 = arith.constant 0 : index
    %367 = vector.load %arg2[%c0_194, %366, %c0_195, %c0_196] : memref<1x8x2x128xf32, #tpu.memory_space<vmem>>, vector<1x1x2x128xf32>
    %368 = vector.shape_cast %367 : vector<1x1x2x128xf32> to vector<2x128xf32>
    %c0_197 = arith.constant 0 : index
    %c0_198 = arith.constant 0 : index
    %c0_199 = arith.constant 0 : index
    %369 = vector.load %arg13[%c0_197, %c0_198, %c0_199] : memref<2x2x32xf32, #tpu.memory_space<vmem>>, vector<1x2x32xf32>
    %370 = vector.shape_cast %369 : vector<1x2x32xf32> to vector<2x32xf32>
    %c0_200 = arith.constant 0 : index
    %c0_201 = arith.constant 0 : index
    %c0_202 = arith.constant 0 : index
    %371 = vector.load %arg14[%c0_200, %c0_201, %c0_202] : memref<2x2x32xf32, #tpu.memory_space<vmem>>, vector<1x2x32xf32>
    %372 = vector.shape_cast %371 : vector<1x2x32xf32> to vector<2x32xf32>
    %373 = arith.truncf %370 : vector<2x32xf32> to vector<2x32xbf16>
    %c0_203 = arith.constant 0 : index
    %c0_204 = arith.constant 0 : index
    %c0_205 = arith.constant 0 : index
    %374 = vector.load %arg4[%c0_203, %c0_204, %c0_205] : memref<2x32x128xbf16, #tpu.memory_space<vmem>>, vector<1x32x128xbf16>
    %375 = vector.shape_cast %374 : vector<1x32x128xbf16> to vector<32x128xbf16>
    %cst_206 = arith.constant dense<0.000000e+00> : vector<2x128xf32>
    %376 = tpu.matmul %373, %375, %cst_206 {dimension_numbers = #tpu.dot_dimension_numbers<[1], [0], [0], [1], [0, 0, 1, 1], [], []>} : vector<2x32xbf16>, vector<32x128xbf16>, vector<2x128xf32> -> vector<2x128xf32>
    %377 = arith.addf %368, %376 : vector<2x128xf32>
    %378 = vector.extract_strided_slice %377 {offsets = [0, 0], sizes = [2, 32], strides = [1, 1]} : vector<2x128xf32> to vector<2x32xf32>
    %379 = arith.negf %378 : vector<2x32xf32>
    %380 = math.exp %379 : vector<2x32xf32>
    %cst_207 = arith.constant 1.000000e+00 : f32
    %381 = vector.broadcast %cst_207 : f32 to vector<2x32xf32>
    %382 = arith.addf %381, %380 : vector<2x32xf32>
    %383 = arith.divf %381, %382 : vector<2x32xf32>
    %384 = vector.extract_strided_slice %377 {offsets = [0, 32], sizes = [2, 32], strides = [1, 1]} : vector<2x128xf32> to vector<2x32xf32>
    %385 = arith.negf %384 : vector<2x32xf32>
    %386 = math.exp %385 : vector<2x32xf32>
    %cst_208 = arith.constant 1.000000e+00 : f32
    %387 = vector.broadcast %cst_208 : f32 to vector<2x32xf32>
    %388 = arith.addf %387, %386 : vector<2x32xf32>
    %389 = arith.divf %387, %388 : vector<2x32xf32>
    %390 = vector.extract_strided_slice %377 {offsets = [0, 64], sizes = [2, 32], strides = [1, 1]} : vector<2x128xf32> to vector<2x32xf32>
    %391 = math.tanh %390 : vector<2x32xf32>
    %392 = vector.extract_strided_slice %377 {offsets = [0, 96], sizes = [2, 32], strides = [1, 1]} : vector<2x128xf32> to vector<2x32xf32>
    %393 = arith.negf %392 : vector<2x32xf32>
    %394 = math.exp %393 : vector<2x32xf32>
    %cst_209 = arith.constant 1.000000e+00 : f32
    %395 = vector.broadcast %cst_209 : f32 to vector<2x32xf32>
    %396 = arith.addf %395, %394 : vector<2x32xf32>
    %397 = arith.divf %395, %396 : vector<2x32xf32>
    %398 = arith.mulf %389, %372 : vector<2x32xf32>
    %399 = arith.mulf %383, %391 : vector<2x32xf32>
    %400 = arith.addf %398, %399 : vector<2x32xf32>
    %401 = math.tanh %400 : vector<2x32xf32>
    %402 = arith.mulf %397, %401 : vector<2x32xf32>
    %c0_210 = arith.constant 0 : index
    %c0_211 = arith.constant 0 : index
    %c0_212 = arith.constant 0 : index
    %403 = vector.load %arg13[%c0_210, %c0_211, %c0_212] : memref<2x2x32xf32, #tpu.memory_space<vmem>>, vector<1x2x32xf32>
    %404 = vector.shape_cast %403 : vector<1x2x32xf32> to vector<2x32xf32>
    %405 = vector.shape_cast %402 : vector<2x32xf32> to vector<1x2x32xf32>
    tpu.vector_store %arg13[%c0_210, %c0_211, %c0_212], %405 {strides = array<i32>} : memref<2x2x32xf32, #tpu.memory_space<vmem>>, vector<1x2x32xf32>,
    %c0_213 = arith.constant 0 : index
    %c0_214 = arith.constant 0 : index
    %c0_215 = arith.constant 0 : index
    %406 = vector.load %arg14[%c0_213, %c0_214, %c0_215] : memref<2x2x32xf32, #tpu.memory_space<vmem>>, vector<1x2x32xf32>
    %407 = vector.shape_cast %406 : vector<1x2x32xf32> to vector<2x32xf32>
    %408 = vector.shape_cast %400 : vector<2x32xf32> to vector<1x2x32xf32>
    tpu.vector_store %arg14[%c0_213, %c0_214, %c0_215], %408 {strides = array<i32>} : memref<2x2x32xf32, #tpu.memory_space<vmem>>, vector<1x2x32xf32>,
    %409 = arith.truncf %402 : vector<2x32xf32> to vector<2x32xbf16>
    %c1_216 = arith.constant 1 : index
    %c0_217 = arith.constant 0 : index
    %c0_218 = arith.constant 0 : index
    %410 = vector.load %arg13[%c1_216, %c0_217, %c0_218] : memref<2x2x32xf32, #tpu.memory_space<vmem>>, vector<1x2x32xf32>
    %411 = vector.shape_cast %410 : vector<1x2x32xf32> to vector<2x32xf32>
    %c1_219 = arith.constant 1 : index
    %c0_220 = arith.constant 0 : index
    %c0_221 = arith.constant 0 : index
    %412 = vector.load %arg14[%c1_219, %c0_220, %c0_221] : memref<2x2x32xf32, #tpu.memory_space<vmem>>, vector<1x2x32xf32>
    %413 = vector.shape_cast %412 : vector<1x2x32xf32> to vector<2x32xf32>
    %414 = arith.truncf %411 : vector<2x32xf32> to vector<2x32xbf16>
    %c1_222 = arith.constant 1 : index
    %c0_223 = arith.constant 0 : index
    %c0_224 = arith.constant 0 : index
    %415 = vector.load %arg4[%c1_222, %c0_223, %c0_224] : memref<2x32x128xbf16, #tpu.memory_space<vmem>>, vector<1x32x128xbf16>
    %416 = vector.shape_cast %415 : vector<1x32x128xbf16> to vector<32x128xbf16>
    %cst_225 = arith.constant dense<0.000000e+00> : vector<2x128xf32>
    %417 = tpu.matmul %414, %416, %cst_225 {dimension_numbers = #tpu.dot_dimension_numbers<[1], [0], [0], [1], [0, 0, 1, 1], [], []>} : vector<2x32xbf16>, vector<32x128xbf16>, vector<2x128xf32> -> vector<2x128xf32>
    %c0_226 = arith.constant 0 : index
    %c0_227 = arith.constant 0 : index
    %c0_228 = arith.constant 0 : index
    %418 = vector.load %arg3[%c0_226, %c0_227, %c0_228] : memref<1x32x128xbf16, #tpu.memory_space<vmem>>, vector<1x32x128xbf16>
    %419 = vector.shape_cast %418 : vector<1x32x128xbf16> to vector<32x128xbf16>
    %cst_229 = arith.constant dense<0.000000e+00> : vector<2x128xf32>
    %420 = tpu.matmul %409, %419, %cst_229 {dimension_numbers = #tpu.dot_dimension_numbers<[1], [0], [0], [1], [0, 0, 1, 1], [], []>} : vector<2x32xbf16>, vector<32x128xbf16>, vector<2x128xf32> -> vector<2x128xf32>
    %421 = arith.addf %420, %417 : vector<2x128xf32>
    %c1_230 = arith.constant 1 : index
    %c0_231 = arith.constant 0 : index
    %c0_232 = arith.constant 0 : index
    %422 = vector.load %arg5[%c1_230, %c0_231, %c0_232] : memref<2x1x128xf32, #tpu.memory_space<vmem>>, vector<1x1x128xf32>
    %423 = vector.shape_cast %422 : vector<1x1x128xf32> to vector<1x128xf32>
    %424 = vector.broadcast %423 : vector<1x128xf32> to vector<2x128xf32>
    %425 = arith.addf %421, %424 : vector<2x128xf32>
    %426 = vector.extract_strided_slice %425 {offsets = [0, 0], sizes = [2, 32], strides = [1, 1]} : vector<2x128xf32> to vector<2x32xf32>
    %427 = arith.negf %426 : vector<2x32xf32>
    %428 = math.exp %427 : vector<2x32xf32>
    %cst_233 = arith.constant 1.000000e+00 : f32
    %429 = vector.broadcast %cst_233 : f32 to vector<2x32xf32>
    %430 = arith.addf %429, %428 : vector<2x32xf32>
    %431 = arith.divf %429, %430 : vector<2x32xf32>
    %432 = vector.extract_strided_slice %425 {offsets = [0, 32], sizes = [2, 32], strides = [1, 1]} : vector<2x128xf32> to vector<2x32xf32>
    %433 = arith.negf %432 : vector<2x32xf32>
    %434 = math.exp %433 : vector<2x32xf32>
    %cst_234 = arith.constant 1.000000e+00 : f32
    %435 = vector.broadcast %cst_234 : f32 to vector<2x32xf32>
    %436 = arith.addf %435, %434 : vector<2x32xf32>
    %437 = arith.divf %435, %436 : vector<2x32xf32>
    %438 = vector.extract_strided_slice %425 {offsets = [0, 64], sizes = [2, 32], strides = [1, 1]} : vector<2x128xf32> to vector<2x32xf32>
    %439 = math.tanh %438 : vector<2x32xf32>
    %440 = vector.extract_strided_slice %425 {offsets = [0, 96], sizes = [2, 32], strides = [1, 1]} : vector<2x128xf32> to vector<2x32xf32>
    %441 = arith.negf %440 : vector<2x32xf32>
    %442 = math.exp %441 : vector<2x32xf32>
    %cst_235 = arith.constant 1.000000e+00 : f32
    %443 = vector.broadcast %cst_235 : f32 to vector<2x32xf32>
    %444 = arith.addf %443, %442 : vector<2x32xf32>
    %445 = arith.divf %443, %444 : vector<2x32xf32>
    %446 = arith.mulf %437, %413 : vector<2x32xf32>
    %447 = arith.mulf %431, %439 : vector<2x32xf32>
    %448 = arith.addf %446, %447 : vector<2x32xf32>
    %449 = math.tanh %448 : vector<2x32xf32>
    %450 = arith.mulf %445, %449 : vector<2x32xf32>
    %c1_236 = arith.constant 1 : index
    %c0_237 = arith.constant 0 : index
    %c0_238 = arith.constant 0 : index
    %451 = vector.load %arg13[%c1_236, %c0_237, %c0_238] : memref<2x2x32xf32, #tpu.memory_space<vmem>>, vector<1x2x32xf32>
    %452 = vector.shape_cast %451 : vector<1x2x32xf32> to vector<2x32xf32>
    %453 = vector.shape_cast %450 : vector<2x32xf32> to vector<1x2x32xf32>
    tpu.vector_store %arg13[%c1_236, %c0_237, %c0_238], %453 {strides = array<i32>} : memref<2x2x32xf32, #tpu.memory_space<vmem>>, vector<1x2x32xf32>,
    %c1_239 = arith.constant 1 : index
    %c0_240 = arith.constant 0 : index
    %c0_241 = arith.constant 0 : index
    %454 = vector.load %arg14[%c1_239, %c0_240, %c0_241] : memref<2x2x32xf32, #tpu.memory_space<vmem>>, vector<1x2x32xf32>
    %455 = vector.shape_cast %454 : vector<1x2x32xf32> to vector<2x32xf32>
    %456 = vector.shape_cast %448 : vector<2x32xf32> to vector<1x2x32xf32>
    tpu.vector_store %arg14[%c1_239, %c0_240, %c0_241], %456 {strides = array<i32>} : memref<2x2x32xf32, #tpu.memory_space<vmem>>, vector<1x2x32xf32>,
    %457 = arith.truncf %450 : vector<2x32xf32> to vector<2x32xbf16>
    %c0_242 = arith.constant 0 : index
    %c0_243 = arith.constant 0 : index
    %458 = vector.load %arg6[%c0_242, %c0_243] : memref<32x4xbf16, #tpu.memory_space<vmem>>, vector<32x4xbf16>
    %cst_244 = arith.constant dense<0.000000e+00> : vector<2x4xf32>
    %459 = tpu.matmul %457, %458, %cst_244 {dimension_numbers = #tpu.dot_dimension_numbers<[1], [0], [0], [1], [0, 0, 1, 1], [], []>} : vector<2x32xbf16>, vector<32x4xbf16>, vector<2x4xf32> -> vector<2x4xf32>
    %cst_245 = arith.constant dense<0xFF800000> : vector<2xf32>
    %460 = vector.multi_reduction <maximumf>, %459, %cst_245 [1] : vector<2x4xf32> to vector<2xf32>
    %461 = vector.shape_cast %460 : vector<2xf32> to vector<2x1xf32>
    %462 = vector.broadcast %461 : vector<2x1xf32> to vector<2x4xf32>
    %463 = arith.subf %459, %462 : vector<2x4xf32>
    %464 = math.exp %463 : vector<2x4xf32>
    %cst_246 = arith.constant dense<0.000000e+00> : vector<2xf32>
    %465 = vector.multi_reduction <add>, %464, %cst_246 [1] : vector<2x4xf32> to vector<2xf32>
    %466 = vector.shape_cast %465 : vector<2xf32> to vector<2x1xf32>
    %467 = tpu.reciprocal %466 {approx = true} : vector<2x1xf32> -> vector<2x1xf32>
    %468 = vector.broadcast %467 : vector<2x1xf32> to vector<2x4xf32>
    %469 = arith.mulf %464, %468 : vector<2x4xf32>
    %470 = arith.truncf %459 : vector<2x4xf32> to vector<2x4xbf16>
    %c0_247 = arith.constant 0 : index
    %c0_248 = arith.constant 0 : index
    %471 = vector.load %arg7[%c0_247, %c0_248] : memref<4x4xbf16, #tpu.memory_space<vmem>>, vector<4x4xbf16>
    %cst_249 = arith.constant dense<0.000000e+00> : vector<2x4xf32>
    %472 = tpu.matmul %470, %471, %cst_249 {dimension_numbers = #tpu.dot_dimension_numbers<[1], [0], [0], [1], [0, 0, 1, 1], [], []>} : vector<2x4xbf16>, vector<4x4xbf16>, vector<2x4xf32> -> vector<2x4xf32>
    %c0_250 = arith.constant 0 : index
    %c0_251 = arith.constant 0 : index
    %473 = vector.load %arg8[%c0_250, %c0_251] : memref<1x4xf32, #tpu.memory_space<vmem>>, vector<1x4xf32>
    %474 = vector.broadcast %473 : vector<1x4xf32> to vector<2x4xf32>
    %475 = arith.addf %472, %474 : vector<2x4xf32>
    %c0_252 = arith.constant 0 : index
    %476 = arith.index_cast %c3_i32 : i32 to index
    %c0_253 = arith.constant 0 : index
    %c0_254 = arith.constant 0 : index
    %477 = vector.load %arg11[%c0_252, %476, %c0_253, %c0_254] : memref<1x8x2x4xf32, #tpu.memory_space<vmem>>, vector<1x1x2x4xf32>
    %478 = vector.shape_cast %477 : vector<1x1x2x4xf32> to vector<2x4xf32>
    %479 = vector.shape_cast %469 : vector<2x4xf32> to vector<1x1x2x4xf32>
    tpu.vector_store %arg11[%c0_252, %476, %c0_253, %c0_254], %479 {strides = array<i32>} : memref<1x8x2x4xf32, #tpu.memory_space<vmem>>, vector<1x1x2x4xf32>,
    %480 = arith.mulf %475, %469 : vector<2x4xf32>
    %cst_255 = arith.constant dense<0.000000e+00> : vector<2xf32>
    %481 = vector.multi_reduction <add>, %480, %cst_255 [1] : vector<2x4xf32> to vector<2xf32>
    %482 = vector.shape_cast %481 : vector<2xf32> to vector<1x2xf32>
    %c0_256 = arith.constant 0 : index
    %c0_257 = arith.constant 0 : index
    %483 = arith.index_cast %c3_i32 : i32 to index
    %c0_258 = arith.constant 0 : index
    %484 = vector.load %arg12[%c0_256, %c0_257, %483, %c0_258] : memref<1x1x8x2xf32, #tpu.memory_space<vmem>>, vector<1x1x1x2xf32>
    %485 = vector.shape_cast %484 : vector<1x1x1x2xf32> to vector<1x2xf32>
    %486 = vector.shape_cast %482 : vector<1x2xf32> to vector<1x1x1x2xf32>
    tpu.vector_store %arg12[%c0_256, %c0_257, %483, %c0_258], %486 {strides = array<i32>} : memref<1x1x8x2xf32, #tpu.memory_space<vmem>>, vector<1x1x1x2xf32>,
    %c4_i32 = arith.constant 4 : i32
    %c0_259 = arith.constant 0 : index
    %487 = arith.index_cast %c4_i32 : i32 to index
    %c0_260 = arith.constant 0 : index
    %c0_261 = arith.constant 0 : index
    %488 = vector.load %arg2[%c0_259, %487, %c0_260, %c0_261] : memref<1x8x2x128xf32, #tpu.memory_space<vmem>>, vector<1x1x2x128xf32>
    %489 = vector.shape_cast %488 : vector<1x1x2x128xf32> to vector<2x128xf32>
    %c0_262 = arith.constant 0 : index
    %c0_263 = arith.constant 0 : index
    %c0_264 = arith.constant 0 : index
    %490 = vector.load %arg13[%c0_262, %c0_263, %c0_264] : memref<2x2x32xf32, #tpu.memory_space<vmem>>, vector<1x2x32xf32>
    %491 = vector.shape_cast %490 : vector<1x2x32xf32> to vector<2x32xf32>
    %c0_265 = arith.constant 0 : index
    %c0_266 = arith.constant 0 : index
    %c0_267 = arith.constant 0 : index
    %492 = vector.load %arg14[%c0_265, %c0_266, %c0_267] : memref<2x2x32xf32, #tpu.memory_space<vmem>>, vector<1x2x32xf32>
    %493 = vector.shape_cast %492 : vector<1x2x32xf32> to vector<2x32xf32>
    %494 = arith.truncf %491 : vector<2x32xf32> to vector<2x32xbf16>
    %c0_268 = arith.constant 0 : index
    %c0_269 = arith.constant 0 : index
    %c0_270 = arith.constant 0 : index
    %495 = vector.load %arg4[%c0_268, %c0_269, %c0_270] : memref<2x32x128xbf16, #tpu.memory_space<vmem>>, vector<1x32x128xbf16>
    %496 = vector.shape_cast %495 : vector<1x32x128xbf16> to vector<32x128xbf16>
    %cst_271 = arith.constant dense<0.000000e+00> : vector<2x128xf32>
    %497 = tpu.matmul %494, %496, %cst_271 {dimension_numbers = #tpu.dot_dimension_numbers<[1], [0], [0], [1], [0, 0, 1, 1], [], []>} : vector<2x32xbf16>, vector<32x128xbf16>, vector<2x128xf32> -> vector<2x128xf32>
    %498 = arith.addf %489, %497 : vector<2x128xf32>
    %499 = vector.extract_strided_slice %498 {offsets = [0, 0], sizes = [2, 32], strides = [1, 1]} : vector<2x128xf32> to vector<2x32xf32>
    %500 = arith.negf %499 : vector<2x32xf32>
    %501 = math.exp %500 : vector<2x32xf32>
    %cst_272 = arith.constant 1.000000e+00 : f32
    %502 = vector.broadcast %cst_272 : f32 to vector<2x32xf32>
    %503 = arith.addf %502, %501 : vector<2x32xf32>
    %504 = arith.divf %502, %503 : vector<2x32xf32>
    %505 = vector.extract_strided_slice %498 {offsets = [0, 32], sizes = [2, 32], strides = [1, 1]} : vector<2x128xf32> to vector<2x32xf32>
    %506 = arith.negf %505 : vector<2x32xf32>
    %507 = math.exp %506 : vector<2x32xf32>
    %cst_273 = arith.constant 1.000000e+00 : f32
    %508 = vector.broadcast %cst_273 : f32 to vector<2x32xf32>
    %509 = arith.addf %508, %507 : vector<2x32xf32>
    %510 = arith.divf %508, %509 : vector<2x32xf32>
    %511 = vector.extract_strided_slice %498 {offsets = [0, 64], sizes = [2, 32], strides = [1, 1]} : vector<2x128xf32> to vector<2x32xf32>
    %512 = math.tanh %511 : vector<2x32xf32>
    %513 = vector.extract_strided_slice %498 {offsets = [0, 96], sizes = [2, 32], strides = [1, 1]} : vector<2x128xf32> to vector<2x32xf32>
    %514 = arith.negf %513 : vector<2x32xf32>
    %515 = math.exp %514 : vector<2x32xf32>
    %cst_274 = arith.constant 1.000000e+00 : f32
    %516 = vector.broadcast %cst_274 : f32 to vector<2x32xf32>
    %517 = arith.addf %516, %515 : vector<2x32xf32>
    %518 = arith.divf %516, %517 : vector<2x32xf32>
    %519 = arith.mulf %510, %493 : vector<2x32xf32>
    %520 = arith.mulf %504, %512 : vector<2x32xf32>
    %521 = arith.addf %519, %520 : vector<2x32xf32>
    %522 = math.tanh %521 : vector<2x32xf32>
    %523 = arith.mulf %518, %522 : vector<2x32xf32>
    %c0_275 = arith.constant 0 : index
    %c0_276 = arith.constant 0 : index
    %c0_277 = arith.constant 0 : index
    %524 = vector.load %arg13[%c0_275, %c0_276, %c0_277] : memref<2x2x32xf32, #tpu.memory_space<vmem>>, vector<1x2x32xf32>
    %525 = vector.shape_cast %524 : vector<1x2x32xf32> to vector<2x32xf32>
    %526 = vector.shape_cast %523 : vector<2x32xf32> to vector<1x2x32xf32>
    tpu.vector_store %arg13[%c0_275, %c0_276, %c0_277], %526 {strides = array<i32>} : memref<2x2x32xf32, #tpu.memory_space<vmem>>, vector<1x2x32xf32>,
    %c0_278 = arith.constant 0 : index
    %c0_279 = arith.constant 0 : index
    %c0_280 = arith.constant 0 : index
    %527 = vector.load %arg14[%c0_278, %c0_279, %c0_280] : memref<2x2x32xf32, #tpu.memory_space<vmem>>, vector<1x2x32xf32>
    %528 = vector.shape_cast %527 : vector<1x2x32xf32> to vector<2x32xf32>
    %529 = vector.shape_cast %521 : vector<2x32xf32> to vector<1x2x32xf32>
    tpu.vector_store %arg14[%c0_278, %c0_279, %c0_280], %529 {strides = array<i32>} : memref<2x2x32xf32, #tpu.memory_space<vmem>>, vector<1x2x32xf32>,
    %530 = arith.truncf %523 : vector<2x32xf32> to vector<2x32xbf16>
    %c1_281 = arith.constant 1 : index
    %c0_282 = arith.constant 0 : index
    %c0_283 = arith.constant 0 : index
    %531 = vector.load %arg13[%c1_281, %c0_282, %c0_283] : memref<2x2x32xf32, #tpu.memory_space<vmem>>, vector<1x2x32xf32>
    %532 = vector.shape_cast %531 : vector<1x2x32xf32> to vector<2x32xf32>
    %c1_284 = arith.constant 1 : index
    %c0_285 = arith.constant 0 : index
    %c0_286 = arith.constant 0 : index
    %533 = vector.load %arg14[%c1_284, %c0_285, %c0_286] : memref<2x2x32xf32, #tpu.memory_space<vmem>>, vector<1x2x32xf32>
    %534 = vector.shape_cast %533 : vector<1x2x32xf32> to vector<2x32xf32>
    %535 = arith.truncf %532 : vector<2x32xf32> to vector<2x32xbf16>
    %c1_287 = arith.constant 1 : index
    %c0_288 = arith.constant 0 : index
    %c0_289 = arith.constant 0 : index
    %536 = vector.load %arg4[%c1_287, %c0_288, %c0_289] : memref<2x32x128xbf16, #tpu.memory_space<vmem>>, vector<1x32x128xbf16>
    %537 = vector.shape_cast %536 : vector<1x32x128xbf16> to vector<32x128xbf16>
    %cst_290 = arith.constant dense<0.000000e+00> : vector<2x128xf32>
    %538 = tpu.matmul %535, %537, %cst_290 {dimension_numbers = #tpu.dot_dimension_numbers<[1], [0], [0], [1], [0, 0, 1, 1], [], []>} : vector<2x32xbf16>, vector<32x128xbf16>, vector<2x128xf32> -> vector<2x128xf32>
    %c0_291 = arith.constant 0 : index
    %c0_292 = arith.constant 0 : index
    %c0_293 = arith.constant 0 : index
    %539 = vector.load %arg3[%c0_291, %c0_292, %c0_293] : memref<1x32x128xbf16, #tpu.memory_space<vmem>>, vector<1x32x128xbf16>
    %540 = vector.shape_cast %539 : vector<1x32x128xbf16> to vector<32x128xbf16>
    %cst_294 = arith.constant dense<0.000000e+00> : vector<2x128xf32>
    %541 = tpu.matmul %530, %540, %cst_294 {dimension_numbers = #tpu.dot_dimension_numbers<[1], [0], [0], [1], [0, 0, 1, 1], [], []>} : vector<2x32xbf16>, vector<32x128xbf16>, vector<2x128xf32> -> vector<2x128xf32>
    %542 = arith.addf %541, %538 : vector<2x128xf32>
    %c1_295 = arith.constant 1 : index
    %c0_296 = arith.constant 0 : index
    %c0_297 = arith.constant 0 : index
    %543 = vector.load %arg5[%c1_295, %c0_296, %c0_297] : memref<2x1x128xf32, #tpu.memory_space<vmem>>, vector<1x1x128xf32>
    %544 = vector.shape_cast %543 : vector<1x1x128xf32> to vector<1x128xf32>
    %545 = vector.broadcast %544 : vector<1x128xf32> to vector<2x128xf32>
    %546 = arith.addf %542, %545 : vector<2x128xf32>
    %547 = vector.extract_strided_slice %546 {offsets = [0, 0], sizes = [2, 32], strides = [1, 1]} : vector<2x128xf32> to vector<2x32xf32>
    %548 = arith.negf %547 : vector<2x32xf32>
    %549 = math.exp %548 : vector<2x32xf32>
    %cst_298 = arith.constant 1.000000e+00 : f32
    %550 = vector.broadcast %cst_298 : f32 to vector<2x32xf32>
    %551 = arith.addf %550, %549 : vector<2x32xf32>
    %552 = arith.divf %550, %551 : vector<2x32xf32>
    %553 = vector.extract_strided_slice %546 {offsets = [0, 32], sizes = [2, 32], strides = [1, 1]} : vector<2x128xf32> to vector<2x32xf32>
    %554 = arith.negf %553 : vector<2x32xf32>
    %555 = math.exp %554 : vector<2x32xf32>
    %cst_299 = arith.constant 1.000000e+00 : f32
    %556 = vector.broadcast %cst_299 : f32 to vector<2x32xf32>
    %557 = arith.addf %556, %555 : vector<2x32xf32>
    %558 = arith.divf %556, %557 : vector<2x32xf32>
    %559 = vector.extract_strided_slice %546 {offsets = [0, 64], sizes = [2, 32], strides = [1, 1]} : vector<2x128xf32> to vector<2x32xf32>
    %560 = math.tanh %559 : vector<2x32xf32>
    %561 = vector.extract_strided_slice %546 {offsets = [0, 96], sizes = [2, 32], strides = [1, 1]} : vector<2x128xf32> to vector<2x32xf32>
    %562 = arith.negf %561 : vector<2x32xf32>
    %563 = math.exp %562 : vector<2x32xf32>
    %cst_300 = arith.constant 1.000000e+00 : f32
    %564 = vector.broadcast %cst_300 : f32 to vector<2x32xf32>
    %565 = arith.addf %564, %563 : vector<2x32xf32>
    %566 = arith.divf %564, %565 : vector<2x32xf32>
    %567 = arith.mulf %558, %534 : vector<2x32xf32>
    %568 = arith.mulf %552, %560 : vector<2x32xf32>
    %569 = arith.addf %567, %568 : vector<2x32xf32>
    %570 = math.tanh %569 : vector<2x32xf32>
    %571 = arith.mulf %566, %570 : vector<2x32xf32>
    %c1_301 = arith.constant 1 : index
    %c0_302 = arith.constant 0 : index
    %c0_303 = arith.constant 0 : index
    %572 = vector.load %arg13[%c1_301, %c0_302, %c0_303] : memref<2x2x32xf32, #tpu.memory_space<vmem>>, vector<1x2x32xf32>
    %573 = vector.shape_cast %572 : vector<1x2x32xf32> to vector<2x32xf32>
    %574 = vector.shape_cast %571 : vector<2x32xf32> to vector<1x2x32xf32>
    tpu.vector_store %arg13[%c1_301, %c0_302, %c0_303], %574 {strides = array<i32>} : memref<2x2x32xf32, #tpu.memory_space<vmem>>, vector<1x2x32xf32>,
    %c1_304 = arith.constant 1 : index
    %c0_305 = arith.constant 0 : index
    %c0_306 = arith.constant 0 : index
    %575 = vector.load %arg14[%c1_304, %c0_305, %c0_306] : memref<2x2x32xf32, #tpu.memory_space<vmem>>, vector<1x2x32xf32>
    %576 = vector.shape_cast %575 : vector<1x2x32xf32> to vector<2x32xf32>
    %577 = vector.shape_cast %569 : vector<2x32xf32> to vector<1x2x32xf32>
    tpu.vector_store %arg14[%c1_304, %c0_305, %c0_306], %577 {strides = array<i32>} : memref<2x2x32xf32, #tpu.memory_space<vmem>>, vector<1x2x32xf32>,
    %578 = arith.truncf %571 : vector<2x32xf32> to vector<2x32xbf16>
    %c0_307 = arith.constant 0 : index
    %c0_308 = arith.constant 0 : index
    %579 = vector.load %arg6[%c0_307, %c0_308] : memref<32x4xbf16, #tpu.memory_space<vmem>>, vector<32x4xbf16>
    %cst_309 = arith.constant dense<0.000000e+00> : vector<2x4xf32>
    %580 = tpu.matmul %578, %579, %cst_309 {dimension_numbers = #tpu.dot_dimension_numbers<[1], [0], [0], [1], [0, 0, 1, 1], [], []>} : vector<2x32xbf16>, vector<32x4xbf16>, vector<2x4xf32> -> vector<2x4xf32>
    %cst_310 = arith.constant dense<0xFF800000> : vector<2xf32>
    %581 = vector.multi_reduction <maximumf>, %580, %cst_310 [1] : vector<2x4xf32> to vector<2xf32>
    %582 = vector.shape_cast %581 : vector<2xf32> to vector<2x1xf32>
    %583 = vector.broadcast %582 : vector<2x1xf32> to vector<2x4xf32>
    %584 = arith.subf %580, %583 : vector<2x4xf32>
    %585 = math.exp %584 : vector<2x4xf32>
    %cst_311 = arith.constant dense<0.000000e+00> : vector<2xf32>
    %586 = vector.multi_reduction <add>, %585, %cst_311 [1] : vector<2x4xf32> to vector<2xf32>
    %587 = vector.shape_cast %586 : vector<2xf32> to vector<2x1xf32>
    %588 = tpu.reciprocal %587 {approx = true} : vector<2x1xf32> -> vector<2x1xf32>
    %589 = vector.broadcast %588 : vector<2x1xf32> to vector<2x4xf32>
    %590 = arith.mulf %585, %589 : vector<2x4xf32>
    %591 = arith.truncf %580 : vector<2x4xf32> to vector<2x4xbf16>
    %c0_312 = arith.constant 0 : index
    %c0_313 = arith.constant 0 : index
    %592 = vector.load %arg7[%c0_312, %c0_313] : memref<4x4xbf16, #tpu.memory_space<vmem>>, vector<4x4xbf16>
    %cst_314 = arith.constant dense<0.000000e+00> : vector<2x4xf32>
    %593 = tpu.matmul %591, %592, %cst_314 {dimension_numbers = #tpu.dot_dimension_numbers<[1], [0], [0], [1], [0, 0, 1, 1], [], []>} : vector<2x4xbf16>, vector<4x4xbf16>, vector<2x4xf32> -> vector<2x4xf32>
    %c0_315 = arith.constant 0 : index
    %c0_316 = arith.constant 0 : index
    %594 = vector.load %arg8[%c0_315, %c0_316] : memref<1x4xf32, #tpu.memory_space<vmem>>, vector<1x4xf32>
    %595 = vector.broadcast %594 : vector<1x4xf32> to vector<2x4xf32>
    %596 = arith.addf %593, %595 : vector<2x4xf32>
    %c0_317 = arith.constant 0 : index
    %597 = arith.index_cast %c4_i32 : i32 to index
    %c0_318 = arith.constant 0 : index
    %c0_319 = arith.constant 0 : index
    %598 = vector.load %arg11[%c0_317, %597, %c0_318, %c0_319] : memref<1x8x2x4xf32, #tpu.memory_space<vmem>>, vector<1x1x2x4xf32>
    %599 = vector.shape_cast %598 : vector<1x1x2x4xf32> to vector<2x4xf32>
    %600 = vector.shape_cast %590 : vector<2x4xf32> to vector<1x1x2x4xf32>
    tpu.vector_store %arg11[%c0_317, %597, %c0_318, %c0_319], %600 {strides = array<i32>} : memref<1x8x2x4xf32, #tpu.memory_space<vmem>>, vector<1x1x2x4xf32>,
    %601 = arith.mulf %596, %590 : vector<2x4xf32>
    %cst_320 = arith.constant dense<0.000000e+00> : vector<2xf32>
    %602 = vector.multi_reduction <add>, %601, %cst_320 [1] : vector<2x4xf32> to vector<2xf32>
    %603 = vector.shape_cast %602 : vector<2xf32> to vector<1x2xf32>
    %c0_321 = arith.constant 0 : index
    %c0_322 = arith.constant 0 : index
    %604 = arith.index_cast %c4_i32 : i32 to index
    %c0_323 = arith.constant 0 : index
    %605 = vector.load %arg12[%c0_321, %c0_322, %604, %c0_323] : memref<1x1x8x2xf32, #tpu.memory_space<vmem>>, vector<1x1x1x2xf32>
    %606 = vector.shape_cast %605 : vector<1x1x1x2xf32> to vector<1x2xf32>
    %607 = vector.shape_cast %603 : vector<1x2xf32> to vector<1x1x1x2xf32>
    tpu.vector_store %arg12[%c0_321, %c0_322, %604, %c0_323], %607 {strides = array<i32>} : memref<1x1x8x2xf32, #tpu.memory_space<vmem>>, vector<1x1x1x2xf32>,
    %c5_i32 = arith.constant 5 : i32
    %c0_324 = arith.constant 0 : index
    %608 = arith.index_cast %c5_i32 : i32 to index
    %c0_325 = arith.constant 0 : index
    %c0_326 = arith.constant 0 : index
    %609 = vector.load %arg2[%c0_324, %608, %c0_325, %c0_326] : memref<1x8x2x128xf32, #tpu.memory_space<vmem>>, vector<1x1x2x128xf32>
    %610 = vector.shape_cast %609 : vector<1x1x2x128xf32> to vector<2x128xf32>
    %c0_327 = arith.constant 0 : index
    %c0_328 = arith.constant 0 : index
    %c0_329 = arith.constant 0 : index
    %611 = vector.load %arg13[%c0_327, %c0_328, %c0_329] : memref<2x2x32xf32, #tpu.memory_space<vmem>>, vector<1x2x32xf32>
    %612 = vector.shape_cast %611 : vector<1x2x32xf32> to vector<2x32xf32>
    %c0_330 = arith.constant 0 : index
    %c0_331 = arith.constant 0 : index
    %c0_332 = arith.constant 0 : index
    %613 = vector.load %arg14[%c0_330, %c0_331, %c0_332] : memref<2x2x32xf32, #tpu.memory_space<vmem>>, vector<1x2x32xf32>
    %614 = vector.shape_cast %613 : vector<1x2x32xf32> to vector<2x32xf32>
    %615 = arith.truncf %612 : vector<2x32xf32> to vector<2x32xbf16>
    %c0_333 = arith.constant 0 : index
    %c0_334 = arith.constant 0 : index
    %c0_335 = arith.constant 0 : index
    %616 = vector.load %arg4[%c0_333, %c0_334, %c0_335] : memref<2x32x128xbf16, #tpu.memory_space<vmem>>, vector<1x32x128xbf16>
    %617 = vector.shape_cast %616 : vector<1x32x128xbf16> to vector<32x128xbf16>
    %cst_336 = arith.constant dense<0.000000e+00> : vector<2x128xf32>
    %618 = tpu.matmul %615, %617, %cst_336 {dimension_numbers = #tpu.dot_dimension_numbers<[1], [0], [0], [1], [0, 0, 1, 1], [], []>} : vector<2x32xbf16>, vector<32x128xbf16>, vector<2x128xf32> -> vector<2x128xf32>
    %619 = arith.addf %610, %618 : vector<2x128xf32>
    %620 = vector.extract_strided_slice %619 {offsets = [0, 0], sizes = [2, 32], strides = [1, 1]} : vector<2x128xf32> to vector<2x32xf32>
    %621 = arith.negf %620 : vector<2x32xf32>
    %622 = math.exp %621 : vector<2x32xf32>
    %cst_337 = arith.constant 1.000000e+00 : f32
    %623 = vector.broadcast %cst_337 : f32 to vector<2x32xf32>
    %624 = arith.addf %623, %622 : vector<2x32xf32>
    %625 = arith.divf %623, %624 : vector<2x32xf32>
    %626 = vector.extract_strided_slice %619 {offsets = [0, 32], sizes = [2, 32], strides = [1, 1]} : vector<2x128xf32> to vector<2x32xf32>
    %627 = arith.negf %626 : vector<2x32xf32>
    %628 = math.exp %627 : vector<2x32xf32>
    %cst_338 = arith.constant 1.000000e+00 : f32
    %629 = vector.broadcast %cst_338 : f32 to vector<2x32xf32>
    %630 = arith.addf %629, %628 : vector<2x32xf32>
    %631 = arith.divf %629, %630 : vector<2x32xf32>
    %632 = vector.extract_strided_slice %619 {offsets = [0, 64], sizes = [2, 32], strides = [1, 1]} : vector<2x128xf32> to vector<2x32xf32>
    %633 = math.tanh %632 : vector<2x32xf32>
    %634 = vector.extract_strided_slice %619 {offsets = [0, 96], sizes = [2, 32], strides = [1, 1]} : vector<2x128xf32> to vector<2x32xf32>
    %635 = arith.negf %634 : vector<2x32xf32>
    %636 = math.exp %635 : vector<2x32xf32>
    %cst_339 = arith.constant 1.000000e+00 : f32
    %637 = vector.broadcast %cst_339 : f32 to vector<2x32xf32>
    %638 = arith.addf %637, %636 : vector<2x32xf32>
    %639 = arith.divf %637, %638 : vector<2x32xf32>
    %640 = arith.mulf %631, %614 : vector<2x32xf32>
    %641 = arith.mulf %625, %633 : vector<2x32xf32>
    %642 = arith.addf %640, %641 : vector<2x32xf32>
    %643 = math.tanh %642 : vector<2x32xf32>
    %644 = arith.mulf %639, %643 : vector<2x32xf32>
    %c0_340 = arith.constant 0 : index
    %c0_341 = arith.constant 0 : index
    %c0_342 = arith.constant 0 : index
    %645 = vector.load %arg13[%c0_340, %c0_341, %c0_342] : memref<2x2x32xf32, #tpu.memory_space<vmem>>, vector<1x2x32xf32>
    %646 = vector.shape_cast %645 : vector<1x2x32xf32> to vector<2x32xf32>
    %647 = vector.shape_cast %644 : vector<2x32xf32> to vector<1x2x32xf32>
    tpu.vector_store %arg13[%c0_340, %c0_341, %c0_342], %647 {strides = array<i32>} : memref<2x2x32xf32, #tpu.memory_space<vmem>>, vector<1x2x32xf32>,
    %c0_343 = arith.constant 0 : index
    %c0_344 = arith.constant 0 : index
    %c0_345 = arith.constant 0 : index
    %648 = vector.load %arg14[%c0_343, %c0_344, %c0_345] : memref<2x2x32xf32, #tpu.memory_space<vmem>>, vector<1x2x32xf32>
    %649 = vector.shape_cast %648 : vector<1x2x32xf32> to vector<2x32xf32>
    %650 = vector.shape_cast %642 : vector<2x32xf32> to vector<1x2x32xf32>
    tpu.vector_store %arg14[%c0_343, %c0_344, %c0_345], %650 {strides = array<i32>} : memref<2x2x32xf32, #tpu.memory_space<vmem>>, vector<1x2x32xf32>,
    %651 = arith.truncf %644 : vector<2x32xf32> to vector<2x32xbf16>
    %c1_346 = arith.constant 1 : index
    %c0_347 = arith.constant 0 : index
    %c0_348 = arith.constant 0 : index
    %652 = vector.load %arg13[%c1_346, %c0_347, %c0_348] : memref<2x2x32xf32, #tpu.memory_space<vmem>>, vector<1x2x32xf32>
    %653 = vector.shape_cast %652 : vector<1x2x32xf32> to vector<2x32xf32>
    %c1_349 = arith.constant 1 : index
    %c0_350 = arith.constant 0 : index
    %c0_351 = arith.constant 0 : index
    %654 = vector.load %arg14[%c1_349, %c0_350, %c0_351] : memref<2x2x32xf32, #tpu.memory_space<vmem>>, vector<1x2x32xf32>
    %655 = vector.shape_cast %654 : vector<1x2x32xf32> to vector<2x32xf32>
    %656 = arith.truncf %653 : vector<2x32xf32> to vector<2x32xbf16>
    %c1_352 = arith.constant 1 : index
    %c0_353 = arith.constant 0 : index
    %c0_354 = arith.constant 0 : index
    %657 = vector.load %arg4[%c1_352, %c0_353, %c0_354] : memref<2x32x128xbf16, #tpu.memory_space<vmem>>, vector<1x32x128xbf16>
    %658 = vector.shape_cast %657 : vector<1x32x128xbf16> to vector<32x128xbf16>
    %cst_355 = arith.constant dense<0.000000e+00> : vector<2x128xf32>
    %659 = tpu.matmul %656, %658, %cst_355 {dimension_numbers = #tpu.dot_dimension_numbers<[1], [0], [0], [1], [0, 0, 1, 1], [], []>} : vector<2x32xbf16>, vector<32x128xbf16>, vector<2x128xf32> -> vector<2x128xf32>
    %c0_356 = arith.constant 0 : index
    %c0_357 = arith.constant 0 : index
    %c0_358 = arith.constant 0 : index
    %660 = vector.load %arg3[%c0_356, %c0_357, %c0_358] : memref<1x32x128xbf16, #tpu.memory_space<vmem>>, vector<1x32x128xbf16>
    %661 = vector.shape_cast %660 : vector<1x32x128xbf16> to vector<32x128xbf16>
    %cst_359 = arith.constant dense<0.000000e+00> : vector<2x128xf32>
    %662 = tpu.matmul %651, %661, %cst_359 {dimension_numbers = #tpu.dot_dimension_numbers<[1], [0], [0], [1], [0, 0, 1, 1], [], []>} : vector<2x32xbf16>, vector<32x128xbf16>, vector<2x128xf32> -> vector<2x128xf32>
    %663 = arith.addf %662, %659 : vector<2x128xf32>
    %c1_360 = arith.constant 1 : index
    %c0_361 = arith.constant 0 : index
    %c0_362 = arith.constant 0 : index
    %664 = vector.load %arg5[%c1_360, %c0_361, %c0_362] : memref<2x1x128xf32, #tpu.memory_space<vmem>>, vector<1x1x128xf32>
    %665 = vector.shape_cast %664 : vector<1x1x128xf32> to vector<1x128xf32>
    %666 = vector.broadcast %665 : vector<1x128xf32> to vector<2x128xf32>
    %667 = arith.addf %663, %666 : vector<2x128xf32>
    %668 = vector.extract_strided_slice %667 {offsets = [0, 0], sizes = [2, 32], strides = [1, 1]} : vector<2x128xf32> to vector<2x32xf32>
    %669 = arith.negf %668 : vector<2x32xf32>
    %670 = math.exp %669 : vector<2x32xf32>
    %cst_363 = arith.constant 1.000000e+00 : f32
    %671 = vector.broadcast %cst_363 : f32 to vector<2x32xf32>
    %672 = arith.addf %671, %670 : vector<2x32xf32>
    %673 = arith.divf %671, %672 : vector<2x32xf32>
    %674 = vector.extract_strided_slice %667 {offsets = [0, 32], sizes = [2, 32], strides = [1, 1]} : vector<2x128xf32> to vector<2x32xf32>
    %675 = arith.negf %674 : vector<2x32xf32>
    %676 = math.exp %675 : vector<2x32xf32>
    %cst_364 = arith.constant 1.000000e+00 : f32
    %677 = vector.broadcast %cst_364 : f32 to vector<2x32xf32>
    %678 = arith.addf %677, %676 : vector<2x32xf32>
    %679 = arith.divf %677, %678 : vector<2x32xf32>
    %680 = vector.extract_strided_slice %667 {offsets = [0, 64], sizes = [2, 32], strides = [1, 1]} : vector<2x128xf32> to vector<2x32xf32>
    %681 = math.tanh %680 : vector<2x32xf32>
    %682 = vector.extract_strided_slice %667 {offsets = [0, 96], sizes = [2, 32], strides = [1, 1]} : vector<2x128xf32> to vector<2x32xf32>
    %683 = arith.negf %682 : vector<2x32xf32>
    %684 = math.exp %683 : vector<2x32xf32>
    %cst_365 = arith.constant 1.000000e+00 : f32
    %685 = vector.broadcast %cst_365 : f32 to vector<2x32xf32>
    %686 = arith.addf %685, %684 : vector<2x32xf32>
    %687 = arith.divf %685, %686 : vector<2x32xf32>
    %688 = arith.mulf %679, %655 : vector<2x32xf32>
    %689 = arith.mulf %673, %681 : vector<2x32xf32>
    %690 = arith.addf %688, %689 : vector<2x32xf32>
    %691 = math.tanh %690 : vector<2x32xf32>
    %692 = arith.mulf %687, %691 : vector<2x32xf32>
    %c1_366 = arith.constant 1 : index
    %c0_367 = arith.constant 0 : index
    %c0_368 = arith.constant 0 : index
    %693 = vector.load %arg13[%c1_366, %c0_367, %c0_368] : memref<2x2x32xf32, #tpu.memory_space<vmem>>, vector<1x2x32xf32>
    %694 = vector.shape_cast %693 : vector<1x2x32xf32> to vector<2x32xf32>
    %695 = vector.shape_cast %692 : vector<2x32xf32> to vector<1x2x32xf32>
    tpu.vector_store %arg13[%c1_366, %c0_367, %c0_368], %695 {strides = array<i32>} : memref<2x2x32xf32, #tpu.memory_space<vmem>>, vector<1x2x32xf32>,
    %c1_369 = arith.constant 1 : index
    %c0_370 = arith.constant 0 : index
    %c0_371 = arith.constant 0 : index
    %696 = vector.load %arg14[%c1_369, %c0_370, %c0_371] : memref<2x2x32xf32, #tpu.memory_space<vmem>>, vector<1x2x32xf32>
    %697 = vector.shape_cast %696 : vector<1x2x32xf32> to vector<2x32xf32>
    %698 = vector.shape_cast %690 : vector<2x32xf32> to vector<1x2x32xf32>
    tpu.vector_store %arg14[%c1_369, %c0_370, %c0_371], %698 {strides = array<i32>} : memref<2x2x32xf32, #tpu.memory_space<vmem>>, vector<1x2x32xf32>,
    %699 = arith.truncf %692 : vector<2x32xf32> to vector<2x32xbf16>
    %c0_372 = arith.constant 0 : index
    %c0_373 = arith.constant 0 : index
    %700 = vector.load %arg6[%c0_372, %c0_373] : memref<32x4xbf16, #tpu.memory_space<vmem>>, vector<32x4xbf16>
    %cst_374 = arith.constant dense<0.000000e+00> : vector<2x4xf32>
    %701 = tpu.matmul %699, %700, %cst_374 {dimension_numbers = #tpu.dot_dimension_numbers<[1], [0], [0], [1], [0, 0, 1, 1], [], []>} : vector<2x32xbf16>, vector<32x4xbf16>, vector<2x4xf32> -> vector<2x4xf32>
    %cst_375 = arith.constant dense<0xFF800000> : vector<2xf32>
    %702 = vector.multi_reduction <maximumf>, %701, %cst_375 [1] : vector<2x4xf32> to vector<2xf32>
    %703 = vector.shape_cast %702 : vector<2xf32> to vector<2x1xf32>
    %704 = vector.broadcast %703 : vector<2x1xf32> to vector<2x4xf32>
    %705 = arith.subf %701, %704 : vector<2x4xf32>
    %706 = math.exp %705 : vector<2x4xf32>
    %cst_376 = arith.constant dense<0.000000e+00> : vector<2xf32>
    %707 = vector.multi_reduction <add>, %706, %cst_376 [1] : vector<2x4xf32> to vector<2xf32>
    %708 = vector.shape_cast %707 : vector<2xf32> to vector<2x1xf32>
    %709 = tpu.reciprocal %708 {approx = true} : vector<2x1xf32> -> vector<2x1xf32>
    %710 = vector.broadcast %709 : vector<2x1xf32> to vector<2x4xf32>
    %711 = arith.mulf %706, %710 : vector<2x4xf32>
    %712 = arith.truncf %701 : vector<2x4xf32> to vector<2x4xbf16>
    %c0_377 = arith.constant 0 : index
    %c0_378 = arith.constant 0 : index
    %713 = vector.load %arg7[%c0_377, %c0_378] : memref<4x4xbf16, #tpu.memory_space<vmem>>, vector<4x4xbf16>
    %cst_379 = arith.constant dense<0.000000e+00> : vector<2x4xf32>
    %714 = tpu.matmul %712, %713, %cst_379 {dimension_numbers = #tpu.dot_dimension_numbers<[1], [0], [0], [1], [0, 0, 1, 1], [], []>} : vector<2x4xbf16>, vector<4x4xbf16>, vector<2x4xf32> -> vector<2x4xf32>
    %c0_380 = arith.constant 0 : index
    %c0_381 = arith.constant 0 : index
    %715 = vector.load %arg8[%c0_380, %c0_381] : memref<1x4xf32, #tpu.memory_space<vmem>>, vector<1x4xf32>
    %716 = vector.broadcast %715 : vector<1x4xf32> to vector<2x4xf32>
    %717 = arith.addf %714, %716 : vector<2x4xf32>
    %c0_382 = arith.constant 0 : index
    %718 = arith.index_cast %c5_i32 : i32 to index
    %c0_383 = arith.constant 0 : index
    %c0_384 = arith.constant 0 : index
    %719 = vector.load %arg11[%c0_382, %718, %c0_383, %c0_384] : memref<1x8x2x4xf32, #tpu.memory_space<vmem>>, vector<1x1x2x4xf32>
    %720 = vector.shape_cast %719 : vector<1x1x2x4xf32> to vector<2x4xf32>
    %721 = vector.shape_cast %711 : vector<2x4xf32> to vector<1x1x2x4xf32>
    tpu.vector_store %arg11[%c0_382, %718, %c0_383, %c0_384], %721 {strides = array<i32>} : memref<1x8x2x4xf32, #tpu.memory_space<vmem>>, vector<1x1x2x4xf32>,
    %722 = arith.mulf %717, %711 : vector<2x4xf32>
    %cst_385 = arith.constant dense<0.000000e+00> : vector<2xf32>
    %723 = vector.multi_reduction <add>, %722, %cst_385 [1] : vector<2x4xf32> to vector<2xf32>
    %724 = vector.shape_cast %723 : vector<2xf32> to vector<1x2xf32>
    %c0_386 = arith.constant 0 : index
    %c0_387 = arith.constant 0 : index
    %725 = arith.index_cast %c5_i32 : i32 to index
    %c0_388 = arith.constant 0 : index
    %726 = vector.load %arg12[%c0_386, %c0_387, %725, %c0_388] : memref<1x1x8x2xf32, #tpu.memory_space<vmem>>, vector<1x1x1x2xf32>
    %727 = vector.shape_cast %726 : vector<1x1x1x2xf32> to vector<1x2xf32>
    %728 = vector.shape_cast %724 : vector<1x2xf32> to vector<1x1x1x2xf32>
    tpu.vector_store %arg12[%c0_386, %c0_387, %725, %c0_388], %728 {strides = array<i32>} : memref<1x1x8x2xf32, #tpu.memory_space<vmem>>, vector<1x1x1x2xf32>,
    %c6_i32 = arith.constant 6 : i32
    %c0_389 = arith.constant 0 : index
    %729 = arith.index_cast %c6_i32 : i32 to index
    %c0_390 = arith.constant 0 : index
    %c0_391 = arith.constant 0 : index
    %730 = vector.load %arg2[%c0_389, %729, %c0_390, %c0_391] : memref<1x8x2x128xf32, #tpu.memory_space<vmem>>, vector<1x1x2x128xf32>
    %731 = vector.shape_cast %730 : vector<1x1x2x128xf32> to vector<2x128xf32>
    %c0_392 = arith.constant 0 : index
    %c0_393 = arith.constant 0 : index
    %c0_394 = arith.constant 0 : index
    %732 = vector.load %arg13[%c0_392, %c0_393, %c0_394] : memref<2x2x32xf32, #tpu.memory_space<vmem>>, vector<1x2x32xf32>
    %733 = vector.shape_cast %732 : vector<1x2x32xf32> to vector<2x32xf32>
    %c0_395 = arith.constant 0 : index
    %c0_396 = arith.constant 0 : index
    %c0_397 = arith.constant 0 : index
    %734 = vector.load %arg14[%c0_395, %c0_396, %c0_397] : memref<2x2x32xf32, #tpu.memory_space<vmem>>, vector<1x2x32xf32>
    %735 = vector.shape_cast %734 : vector<1x2x32xf32> to vector<2x32xf32>
    %736 = arith.truncf %733 : vector<2x32xf32> to vector<2x32xbf16>
    %c0_398 = arith.constant 0 : index
    %c0_399 = arith.constant 0 : index
    %c0_400 = arith.constant 0 : index
    %737 = vector.load %arg4[%c0_398, %c0_399, %c0_400] : memref<2x32x128xbf16, #tpu.memory_space<vmem>>, vector<1x32x128xbf16>
    %738 = vector.shape_cast %737 : vector<1x32x128xbf16> to vector<32x128xbf16>
    %cst_401 = arith.constant dense<0.000000e+00> : vector<2x128xf32>
    %739 = tpu.matmul %736, %738, %cst_401 {dimension_numbers = #tpu.dot_dimension_numbers<[1], [0], [0], [1], [0, 0, 1, 1], [], []>} : vector<2x32xbf16>, vector<32x128xbf16>, vector<2x128xf32> -> vector<2x128xf32>
    %740 = arith.addf %731, %739 : vector<2x128xf32>
    %741 = vector.extract_strided_slice %740 {offsets = [0, 0], sizes = [2, 32], strides = [1, 1]} : vector<2x128xf32> to vector<2x32xf32>
    %742 = arith.negf %741 : vector<2x32xf32>
    %743 = math.exp %742 : vector<2x32xf32>
    %cst_402 = arith.constant 1.000000e+00 : f32
    %744 = vector.broadcast %cst_402 : f32 to vector<2x32xf32>
    %745 = arith.addf %744, %743 : vector<2x32xf32>
    %746 = arith.divf %744, %745 : vector<2x32xf32>
    %747 = vector.extract_strided_slice %740 {offsets = [0, 32], sizes = [2, 32], strides = [1, 1]} : vector<2x128xf32> to vector<2x32xf32>
    %748 = arith.negf %747 : vector<2x32xf32>
    %749 = math.exp %748 : vector<2x32xf32>
    %cst_403 = arith.constant 1.000000e+00 : f32
    %750 = vector.broadcast %cst_403 : f32 to vector<2x32xf32>
    %751 = arith.addf %750, %749 : vector<2x32xf32>
    %752 = arith.divf %750, %751 : vector<2x32xf32>
    %753 = vector.extract_strided_slice %740 {offsets = [0, 64], sizes = [2, 32], strides = [1, 1]} : vector<2x128xf32> to vector<2x32xf32>
    %754 = math.tanh %753 : vector<2x32xf32>
    %755 = vector.extract_strided_slice %740 {offsets = [0, 96], sizes = [2, 32], strides = [1, 1]} : vector<2x128xf32> to vector<2x32xf32>
    %756 = arith.negf %755 : vector<2x32xf32>
    %757 = math.exp %756 : vector<2x32xf32>
    %cst_404 = arith.constant 1.000000e+00 : f32
    %758 = vector.broadcast %cst_404 : f32 to vector<2x32xf32>
    %759 = arith.addf %758, %757 : vector<2x32xf32>
    %760 = arith.divf %758, %759 : vector<2x32xf32>
    %761 = arith.mulf %752, %735 : vector<2x32xf32>
    %762 = arith.mulf %746, %754 : vector<2x32xf32>
    %763 = arith.addf %761, %762 : vector<2x32xf32>
    %764 = math.tanh %763 : vector<2x32xf32>
    %765 = arith.mulf %760, %764 : vector<2x32xf32>
    %c0_405 = arith.constant 0 : index
    %c0_406 = arith.constant 0 : index
    %c0_407 = arith.constant 0 : index
    %766 = vector.load %arg13[%c0_405, %c0_406, %c0_407] : memref<2x2x32xf32, #tpu.memory_space<vmem>>, vector<1x2x32xf32>
    %767 = vector.shape_cast %766 : vector<1x2x32xf32> to vector<2x32xf32>
    %768 = vector.shape_cast %765 : vector<2x32xf32> to vector<1x2x32xf32>
    tpu.vector_store %arg13[%c0_405, %c0_406, %c0_407], %768 {strides = array<i32>} : memref<2x2x32xf32, #tpu.memory_space<vmem>>, vector<1x2x32xf32>,
    %c0_408 = arith.constant 0 : index
    %c0_409 = arith.constant 0 : index
    %c0_410 = arith.constant 0 : index
    %769 = vector.load %arg14[%c0_408, %c0_409, %c0_410] : memref<2x2x32xf32, #tpu.memory_space<vmem>>, vector<1x2x32xf32>
    %770 = vector.shape_cast %769 : vector<1x2x32xf32> to vector<2x32xf32>
    %771 = vector.shape_cast %763 : vector<2x32xf32> to vector<1x2x32xf32>
    tpu.vector_store %arg14[%c0_408, %c0_409, %c0_410], %771 {strides = array<i32>} : memref<2x2x32xf32, #tpu.memory_space<vmem>>, vector<1x2x32xf32>,
    %772 = arith.truncf %765 : vector<2x32xf32> to vector<2x32xbf16>
    %c1_411 = arith.constant 1 : index
    %c0_412 = arith.constant 0 : index
    %c0_413 = arith.constant 0 : index
    %773 = vector.load %arg13[%c1_411, %c0_412, %c0_413] : memref<2x2x32xf32, #tpu.memory_space<vmem>>, vector<1x2x32xf32>
    %774 = vector.shape_cast %773 : vector<1x2x32xf32> to vector<2x32xf32>
    %c1_414 = arith.constant 1 : index
    %c0_415 = arith.constant 0 : index
    %c0_416 = arith.constant 0 : index
    %775 = vector.load %arg14[%c1_414, %c0_415, %c0_416] : memref<2x2x32xf32, #tpu.memory_space<vmem>>, vector<1x2x32xf32>
    %776 = vector.shape_cast %775 : vector<1x2x32xf32> to vector<2x32xf32>
    %777 = arith.truncf %774 : vector<2x32xf32> to vector<2x32xbf16>
    %c1_417 = arith.constant 1 : index
    %c0_418 = arith.constant 0 : index
    %c0_419 = arith.constant 0 : index
    %778 = vector.load %arg4[%c1_417, %c0_418, %c0_419] : memref<2x32x128xbf16, #tpu.memory_space<vmem>>, vector<1x32x128xbf16>
    %779 = vector.shape_cast %778 : vector<1x32x128xbf16> to vector<32x128xbf16>
    %cst_420 = arith.constant dense<0.000000e+00> : vector<2x128xf32>
    %780 = tpu.matmul %777, %779, %cst_420 {dimension_numbers = #tpu.dot_dimension_numbers<[1], [0], [0], [1], [0, 0, 1, 1], [], []>} : vector<2x32xbf16>, vector<32x128xbf16>, vector<2x128xf32> -> vector<2x128xf32>
    %c0_421 = arith.constant 0 : index
    %c0_422 = arith.constant 0 : index
    %c0_423 = arith.constant 0 : index
    %781 = vector.load %arg3[%c0_421, %c0_422, %c0_423] : memref<1x32x128xbf16, #tpu.memory_space<vmem>>, vector<1x32x128xbf16>
    %782 = vector.shape_cast %781 : vector<1x32x128xbf16> to vector<32x128xbf16>
    %cst_424 = arith.constant dense<0.000000e+00> : vector<2x128xf32>
    %783 = tpu.matmul %772, %782, %cst_424 {dimension_numbers = #tpu.dot_dimension_numbers<[1], [0], [0], [1], [0, 0, 1, 1], [], []>} : vector<2x32xbf16>, vector<32x128xbf16>, vector<2x128xf32> -> vector<2x128xf32>
    %784 = arith.addf %783, %780 : vector<2x128xf32>
    %c1_425 = arith.constant 1 : index
    %c0_426 = arith.constant 0 : index
    %c0_427 = arith.constant 0 : index
    %785 = vector.load %arg5[%c1_425, %c0_426, %c0_427] : memref<2x1x128xf32, #tpu.memory_space<vmem>>, vector<1x1x128xf32>
    %786 = vector.shape_cast %785 : vector<1x1x128xf32> to vector<1x128xf32>
    %787 = vector.broadcast %786 : vector<1x128xf32> to vector<2x128xf32>
    %788 = arith.addf %784, %787 : vector<2x128xf32>
    %789 = vector.extract_strided_slice %788 {offsets = [0, 0], sizes = [2, 32], strides = [1, 1]} : vector<2x128xf32> to vector<2x32xf32>
    %790 = arith.negf %789 : vector<2x32xf32>
    %791 = math.exp %790 : vector<2x32xf32>
    %cst_428 = arith.constant 1.000000e+00 : f32
    %792 = vector.broadcast %cst_428 : f32 to vector<2x32xf32>
    %793 = arith.addf %792, %791 : vector<2x32xf32>
    %794 = arith.divf %792, %793 : vector<2x32xf32>
    %795 = vector.extract_strided_slice %788 {offsets = [0, 32], sizes = [2, 32], strides = [1, 1]} : vector<2x128xf32> to vector<2x32xf32>
    %796 = arith.negf %795 : vector<2x32xf32>
    %797 = math.exp %796 : vector<2x32xf32>
    %cst_429 = arith.constant 1.000000e+00 : f32
    %798 = vector.broadcast %cst_429 : f32 to vector<2x32xf32>
    %799 = arith.addf %798, %797 : vector<2x32xf32>
    %800 = arith.divf %798, %799 : vector<2x32xf32>
    %801 = vector.extract_strided_slice %788 {offsets = [0, 64], sizes = [2, 32], strides = [1, 1]} : vector<2x128xf32> to vector<2x32xf32>
    %802 = math.tanh %801 : vector<2x32xf32>
    %803 = vector.extract_strided_slice %788 {offsets = [0, 96], sizes = [2, 32], strides = [1, 1]} : vector<2x128xf32> to vector<2x32xf32>
    %804 = arith.negf %803 : vector<2x32xf32>
    %805 = math.exp %804 : vector<2x32xf32>
    %cst_430 = arith.constant 1.000000e+00 : f32
    %806 = vector.broadcast %cst_430 : f32 to vector<2x32xf32>
    %807 = arith.addf %806, %805 : vector<2x32xf32>
    %808 = arith.divf %806, %807 : vector<2x32xf32>
    %809 = arith.mulf %800, %776 : vector<2x32xf32>
    %810 = arith.mulf %794, %802 : vector<2x32xf32>
    %811 = arith.addf %809, %810 : vector<2x32xf32>
    %812 = math.tanh %811 : vector<2x32xf32>
    %813 = arith.mulf %808, %812 : vector<2x32xf32>
    %c1_431 = arith.constant 1 : index
    %c0_432 = arith.constant 0 : index
    %c0_433 = arith.constant 0 : index
    %814 = vector.load %arg13[%c1_431, %c0_432, %c0_433] : memref<2x2x32xf32, #tpu.memory_space<vmem>>, vector<1x2x32xf32>
    %815 = vector.shape_cast %814 : vector<1x2x32xf32> to vector<2x32xf32>
    %816 = vector.shape_cast %813 : vector<2x32xf32> to vector<1x2x32xf32>
    tpu.vector_store %arg13[%c1_431, %c0_432, %c0_433], %816 {strides = array<i32>} : memref<2x2x32xf32, #tpu.memory_space<vmem>>, vector<1x2x32xf32>,
    %c1_434 = arith.constant 1 : index
    %c0_435 = arith.constant 0 : index
    %c0_436 = arith.constant 0 : index
    %817 = vector.load %arg14[%c1_434, %c0_435, %c0_436] : memref<2x2x32xf32, #tpu.memory_space<vmem>>, vector<1x2x32xf32>
    %818 = vector.shape_cast %817 : vector<1x2x32xf32> to vector<2x32xf32>
    %819 = vector.shape_cast %811 : vector<2x32xf32> to vector<1x2x32xf32>
    tpu.vector_store %arg14[%c1_434, %c0_435, %c0_436], %819 {strides = array<i32>} : memref<2x2x32xf32, #tpu.memory_space<vmem>>, vector<1x2x32xf32>,
    %820 = arith.truncf %813 : vector<2x32xf32> to vector<2x32xbf16>
    %c0_437 = arith.constant 0 : index
    %c0_438 = arith.constant 0 : index
    %821 = vector.load %arg6[%c0_437, %c0_438] : memref<32x4xbf16, #tpu.memory_space<vmem>>, vector<32x4xbf16>
    %cst_439 = arith.constant dense<0.000000e+00> : vector<2x4xf32>
    %822 = tpu.matmul %820, %821, %cst_439 {dimension_numbers = #tpu.dot_dimension_numbers<[1], [0], [0], [1], [0, 0, 1, 1], [], []>} : vector<2x32xbf16>, vector<32x4xbf16>, vector<2x4xf32> -> vector<2x4xf32>
    %cst_440 = arith.constant dense<0xFF800000> : vector<2xf32>
    %823 = vector.multi_reduction <maximumf>, %822, %cst_440 [1] : vector<2x4xf32> to vector<2xf32>
    %824 = vector.shape_cast %823 : vector<2xf32> to vector<2x1xf32>
    %825 = vector.broadcast %824 : vector<2x1xf32> to vector<2x4xf32>
    %826 = arith.subf %822, %825 : vector<2x4xf32>
    %827 = math.exp %826 : vector<2x4xf32>
    %cst_441 = arith.constant dense<0.000000e+00> : vector<2xf32>
    %828 = vector.multi_reduction <add>, %827, %cst_441 [1] : vector<2x4xf32> to vector<2xf32>
    %829 = vector.shape_cast %828 : vector<2xf32> to vector<2x1xf32>
    %830 = tpu.reciprocal %829 {approx = true} : vector<2x1xf32> -> vector<2x1xf32>
    %831 = vector.broadcast %830 : vector<2x1xf32> to vector<2x4xf32>
    %832 = arith.mulf %827, %831 : vector<2x4xf32>
    %833 = arith.truncf %822 : vector<2x4xf32> to vector<2x4xbf16>
    %c0_442 = arith.constant 0 : index
    %c0_443 = arith.constant 0 : index
    %834 = vector.load %arg7[%c0_442, %c0_443] : memref<4x4xbf16, #tpu.memory_space<vmem>>, vector<4x4xbf16>
    %cst_444 = arith.constant dense<0.000000e+00> : vector<2x4xf32>
    %835 = tpu.matmul %833, %834, %cst_444 {dimension_numbers = #tpu.dot_dimension_numbers<[1], [0], [0], [1], [0, 0, 1, 1], [], []>} : vector<2x4xbf16>, vector<4x4xbf16>, vector<2x4xf32> -> vector<2x4xf32>
    %c0_445 = arith.constant 0 : index
    %c0_446 = arith.constant 0 : index
    %836 = vector.load %arg8[%c0_445, %c0_446] : memref<1x4xf32, #tpu.memory_space<vmem>>, vector<1x4xf32>
    %837 = vector.broadcast %836 : vector<1x4xf32> to vector<2x4xf32>
    %838 = arith.addf %835, %837 : vector<2x4xf32>
    %c0_447 = arith.constant 0 : index
    %839 = arith.index_cast %c6_i32 : i32 to index
    %c0_448 = arith.constant 0 : index
    %c0_449 = arith.constant 0 : index
    %840 = vector.load %arg11[%c0_447, %839, %c0_448, %c0_449] : memref<1x8x2x4xf32, #tpu.memory_space<vmem>>, vector<1x1x2x4xf32>
    %841 = vector.shape_cast %840 : vector<1x1x2x4xf32> to vector<2x4xf32>
    %842 = vector.shape_cast %832 : vector<2x4xf32> to vector<1x1x2x4xf32>
    tpu.vector_store %arg11[%c0_447, %839, %c0_448, %c0_449], %842 {strides = array<i32>} : memref<1x8x2x4xf32, #tpu.memory_space<vmem>>, vector<1x1x2x4xf32>,
    %843 = arith.mulf %838, %832 : vector<2x4xf32>
    %cst_450 = arith.constant dense<0.000000e+00> : vector<2xf32>
    %844 = vector.multi_reduction <add>, %843, %cst_450 [1] : vector<2x4xf32> to vector<2xf32>
    %845 = vector.shape_cast %844 : vector<2xf32> to vector<1x2xf32>
    %c0_451 = arith.constant 0 : index
    %c0_452 = arith.constant 0 : index
    %846 = arith.index_cast %c6_i32 : i32 to index
    %c0_453 = arith.constant 0 : index
    %847 = vector.load %arg12[%c0_451, %c0_452, %846, %c0_453] : memref<1x1x8x2xf32, #tpu.memory_space<vmem>>, vector<1x1x1x2xf32>
    %848 = vector.shape_cast %847 : vector<1x1x1x2xf32> to vector<1x2xf32>
    %849 = vector.shape_cast %845 : vector<1x2xf32> to vector<1x1x1x2xf32>
    tpu.vector_store %arg12[%c0_451, %c0_452, %846, %c0_453], %849 {strides = array<i32>} : memref<1x1x8x2xf32, #tpu.memory_space<vmem>>, vector<1x1x1x2xf32>,
    %c7_i32 = arith.constant 7 : i32
    %c0_454 = arith.constant 0 : index
    %850 = arith.index_cast %c7_i32 : i32 to index
    %c0_455 = arith.constant 0 : index
    %c0_456 = arith.constant 0 : index
    %851 = vector.load %arg2[%c0_454, %850, %c0_455, %c0_456] : memref<1x8x2x128xf32, #tpu.memory_space<vmem>>, vector<1x1x2x128xf32>
    %852 = vector.shape_cast %851 : vector<1x1x2x128xf32> to vector<2x128xf32>
    %c0_457 = arith.constant 0 : index
    %c0_458 = arith.constant 0 : index
    %c0_459 = arith.constant 0 : index
    %853 = vector.load %arg13[%c0_457, %c0_458, %c0_459] : memref<2x2x32xf32, #tpu.memory_space<vmem>>, vector<1x2x32xf32>
    %854 = vector.shape_cast %853 : vector<1x2x32xf32> to vector<2x32xf32>
    %c0_460 = arith.constant 0 : index
    %c0_461 = arith.constant 0 : index
    %c0_462 = arith.constant 0 : index
    %855 = vector.load %arg14[%c0_460, %c0_461, %c0_462] : memref<2x2x32xf32, #tpu.memory_space<vmem>>, vector<1x2x32xf32>
    %856 = vector.shape_cast %855 : vector<1x2x32xf32> to vector<2x32xf32>
    %857 = arith.truncf %854 : vector<2x32xf32> to vector<2x32xbf16>
    %c0_463 = arith.constant 0 : index
    %c0_464 = arith.constant 0 : index
    %c0_465 = arith.constant 0 : index
    %858 = vector.load %arg4[%c0_463, %c0_464, %c0_465] : memref<2x32x128xbf16, #tpu.memory_space<vmem>>, vector<1x32x128xbf16>
    %859 = vector.shape_cast %858 : vector<1x32x128xbf16> to vector<32x128xbf16>
    %cst_466 = arith.constant dense<0.000000e+00> : vector<2x128xf32>
    %860 = tpu.matmul %857, %859, %cst_466 {dimension_numbers = #tpu.dot_dimension_numbers<[1], [0], [0], [1], [0, 0, 1, 1], [], []>} : vector<2x32xbf16>, vector<32x128xbf16>, vector<2x128xf32> -> vector<2x128xf32>
    %861 = arith.addf %852, %860 : vector<2x128xf32>
    %862 = vector.extract_strided_slice %861 {offsets = [0, 0], sizes = [2, 32], strides = [1, 1]} : vector<2x128xf32> to vector<2x32xf32>
    %863 = arith.negf %862 : vector<2x32xf32>
    %864 = math.exp %863 : vector<2x32xf32>
    %cst_467 = arith.constant 1.000000e+00 : f32
    %865 = vector.broadcast %cst_467 : f32 to vector<2x32xf32>
    %866 = arith.addf %865, %864 : vector<2x32xf32>
    %867 = arith.divf %865, %866 : vector<2x32xf32>
    %868 = vector.extract_strided_slice %861 {offsets = [0, 32], sizes = [2, 32], strides = [1, 1]} : vector<2x128xf32> to vector<2x32xf32>
    %869 = arith.negf %868 : vector<2x32xf32>
    %870 = math.exp %869 : vector<2x32xf32>
    %cst_468 = arith.constant 1.000000e+00 : f32
    %871 = vector.broadcast %cst_468 : f32 to vector<2x32xf32>
    %872 = arith.addf %871, %870 : vector<2x32xf32>
    %873 = arith.divf %871, %872 : vector<2x32xf32>
    %874 = vector.extract_strided_slice %861 {offsets = [0, 64], sizes = [2, 32], strides = [1, 1]} : vector<2x128xf32> to vector<2x32xf32>
    %875 = math.tanh %874 : vector<2x32xf32>
    %876 = vector.extract_strided_slice %861 {offsets = [0, 96], sizes = [2, 32], strides = [1, 1]} : vector<2x128xf32> to vector<2x32xf32>
    %877 = arith.negf %876 : vector<2x32xf32>
    %878 = math.exp %877 : vector<2x32xf32>
    %cst_469 = arith.constant 1.000000e+00 : f32
    %879 = vector.broadcast %cst_469 : f32 to vector<2x32xf32>
    %880 = arith.addf %879, %878 : vector<2x32xf32>
    %881 = arith.divf %879, %880 : vector<2x32xf32>
    %882 = arith.mulf %873, %856 : vector<2x32xf32>
    %883 = arith.mulf %867, %875 : vector<2x32xf32>
    %884 = arith.addf %882, %883 : vector<2x32xf32>
    %885 = math.tanh %884 : vector<2x32xf32>
    %886 = arith.mulf %881, %885 : vector<2x32xf32>
    %c0_470 = arith.constant 0 : index
    %c0_471 = arith.constant 0 : index
    %c0_472 = arith.constant 0 : index
    %887 = vector.load %arg13[%c0_470, %c0_471, %c0_472] : memref<2x2x32xf32, #tpu.memory_space<vmem>>, vector<1x2x32xf32>
    %888 = vector.shape_cast %887 : vector<1x2x32xf32> to vector<2x32xf32>
    %889 = vector.shape_cast %886 : vector<2x32xf32> to vector<1x2x32xf32>
    tpu.vector_store %arg13[%c0_470, %c0_471, %c0_472], %889 {strides = array<i32>} : memref<2x2x32xf32, #tpu.memory_space<vmem>>, vector<1x2x32xf32>,
    %c0_473 = arith.constant 0 : index
    %c0_474 = arith.constant 0 : index
    %c0_475 = arith.constant 0 : index
    %890 = vector.load %arg14[%c0_473, %c0_474, %c0_475] : memref<2x2x32xf32, #tpu.memory_space<vmem>>, vector<1x2x32xf32>
    %891 = vector.shape_cast %890 : vector<1x2x32xf32> to vector<2x32xf32>
    %892 = vector.shape_cast %884 : vector<2x32xf32> to vector<1x2x32xf32>
    tpu.vector_store %arg14[%c0_473, %c0_474, %c0_475], %892 {strides = array<i32>} : memref<2x2x32xf32, #tpu.memory_space<vmem>>, vector<1x2x32xf32>,
    %893 = arith.truncf %886 : vector<2x32xf32> to vector<2x32xbf16>
    %c1_476 = arith.constant 1 : index
    %c0_477 = arith.constant 0 : index
    %c0_478 = arith.constant 0 : index
    %894 = vector.load %arg13[%c1_476, %c0_477, %c0_478] : memref<2x2x32xf32, #tpu.memory_space<vmem>>, vector<1x2x32xf32>
    %895 = vector.shape_cast %894 : vector<1x2x32xf32> to vector<2x32xf32>
    %c1_479 = arith.constant 1 : index
    %c0_480 = arith.constant 0 : index
    %c0_481 = arith.constant 0 : index
    %896 = vector.load %arg14[%c1_479, %c0_480, %c0_481] : memref<2x2x32xf32, #tpu.memory_space<vmem>>, vector<1x2x32xf32>
    %897 = vector.shape_cast %896 : vector<1x2x32xf32> to vector<2x32xf32>
    %898 = arith.truncf %895 : vector<2x32xf32> to vector<2x32xbf16>
    %c1_482 = arith.constant 1 : index
    %c0_483 = arith.constant 0 : index
    %c0_484 = arith.constant 0 : index
    %899 = vector.load %arg4[%c1_482, %c0_483, %c0_484] : memref<2x32x128xbf16, #tpu.memory_space<vmem>>, vector<1x32x128xbf16>
    %900 = vector.shape_cast %899 : vector<1x32x128xbf16> to vector<32x128xbf16>
    %cst_485 = arith.constant dense<0.000000e+00> : vector<2x128xf32>
    %901 = tpu.matmul %898, %900, %cst_485 {dimension_numbers = #tpu.dot_dimension_numbers<[1], [0], [0], [1], [0, 0, 1, 1], [], []>} : vector<2x32xbf16>, vector<32x128xbf16>, vector<2x128xf32> -> vector<2x128xf32>
    %c0_486 = arith.constant 0 : index
    %c0_487 = arith.constant 0 : index
    %c0_488 = arith.constant 0 : index
    %902 = vector.load %arg3[%c0_486, %c0_487, %c0_488] : memref<1x32x128xbf16, #tpu.memory_space<vmem>>, vector<1x32x128xbf16>
    %903 = vector.shape_cast %902 : vector<1x32x128xbf16> to vector<32x128xbf16>
    %cst_489 = arith.constant dense<0.000000e+00> : vector<2x128xf32>
    %904 = tpu.matmul %893, %903, %cst_489 {dimension_numbers = #tpu.dot_dimension_numbers<[1], [0], [0], [1], [0, 0, 1, 1], [], []>} : vector<2x32xbf16>, vector<32x128xbf16>, vector<2x128xf32> -> vector<2x128xf32>
    %905 = arith.addf %904, %901 : vector<2x128xf32>
    %c1_490 = arith.constant 1 : index
    %c0_491 = arith.constant 0 : index
    %c0_492 = arith.constant 0 : index
    %906 = vector.load %arg5[%c1_490, %c0_491, %c0_492] : memref<2x1x128xf32, #tpu.memory_space<vmem>>, vector<1x1x128xf32>
    %907 = vector.shape_cast %906 : vector<1x1x128xf32> to vector<1x128xf32>
    %908 = vector.broadcast %907 : vector<1x128xf32> to vector<2x128xf32>
    %909 = arith.addf %905, %908 : vector<2x128xf32>
    %910 = vector.extract_strided_slice %909 {offsets = [0, 0], sizes = [2, 32], strides = [1, 1]} : vector<2x128xf32> to vector<2x32xf32>
    %911 = arith.negf %910 : vector<2x32xf32>
    %912 = math.exp %911 : vector<2x32xf32>
    %cst_493 = arith.constant 1.000000e+00 : f32
    %913 = vector.broadcast %cst_493 : f32 to vector<2x32xf32>
    %914 = arith.addf %913, %912 : vector<2x32xf32>
    %915 = arith.divf %913, %914 : vector<2x32xf32>
    %916 = vector.extract_strided_slice %909 {offsets = [0, 32], sizes = [2, 32], strides = [1, 1]} : vector<2x128xf32> to vector<2x32xf32>
    %917 = arith.negf %916 : vector<2x32xf32>
    %918 = math.exp %917 : vector<2x32xf32>
    %cst_494 = arith.constant 1.000000e+00 : f32
    %919 = vector.broadcast %cst_494 : f32 to vector<2x32xf32>
    %920 = arith.addf %919, %918 : vector<2x32xf32>
    %921 = arith.divf %919, %920 : vector<2x32xf32>
    %922 = vector.extract_strided_slice %909 {offsets = [0, 64], sizes = [2, 32], strides = [1, 1]} : vector<2x128xf32> to vector<2x32xf32>
    %923 = math.tanh %922 : vector<2x32xf32>
    %924 = vector.extract_strided_slice %909 {offsets = [0, 96], sizes = [2, 32], strides = [1, 1]} : vector<2x128xf32> to vector<2x32xf32>
    %925 = arith.negf %924 : vector<2x32xf32>
    %926 = math.exp %925 : vector<2x32xf32>
    %cst_495 = arith.constant 1.000000e+00 : f32
    %927 = vector.broadcast %cst_495 : f32 to vector<2x32xf32>
    %928 = arith.addf %927, %926 : vector<2x32xf32>
    %929 = arith.divf %927, %928 : vector<2x32xf32>
    %930 = arith.mulf %921, %897 : vector<2x32xf32>
    %931 = arith.mulf %915, %923 : vector<2x32xf32>
    %932 = arith.addf %930, %931 : vector<2x32xf32>
    %933 = math.tanh %932 : vector<2x32xf32>
    %934 = arith.mulf %929, %933 : vector<2x32xf32>
    %c1_496 = arith.constant 1 : index
    %c0_497 = arith.constant 0 : index
    %c0_498 = arith.constant 0 : index
    %935 = vector.load %arg13[%c1_496, %c0_497, %c0_498] : memref<2x2x32xf32, #tpu.memory_space<vmem>>, vector<1x2x32xf32>
    %936 = vector.shape_cast %935 : vector<1x2x32xf32> to vector<2x32xf32>
    %937 = vector.shape_cast %934 : vector<2x32xf32> to vector<1x2x32xf32>
    tpu.vector_store %arg13[%c1_496, %c0_497, %c0_498], %937 {strides = array<i32>} : memref<2x2x32xf32, #tpu.memory_space<vmem>>, vector<1x2x32xf32>,
    %c1_499 = arith.constant 1 : index
    %c0_500 = arith.constant 0 : index
    %c0_501 = arith.constant 0 : index
    %938 = vector.load %arg14[%c1_499, %c0_500, %c0_501] : memref<2x2x32xf32, #tpu.memory_space<vmem>>, vector<1x2x32xf32>
    %939 = vector.shape_cast %938 : vector<1x2x32xf32> to vector<2x32xf32>
    %940 = vector.shape_cast %932 : vector<2x32xf32> to vector<1x2x32xf32>
    tpu.vector_store %arg14[%c1_499, %c0_500, %c0_501], %940 {strides = array<i32>} : memref<2x2x32xf32, #tpu.memory_space<vmem>>, vector<1x2x32xf32>,
    %941 = arith.truncf %934 : vector<2x32xf32> to vector<2x32xbf16>
    %c0_502 = arith.constant 0 : index
    %c0_503 = arith.constant 0 : index
    %942 = vector.load %arg6[%c0_502, %c0_503] : memref<32x4xbf16, #tpu.memory_space<vmem>>, vector<32x4xbf16>
    %cst_504 = arith.constant dense<0.000000e+00> : vector<2x4xf32>
    %943 = tpu.matmul %941, %942, %cst_504 {dimension_numbers = #tpu.dot_dimension_numbers<[1], [0], [0], [1], [0, 0, 1, 1], [], []>} : vector<2x32xbf16>, vector<32x4xbf16>, vector<2x4xf32> -> vector<2x4xf32>
    %cst_505 = arith.constant dense<0xFF800000> : vector<2xf32>
    %944 = vector.multi_reduction <maximumf>, %943, %cst_505 [1] : vector<2x4xf32> to vector<2xf32>
    %945 = vector.shape_cast %944 : vector<2xf32> to vector<2x1xf32>
    %946 = vector.broadcast %945 : vector<2x1xf32> to vector<2x4xf32>
    %947 = arith.subf %943, %946 : vector<2x4xf32>
    %948 = math.exp %947 : vector<2x4xf32>
    %cst_506 = arith.constant dense<0.000000e+00> : vector<2xf32>
    %949 = vector.multi_reduction <add>, %948, %cst_506 [1] : vector<2x4xf32> to vector<2xf32>
    %950 = vector.shape_cast %949 : vector<2xf32> to vector<2x1xf32>
    %951 = tpu.reciprocal %950 {approx = true} : vector<2x1xf32> -> vector<2x1xf32>
    %952 = vector.broadcast %951 : vector<2x1xf32> to vector<2x4xf32>
    %953 = arith.mulf %948, %952 : vector<2x4xf32>
    %954 = arith.truncf %943 : vector<2x4xf32> to vector<2x4xbf16>
    %c0_507 = arith.constant 0 : index
    %c0_508 = arith.constant 0 : index
    %955 = vector.load %arg7[%c0_507, %c0_508] : memref<4x4xbf16, #tpu.memory_space<vmem>>, vector<4x4xbf16>
    %cst_509 = arith.constant dense<0.000000e+00> : vector<2x4xf32>
    %956 = tpu.matmul %954, %955, %cst_509 {dimension_numbers = #tpu.dot_dimension_numbers<[1], [0], [0], [1], [0, 0, 1, 1], [], []>} : vector<2x4xbf16>, vector<4x4xbf16>, vector<2x4xf32> -> vector<2x4xf32>
    %c0_510 = arith.constant 0 : index
    %c0_511 = arith.constant 0 : index
    %957 = vector.load %arg8[%c0_510, %c0_511] : memref<1x4xf32, #tpu.memory_space<vmem>>, vector<1x4xf32>
    %958 = vector.broadcast %957 : vector<1x4xf32> to vector<2x4xf32>
    %959 = arith.addf %956, %958 : vector<2x4xf32>
    %c0_512 = arith.constant 0 : index
    %960 = arith.index_cast %c7_i32 : i32 to index
    %c0_513 = arith.constant 0 : index
    %c0_514 = arith.constant 0 : index
    %961 = vector.load %arg11[%c0_512, %960, %c0_513, %c0_514] : memref<1x8x2x4xf32, #tpu.memory_space<vmem>>, vector<1x1x2x4xf32>
    %962 = vector.shape_cast %961 : vector<1x1x2x4xf32> to vector<2x4xf32>
    %963 = vector.shape_cast %953 : vector<2x4xf32> to vector<1x1x2x4xf32>
    tpu.vector_store %arg11[%c0_512, %960, %c0_513, %c0_514], %963 {strides = array<i32>} : memref<1x8x2x4xf32, #tpu.memory_space<vmem>>, vector<1x1x2x4xf32>,
    %964 = arith.mulf %959, %953 : vector<2x4xf32>
    %cst_515 = arith.constant dense<0.000000e+00> : vector<2xf32>
    %965 = vector.multi_reduction <add>, %964, %cst_515 [1] : vector<2x4xf32> to vector<2xf32>
    %966 = vector.shape_cast %965 : vector<2xf32> to vector<1x2xf32>
    %c0_516 = arith.constant 0 : index
    %c0_517 = arith.constant 0 : index
    %967 = arith.index_cast %c7_i32 : i32 to index
    %c0_518 = arith.constant 0 : index
    %968 = vector.load %arg12[%c0_516, %c0_517, %967, %c0_518] : memref<1x1x8x2xf32, #tpu.memory_space<vmem>>, vector<1x1x1x2xf32>
    %969 = vector.shape_cast %968 : vector<1x1x1x2xf32> to vector<1x2xf32>
    %970 = vector.shape_cast %966 : vector<1x2xf32> to vector<1x1x1x2xf32>
    tpu.vector_store %arg12[%c0_516, %c0_517, %967, %c0_518], %970 {strides = array<i32>} : memref<1x1x8x2xf32, #tpu.memory_space<vmem>>, vector<1x1x1x2xf32>,
    %c8_i32 = arith.constant 8 : i32
    return
  }
  func.func @transform_0(%arg0: i32, %arg1: i32) -> (i32, i32, i32, i32) {
    %c0_i32 = arith.constant 0 : i32
    %c0_i32_0 = arith.constant 0 : i32
    %c0_i32_1 = arith.constant 0 : i32
    return %arg0, %arg1, %c0_i32, %c0_i32_0 : i32, i32, i32, i32
  }
  func.func @transform_1(%arg0: i32, %arg1: i32) -> (i32, i32, i32) {
    %c0_i32 = arith.constant 0 : i32
    %c0_i32_0 = arith.constant 0 : i32
    %c0_i32_1 = arith.constant 0 : i32
    %c0_i32_2 = arith.constant 0 : i32
    return %c0_i32, %c0_i32_0, %c0_i32_1 : i32, i32, i32
  }
  func.func @transform_2(%arg0: i32, %arg1: i32) -> (i32, i32, i32) {
    %c0_i32 = arith.constant 0 : i32
    %c0_i32_0 = arith.constant 0 : i32
    %c0_i32_1 = arith.constant 0 : i32
    %c0_i32_2 = arith.constant 0 : i32
    return %c0_i32, %c0_i32_0, %c0_i32_1 : i32, i32, i32
  }
  func.func @transform_3(%arg0: i32, %arg1: i32) -> (i32, i32, i32) {
    %c0_i32 = arith.constant 0 : i32
    %c0_i32_0 = arith.constant 0 : i32
    %c0_i32_1 = arith.constant 0 : i32
    %c0_i32_2 = arith.constant 0 : i32
    return %c0_i32, %c0_i32_0, %c0_i32_1 : i32, i32, i32
  }
  func.func @transform_4(%arg0: i32, %arg1: i32) -> (i32, i32) {
    %c0_i32 = arith.constant 0 : i32
    %c0_i32_0 = arith.constant 0 : i32
    %c0_i32_1 = arith.constant 0 : i32
    return %c0_i32, %c0_i32_0 : i32, i32
  }
  func.func @transform_5(%arg0: i32, %arg1: i32) -> (i32, i32) {
    %c0_i32 = arith.constant 0 : i32
    %c0_i32_0 = arith.constant 0 : i32
    %c0_i32_1 = arith.constant 0 : i32
    return %c0_i32, %c0_i32_0 : i32, i32
  }
  func.func @transform_6(%arg0: i32, %arg1: i32) -> (i32, i32) {
    %c0_i32 = arith.constant 0 : i32
    %c0_i32_0 = arith.constant 0 : i32
    %c0_i32_1 = arith.constant 0 : i32
    return %c0_i32, %c0_i32_0 : i32, i32
  }
  func.func @transform_7(%arg0: i32, %arg1: i32) -> (i32, i32, i32, i32) {
    %c0_i32 = arith.constant 0 : i32
    %c0_i32_0 = arith.constant 0 : i32
    %c0_i32_1 = arith.constant 0 : i32
    %c0_i32_2 = arith.constant 0 : i32
    return %c0_i32, %arg0, %c0_i32_0, %c0_i32_1 : i32, i32, i32, i32
  }
  func.func @transform_8(%arg0: i32, %arg1: i32) -> (i32, i32, i32, i32) {
    %c0_i32 = arith.constant 0 : i32
    %c0_i32_0 = arith.constant 0 : i32
    %c0_i32_1 = arith.constant 0 : i32
    %c0_i32_2 = arith.constant 0 : i32
    return %c0_i32, %arg0, %c0_i32_0, %c0_i32_1 : i32, i32, i32, i32
  }
  func.func @transform_9(%arg0: i32, %arg1: i32) -> (i32, i32, i32, i32) {
    %c0_i32 = arith.constant 0 : i32
    %c0_i32_0 = arith.constant 0 : i32
    %c0_i32_1 = arith.constant 0 : i32
    return %arg0, %arg1, %c0_i32, %c0_i32_0 : i32, i32, i32, i32
  }
  func.func @transform_10(%arg0: i32, %arg1: i32) -> (i32, i32, i32, i32) {
    %c0_i32 = arith.constant 0 : i32
    %c0_i32_0 = arith.constant 0 : i32
    %c0_i32_1 = arith.constant 0 : i32
    return %arg0, %arg1, %c0_i32, %c0_i32_0 : i32, i32, i32, i32
  }
}

</mosaic_0001>

<bundles_post_ra>
// kernel: tpu_custom_call.1
= control target key start
LH: loop header
LB: loop body
LE: loop exit
PB: predicated region body
PF: predicated region fallthrough
CT: control target
= control target key end

     0   :  { %16 = vsyncpa [#allocation5], 0  ;;  %s3806_s0 = inlined_call_operand.vmem [shape: f32[1,8,2,128], index: 0, kind: input, shape index: {}]   ;;  %s3807_s1 = inlined_call_operand.hbm [shape: bf16[1,32,128], index: 1, kind: input, shape index: {}]   ;;  %s3808_s2 = inlined_call_operand.hbm [shape: bf16[2,32,128], index: 2, kind: input, shape index: {}]   ;;  %s3809_s3 = inlined_call_operand.vmem [shape: f32[2,1,128], index: 3, kind: input, shape index: {}]   ;;  %s3810_s4 = inlined_call_operand.vmem [shape: bf16[32,4], index: 4, kind: input, shape index: {}]   ;;  %s3811_s5 = inlined_call_operand.hbm [shape: bf16[4,4], index: 5, kind: input, shape index: {}]   ;;  %s3812_s6 = inlined_call_operand.hbm [shape: f32[1,4], index: 6, kind: input, shape index: {}]   ;;  %s3813_s7 = inlined_call_operand.vmem [shape: f32[2,1,2,32], index: 7, kind: input, shape index: {}]   ;;  %s3814_s8 = inlined_call_operand.hbm [shape: f32[2,1,2,32], index: 8, kind: input, shape index: {}]   ;;  %s3815_s9 = inlined_call_operand.vmem [shape: f32[1,8,2,4], index: 9, kind: output, shape index: {0}]   ;;  %s3816_s10 = inlined_call_operand.vmem [shape: f32[1,1,8,2], index: 10, kind: output, shape index: {1}]  }
   0x1   :  { %17 = vsyncpa [#allocation7], 0 }
   0x2   :  { %18 = vsyncpa [#allocation10], 0  ;;  %s38_s15 = sshll.u32 %s3808_s2, 4  ;;  %s3237_s16 = smov [#allocation6]   ;;  %s39_s15 = int_to_ptr.hbm [resolvable:$true] %s38_s15 }
   0x3   :  { %s40_s17 = sshll.u32 %s3237_s16, 4  ;;  %s67_s20 = sshll.u32 %s3812_s6, 4  ;;  %s41_s17 = int_to_ptr.vmem [resolvable:$true] %s40_s17  ;;  %s68_s20 = int_to_ptr.hbm [resolvable:$true] %s67_s20 }
   0x4   :  { %s3238_s21 = smov 64   ;;  %s3239_s22 = smov 4  }
   0x5   :  { %46 = dma.hbm_to_vmem [thread:$0]  %s39_s15, 512, %s41_s17, [#allocation7], %s3238_s21, %s3238_s21, %s3239_s22  }
   0x6   :  { %s3240_s23 = smov [#allocation9]   ;;  %s25_s2 = sshll.u32 %s3807_s1, 4  ;;  %s26_s2 = int_to_ptr.hbm [resolvable:$true] %s25_s2 }
   0x7   :  { %s69_s24 = sshll.u32 %s3240_s23, 4  ;;  %s56_s29 = sshll.u32 %s3811_s5, 4  ;;  %s70_s24 = int_to_ptr.vmem [resolvable:$true] %s69_s24  ;;  %s57_s29 = int_to_ptr.hbm [resolvable:$true] %s56_s29 }
   0x8   :  { %72 = dma.hbm_to_vmem [thread:$0]  %s68_s20, 16, %s70_s24, [#allocation10]  }
   0x9   :  { %s3241_s6 = smov [#allocation4]   ;;  %s3242_s11 = smov [#allocation8]  }
   0xa   :  { %s27_s30 = sshll.u32 %s3241_s6, 4  ;;  %s58_s12 = sshll.u32 %s3242_s11, 4  ;;  %s28_s30 = int_to_ptr.vmem [resolvable:$true] %s27_s30  ;;  %s59_s12 = int_to_ptr.vmem [resolvable:$true] %s58_s12 }
   0xb   :  { %33 = dma.hbm_to_vmem [thread:$0]  %s26_s2, 256, %s28_s30, [#allocation5], %s3238_s21, %s3238_s21, %s3239_s22  }
   0xc   :  { %s79_s1 = sshll.u32 %s3814_s8, 4  ;;  %s3243_s15 = smov [#allocation11]   ;;  %s80_s1 = int_to_ptr.hbm [resolvable:$true] %s79_s1 }
   0xd   :  { %61 = dma.hbm_to_vmem [thread:$0]  %s57_s29, 32, %s59_s12, [#allocation7]  }
   0xe   :  { %s81_s16 = sshll.u32 %s3243_s15, 4  ;;  %s3244_s5 = smov 32   ;;  %s82_s16 = int_to_ptr.vmem [resolvable:$true] %s81_s16 }
   0xf   :  { %s3245_s17 = smov 2  }
  0x10   :  { %87 = dma.hbm_to_vmem [thread:$0]  %s80_s1, 64, %s82_s16, [#allocation10], %s3244_s5, %s3244_s5, %s3245_s17  }
  0x11   :  { %3231 = dma.done.wait [#allocation5], 256  }
  0x12   :  { %3232 = vsyncadd [#allocation5], 4294967040 }
  0x13   :  { %3233 = dma.done.wait [#allocation7], 544  }
  0x14   :  { %3234 = vsyncadd [#allocation7], 4294966752 }
  0x15   :  { %3235 = dma.done.wait [#allocation10], 80  }
  0x16   :  { %3236 = vsyncadd [#allocation10], 4294967216  ;;  %vm115_vm0 = vcmask 254976   ;;  %v2862_v0 = vld [vmem:[#allocation6 + $0x8] sm:$0xff]  ;;  %v2861_v2 = vld [vmem:[#allocation6] sm:$0xff]  ;;  %vm142_vm1 = vcmask 261120  }
  0x17   :  { %v113_v1 = vld [vmem:[%s3813_s7] sm:$0x3]  ;;  %152 = vmatpush.bf16.msra.mxu0 %v2862_v0  ;;  %v118_v5 = vld [vmem:[#allocation11] sm:$0x3]  ;;  %s3246_s22 = smov 96   ;;  %v2864_v32 = vld [vmem:[#allocation6 + $0x18] sm:$0xff] }
  0x18   :  { %116 = vst.msk [vmem:[#allocation2] sm:$0x3] %vm115_vm0, %v113_v1  ;;  %v122_v6 = vld [vmem:[%s3806_s0] sm:$0x3]  ;;  %v2866_v33 = vld [vmem:[#allocation4 + $0x8] sm:$0xff]  ;;  %244 = vmatpush.bf16.msra.mxu1 %v2864_v32  ;;  %v2863_v35 = vld [vmem:[#allocation6 + $0x10] sm:$0xff] }
  0x19   :  { %120 = vst.msk [vmem:[#allocation3] sm:$0x3] %vm115_vm0, %v118_v5  ;;  %v114_v34 = vld [vmem:[%s3813_s7 + $0x2] sm:$0x3]  ;;  %279 = vmatpush.bf16.msra.mxu2 %v2866_v33  ;;  %v2865_v36 = vld [vmem:[#allocation4] sm:$0xff]  ;;  %v2869_v44 = vld [vmem:[#allocation6] sm:$0xff] }
  0x1a   :  { %117 = vst.msk [vmem:[#allocation2 + $0x2] sm:$0x3] %vm115_vm0, %v114_v34  ;;  %v2870_v43 = vld [vmem:[#allocation6 + $0x8] sm:$0xff]  ;;  %v119_v51 = vld [vmem:[#allocation11 + $0x2] sm:$0x3]  ;;  %vm401_vm14 = vcmask 1041408  }
  0x1b   :  { %153 = vmatpush.bf16.msra.mxu0 %v2861_v2  ;;  %121 = vst.msk [vmem:[#allocation3 + $0x2] sm:$0x3] %vm115_vm0, %v119_v51  ;;  %v2935_v52 = vld [vmem:[%s3809_s3 + $0x1] ss:$0 sm:$0xff]  ;;  %v2567_v57 = vld [vmem:[%s3806_s0 + $0x2] sm:$0x3] }
  0x1c   :  { %245 = vmatpush.bf16.msra.mxu1 %v2863_v35  ;;  %v2871_v51 = vld [vmem:[#allocation6 + $0x10] sm:$0xff]  ;;  %vm397_vm15 = vcmask 31744  }
  0x1d   :  { %280 = vmatpush.bf16.msra.mxu2 %v2865_v36 }
  0x1f   :  { %v123_v3 = vld [vmem:[#allocation2] sm:$0x3] }
  0x20   :  { %v125_v4 = vpack.c.bf16 %v123_v3, %v123_v3  ;;  %v124_v11 = vld [vmem:[#allocation3] sm:$0x3]  ;;  %460 = vmatpush.bf16.msrb.mxu1 %v2870_v43 }
  0x21   :  { %v214_v37 = vld [vmem:[#allocation2 + $0x2] sm:$0x3] }
  0x22   :  { %2535 = vmatmul.msk.bf16.vlgmr.msra.gmra.mxu0 %vm142_vm1, %v125_v4  ;;  %v217_v38 = vpack.c.bf16 %v214_v37, %v214_v37  ;;  %v216_v61 = vld [vmem:[#allocation3 + $0x2] sm:$0x3] }
  0x24   :  { %2545 = vmatmul.msk.bf16.vlgmr.msra.gmra.mxu1 %vm142_vm1, %v217_v38 }
  0x25   :  { %461 = vmatpush.bf16.msrb.mxu1 %v2869_v44 }
  0x9f   :  { %v155_v7 = vpop.f32.mrf.mxu0 }
  0xa0   :  { %v159_v8 = vadd.f32 %v155_v7, %v122_v6 }
  0xa1   :  { %v247_v49 = vpop.f32.mrf.mxu1 }
  0xa2   :  { %2951 = vtanh.f32 %v159_v8  ;;  %v2536_v12 = vmul.f32 -1.442695, %v159_v8 }
  0xa4   :  { %2953 = vpow2.f32 %v2536_v12 }
  0xa7   :  { %v157_v9 = vpop.f32.mrf.mxu0 }
  0xa8   :  { %v2952_v10 = vpop.eup %2951 }
  0xa9   :  { %186 = vrot.lane.b32.xlu0 %v2952_v10, %s3238_s21  ;;  %v249_v50 = vpop.f32.mrf.mxu1 }
  0xaa   :  { %v2954_v13 = vpop.eup %2953  ;;  %v2874_v50 = vld [vmem:[#allocation4 + $0x8] sm:$0xff] }
  0xab   :  { %v163_v14 = vadd.f32 1.0, %v2954_v13 }
  0xad   :  { %2955 = vrcp.f32 %v163_v14  ;;  %v175_v20 = vand.u32 2147483648, %v163_v14  ;;  %vm169_vm3 = vweird.f32 %v163_v14  ;;  %v173_v21 = vand.u32 2147483647, %v163_v14 }
  0xaf   :  { %v176_v23 = vor.u32 1.1754944e-38, %v175_v20  ;;  %vm174_vm5 = vcmp.eq.f32.partialorder %v173_v21, 8.507059e+37 }
  0xb1   :  { %181 = vrot.lane.b32.xlu0 %v124_v11, %s3244_s5 }
  0xb3   :  { %v2956_v15 = vpop.eup %2955 }
  0xb4   :  { %v165_v16 = vmul.f32 %v2956_v15, %v163_v14  ;;  %vm170_vm2 = vweird.f32 %v2956_v15 }
  0xb5   :  { %vm171_vm4 = vmor %vm169_vm3, %vm170_vm2 }
  0xb6   :  { %v166_v17 = vsub.f32 1.0, %v165_v16 }
  0xb8   :  { %v167_v18 = vmul.f32 %v2956_v15, %v166_v17 }
  0xba   :  { %v168_v19 = vadd.f32 %v2956_v15, %v167_v18 }
  0xbc   :  { %v172_v22 = vsel %vm171_vm4, %v2956_v15, %v168_v19 }
  0xbd   :  { %v177_v25 = vsel %vm174_vm5, %v176_v23, %v172_v22 }
 0x11b   :  { %v187_v24 = vpop.permute.xlu0 %186 }
 0x11c   :  { %v189_v26 = vmul.f32 %v187_v24, %v177_v25 }
 0x11e   :  { %191 = vrot.lane.b32.xlu1 %v189_v26, %s3244_s5 }
 0x123   :  { %v182_v27 = vpop.permute.xlu0 %181 }
 0x124   :  { %v184_v28 = vmul.f32 %v182_v27, %v177_v25 }
 0x190   :  { %v192_v29 = vpop.permute.xlu1 %191 }
 0x191   :  { %v194_v30 = vadd.f32 %v192_v29, %v184_v28 }
 0x193   :  { %2957 = vtanh.f32 %v194_v30 }
 0x199   :  { %v2958_v31 = vpop.eup %2957 }
 0x19a   :  { %197 = vrot.lane.b32.xlu1 %v2958_v31, %s3238_s21 }
 0x1a2   :  { %208 = vrot.lane.b32.xlu1 %v194_v30, %s3246_s22 }
 0x20c   :  { %v198_v39 = vpop.permute.xlu1 %197 }
 0x20d   :  { %v200_v40 = vmul.f32 %v198_v39, %v177_v25 }
 0x20f   :  { %v212_v41 = vpack.c.bf16 %v200_v40, %v200_v40 }
 0x211   :  { %256 = vrot.lane.b32.xlu2 %v212_v41, %s3244_s5 }
 0x214   :  { %v209_v42 = vpop.permute.xlu1 %208 }
 0x215   :  { %211 = vst.msk [vmem:[#allocation3] sm:$0x3] %vm115_vm0, %v209_v42 }
 0x219   :  { %202 = vrot.lane.b32.xlu2 %v200_v40, %s3244_s5 }
 0x21c   :  { %v433_v0 = vld [vmem:[#allocation3] sm:$0x3] }
 0x26b   :  { %v257_v45 = vpop.permute.xlu2 %256 }
 0x26c   :  { %2554 = vmatmul.msk.bf16.vlgmr.msra.gmra.mxu2 %vm142_vm1, %v257_v45 }
 0x273   :  { %v203_v46 = vpop.permute.xlu2 %202 }
 0x274   :  { %206 = vst.msk [vmem:[#allocation2] sm:$0x3] %vm115_vm0, %v203_v46 }
 0x27b   :  { %v432_v47 = vld [vmem:[#allocation2] sm:$0x3] }
 0x27c   :  { %v434_v48 = vpack.c.bf16 %v432_v47, %v432_v47  ;;  %v2868_v47 = vld [vmem:[%s3810_s4 + $0x8] sm:$0xff] }
 0x27d   :  { %372 = vmatpush.bf16.msra.mxu3 %v2868_v47 }
 0x27e   :  { %2576 = vmatmul.msk.bf16.vlgmr.msrb.gmra.mxu1 %vm142_vm1, %v434_v48  ;;  %v2867_v48 = vld [vmem:[%s3810_s4] sm:$0xff] }
 0x281   :  { %373 = vmatpush.bf16.msra.mxu3 %v2867_v48 }
 0x285   :  { %583 = vmatpush.bf16.msrb.mxu3 %v2874_v50 }
 0x2ef   :  { %v282_v53 = vpop.f32.mrf.mxu2 }
 0x2f0   :  { %v283_v54 = vadd.f32 %v282_v53, %v247_v49  ;;  %v2872_v49 = vld [vmem:[#allocation6 + $0x18] sm:$0xff]  ;;  %v2878_v53 = vld [vmem:[#allocation6 + $0x8] sm:$0xff] }
 0x2f1   :  { %548 = vmatpush.bf16.msrb.mxu2 %v2872_v49 }
 0x2f2   :  { %v291_v55 = vadd.f32 %v2935_v52, %v283_v54  ;;  %v2873_v52 = vld [vmem:[#allocation4] sm:$0xff]  ;;  %v2877_v54 = vld [vmem:[#allocation6] sm:$0xff] }
 0x2f3   :  { %584 = vmatpush.bf16.msrb.mxu3 %v2873_v52 }
 0x2f4   :  { %2959 = vtanh.f32 %v291_v55  ;;  %v2556_v4 = vmul.f32 -1.442695, %v291_v55 }
 0x2f5   :  { %549 = vmatpush.bf16.msrb.mxu2 %v2871_v51 }
 0x2f7   :  { %v284_v56 = vpop.f32.mrf.mxu2 }
 0x2f9   :  { %758 = vmatpush.bf16.msra.mxu2 %v2878_v53 }
 0x2fa   :  { %v2960_v58 = vpop.eup %2959 }
 0x2fb   :  { %318 = vrot.lane.b32.xlu0 %v2960_v58, %s3238_s21  ;;  %v463_v59 = vpop.f32.mrf.mxu1 }
 0x2fc   :  { %v467_v60 = vadd.f32 %v2567_v57, %v463_v59 }
 0x2fd   :  { %759 = vmatpush.bf16.msra.mxu2 %v2877_v54 }
 0x2fe   :  { %2961 = vtanh.f32 %v467_v60  ;;  %v2577_v1 = vmul.f32 -1.442695, %v467_v60 }
 0x300   :  { %2963 = vpow2.f32 %v2577_v1  ;;  %v392_v1 = vld [vmem:[#allocation8] sm:$0x3] }
 0x303   :  { %313 = vrot.lane.b32.xlu0 %v216_v61, %s3244_s5  ;;  %v465_v62 = vpop.f32.mrf.mxu1 }
 0x304   :  { %v2962_v63 = vpop.eup %2961 }
 0x305   :  { %494 = vrot.lane.b32.xlu2 %v2962_v63, %s3238_s21 }
 0x306   :  { %v2964_v2 = vpop.eup %2963 }
 0x307   :  { %v471_v3 = vadd.f32 1.0, %v2964_v2  ;;  %v403_v2 = vsel %vm401_vm14, %v392_v1, 0 }
 0x308   :  { %412 = vmatpush.bf16.msrb.mxu0 %v403_v2 }
 0x309   :  { %2965 = vrcp.f32 %v471_v3  ;;  %v483_v13 = vand.u32 2147483648, %v471_v3  ;;  %vm477_vm7 = vweird.f32 %v471_v3  ;;  %v481_v14 = vand.u32 2147483647, %v471_v3 }
 0x30a   :  { %2967 = vpow2.f32 %v2556_v4 }
 0x30b   :  { %v484_v17 = vor.u32 1.1754944e-38, %v483_v13  ;;  %vm482_vm9 = vcmp.eq.f32.partialorder %v481_v14, 8.507059e+37 }
 0x30d   :  { %489 = vrot.lane.b32.xlu2 %v433_v0, %s3244_s5 }
 0x30f   :  { %v2966_v5 = vpop.eup %2965 }
 0x310   :  { %v2968_v6 = vpop.eup %2967  ;;  %v473_v7 = vmul.f32 %v2966_v5, %v471_v3  ;;  %vm478_vm6 = vweird.f32 %v2966_v5 }
 0x311   :  { %v295_v8 = vadd.f32 1.0, %v2968_v6  ;;  %vm479_vm8 = vmor %vm477_vm7, %vm478_vm6 }
 0x312   :  { %v474_v9 = vsub.f32 1.0, %v473_v7  ;;  %v2936_v7 = vld [vmem:[%s3809_s3 + $0x1] ss:$0 sm:$0xff] }
 0x313   :  { %2969 = vrcp.f32 %v295_v8  ;;  %v307_v24 = vand.u32 2147483648, %v295_v8  ;;  %vm301_vm11 = vweird.f32 %v295_v8  ;;  %v305_v25 = vand.u32 2147483647, %v295_v8 }
 0x314   :  { %v475_v10 = vmul.f32 %v2966_v5, %v474_v9 }
 0x315   :  { %v308_v27 = vor.u32 1.1754944e-38, %v307_v24  ;;  %vm306_vm13 = vcmp.eq.f32.partialorder %v305_v25, 8.507059e+37 }
 0x316   :  { %v476_v12 = vadd.f32 %v2966_v5, %v475_v10 }
 0x318   :  { %v480_v16 = vsel %vm479_vm8, %v2966_v5, %v476_v12  ;;  %v2609_v12 = vld [vmem:[%s3806_s0 + $0x4] sm:$0x3] }
 0x319   :  { %v2970_v11 = vpop.eup %2969  ;;  %v485_v20 = vsel %vm482_vm9, %v484_v17, %v480_v16 }
 0x31a   :  { %v297_v15 = vmul.f32 %v2970_v11, %v295_v8  ;;  %vm302_vm10 = vweird.f32 %v2970_v11 }
 0x31b   :  { %vm303_vm12 = vmor %vm301_vm11, %vm302_vm10 }
 0x31c   :  { %v298_v18 = vsub.f32 1.0, %v297_v15 }
 0x31e   :  { %v299_v22 = vmul.f32 %v2970_v11, %v298_v18 }
 0x320   :  { %v300_v23 = vadd.f32 %v2970_v11, %v299_v22 }
 0x322   :  { %v304_v26 = vsel %vm303_vm12, %v2970_v11, %v300_v23 }
 0x323   :  { %v309_v29 = vsel %vm306_vm13, %v308_v27, %v304_v26 }
 0x35f   :  { %v495_v19 = vpop.permute.xlu2 %494 }
 0x360   :  { %v497_v21 = vmul.f32 %v495_v19, %v485_v20 }
 0x362   :  { %499 = vrot.lane.b32.xlu0 %v497_v21, %s3244_s5 }
 0x367   :  { %v490_v32 = vpop.permute.xlu2 %489 }
 0x368   :  { %v492_v33 = vmul.f32 %v490_v32, %v485_v20 }
 0x36d   :  { %v319_v28 = vpop.permute.xlu0 %318 }
 0x36e   :  { %v321_v30 = vmul.f32 %v319_v28, %v309_v29 }
 0x370   :  { %323 = vrot.lane.b32.xlu1 %v321_v30, %s3244_s5 }
 0x375   :  { %v314_v31 = vpop.permute.xlu0 %313 }
 0x376   :  { %v316_v37 = vmul.f32 %v314_v31, %v309_v29 }
 0x3d4   :  { %v500_v34 = vpop.permute.xlu0 %499 }
 0x3d5   :  { %v502_v35 = vadd.f32 %v500_v34, %v492_v33 }
 0x3d7   :  { %2971 = vtanh.f32 %v502_v35 }
 0x3dd   :  { %v2972_v36 = vpop.eup %2971 }
 0x3de   :  { %505 = vrot.lane.b32.xlu2 %v2972_v36, %s3238_s21 }
 0x3e2   :  { %v324_v38 = vpop.permute.xlu1 %323 }
 0x3e3   :  { %v326_v39 = vadd.f32 %v324_v38, %v316_v37 }
 0x3e5   :  { %2973 = vtanh.f32 %v326_v39 }
 0x3eb   :  { %v2974_v40 = vpop.eup %2973 }
 0x3ec   :  { %329 = vrot.lane.b32.xlu1 %v2974_v40, %s3238_s21 }
 0x438   :  { %v506_v41 = vpop.permute.xlu2 %505 }
 0x439   :  { %v508_v42 = vmul.f32 %v506_v41, %v485_v20 }
 0x43b   :  { %v519_v43 = vpack.c.bf16 %v508_v42, %v508_v42 }
 0x43d   :  { %560 = vrot.lane.b32.xlu2 %v519_v43, %s3244_s5 }
 0x45e   :  { %v330_v44 = vpop.permute.xlu1 %329 }
 0x45f   :  { %v332_v45 = vmul.f32 %v330_v44, %v309_v29 }
 0x461   :  { %334 = vrot.lane.b32.xlu1 %v332_v45, %s3244_s5  ;;  %v343_v46 = vpack.c.bf16 %v332_v45, %v332_v45 }
 0x463   :  { %349 = vrot.lane.b32.xlu0 %v343_v46, %s3244_s5 }
 0x469   :  { %339 = vrot.lane.b32.xlu1 %v326_v39, %s3246_s22 }
 0x46b   :  { %510 = vrot.lane.b32.xlu0 %v508_v42, %s3244_s5 }
 0x473   :  { %515 = vrot.lane.b32.xlu0 %v502_v35, %s3246_s22 }
 0x497   :  { %v561_v61 = vpop.permute.xlu2 %560 }
 0x4d3   :  { %v335_v55 = vpop.permute.xlu1 %334 }
 0x4d4   :  { %337 = vst.msk [vmem:[#allocation2 + $0x2] sm:$0x3] %vm115_vm0, %v335_v55 }
 0x4d5   :  { %v350_v56 = vpop.permute.xlu0 %349 }
 0x4d6   :  { %2565 = vmatmul.msk.bf16.vlgmr.msra.gmra.mxu3 %vm142_vm1, %v350_v56 }
 0x4db   :  { %v340_v57 = vpop.permute.xlu1 %339  ;;  %v520_v58 = vld [vmem:[#allocation2 + $0x2] sm:$0x3] }
 0x4dc   :  { %342 = vst.msk [vmem:[#allocation3 + $0x2] sm:$0x3] %vm115_vm0, %v340_v57  ;;  %v522_v59 = vpack.c.bf16 %v520_v58, %v520_v58 }
 0x4dd   :  { %v511_v60 = vpop.permute.xlu0 %510 }
 0x4de   :  { %513 = vst.msk [vmem:[#allocation2] sm:$0x3] %vm115_vm0, %v511_v60  ;;  %2586 = vmatmul.msk.bf16.vlgmr.msrb.gmra.mxu2 %vm142_vm1, %v522_v59 }
 0x4e3   :  { %v521_v19 = vld [vmem:[#allocation3 + $0x2] sm:$0x3] }
 0x4e5   :  { %v516_v62 = vpop.permute.xlu0 %515  ;;  %v730_v63 = vld [vmem:[#allocation2] sm:$0x3] }
 0x4e6   :  { %518 = vst.msk [vmem:[#allocation3] sm:$0x3] %vm115_vm0, %v516_v62  ;;  %2595 = vmatmul.msk.bf16.vlgmr.msrb.gmra.mxu3 %vm142_vm1, %v561_v61  ;;  %v732_v0 = vpack.c.bf16 %v730_v63, %v730_v63  ;;  %v2880_v63 = vld [vmem:[#allocation6 + $0x18] sm:$0xff] }
 0x4e7   :  { %846 = vmatpush.bf16.msra.mxu3 %v2880_v63 }
 0x4ed   :  { %v731_v20 = vld [vmem:[#allocation3] sm:$0x3] }
 0x4ee   :  { %2618 = vmatmul.msk.bf16.vlgmr.msra.gmra.mxu2 %vm142_vm1, %v732_v0 }
 0x559   :  { %v3384_v3 = vpop.f32.mrf.mxu3 }
 0x55a   :  { %v391_v4 = vpack.c.bf16 %v3384_v3, %v3384_v3 }
 0x55c   :  { %2566 = vmatmul.msk.bf16.vlgmr.msrb.gmra.mxu0 %vm397_vm15, %v391_v4 }
 0x561   :  { %v377_v5 = vpop.f32.mrf.mxu3  ;;  %v551_v6 = vpop.f32.mrf.mxu2 }
 0x569   :  { %v553_v8 = vpop.f32.mrf.mxu2  ;;  %v586_v9 = vpop.f32.mrf.mxu3 }
 0x56a   :  { %v587_v10 = vadd.f32 %v586_v9, %v551_v6  ;;  %v2886_v8 = vld [vmem:[#allocation6 + $0x8] sm:$0xff]  ;;  %v2885_v9 = vld [vmem:[#allocation6] sm:$0xff] }
 0x56c   :  { %v594_v11 = vadd.f32 %v2936_v7, %v587_v10  ;;  %v2879_v7 = vld [vmem:[#allocation6 + $0x10] sm:$0xff] }
 0x56d   :  { %847 = vmatpush.bf16.msra.mxu3 %v2879_v7  ;;  %v2876_v10 = vld [vmem:[%s3810_s4 + $0x8] sm:$0xff] }
 0x56e   :  { %2975 = vtanh.f32 %v594_v11  ;;  %v2597_v21 = vmul.f32 -1.442695, %v594_v11  ;;  %675 = vmatpush.bf16.msra.mxu0 %v2876_v10  ;;  %v2875_v11 = vld [vmem:[%s3810_s4] sm:$0xff] }
 0x571   :  { %v588_v13 = vpop.f32.mrf.mxu3  ;;  %v761_v14 = vpop.f32.mrf.mxu2  ;;  %1056 = vmatpush.bf16.msrb.mxu3 %v2886_v8 }
 0x572   :  { %v765_v15 = vadd.f32 %v2609_v12, %v761_v14  ;;  %676 = vmatpush.bf16.msra.mxu0 %v2875_v11  ;;  %v2882_v13 = vld [vmem:[#allocation4 + $0x8] sm:$0xff]  ;;  %v2881_v14 = vld [vmem:[#allocation4] sm:$0xff] }
 0x574   :  { %v2976_v16 = vpop.eup %2975  ;;  %2977 = vtanh.f32 %v765_v15  ;;  %v2619_v26 = vmul.f32 -1.442695, %v765_v15 }
 0x575   :  { %621 = vrot.lane.b32.xlu2 %v2976_v16, %s3238_s21  ;;  %2979 = vpow2.f32 %v2597_v21  ;;  %1057 = vmatpush.bf16.msrb.mxu3 %v2885_v9 }
 0x576   :  { %881 = vmatpush.bf16.msrb.mxu0 %v2882_v13 }
 0x579   :  { %v763_v17 = vpop.f32.mrf.mxu2 }
 0x57a   :  { %v2978_v18 = vpop.eup %2977  ;;  %882 = vmatpush.bf16.msrb.mxu0 %v2881_v14 }
 0x57b   :  { %792 = vrot.lane.b32.xlu1 %v2978_v18, %s3238_s21  ;;  %v2980_v22 = vpop.eup %2979 }
 0x57c   :  { %v598_v23 = vadd.f32 1.0, %v2980_v22 }
 0x57d   :  { %616 = vrot.lane.b32.xlu2 %v521_v19, %s3244_s5 }
 0x57e   :  { %2981 = vrcp.f32 %v598_v23  ;;  %v610_v30 = vand.u32 2147483648, %v598_v23  ;;  %vm604_vm3 = vweird.f32 %v598_v23  ;;  %v608_v32 = vand.u32 2147483647, %v598_v23 }
 0x57f   :  { %2983 = vpow2.f32 %v2619_v26 }
 0x580   :  { %v611_v35 = vor.u32 1.1754944e-38, %v610_v30  ;;  %vm609_vm5 = vcmp.eq.f32.partialorder %v608_v32, 8.507059e+37  ;;  %v2651_v30 = vld [vmem:[%s3806_s0 + $0x6] sm:$0x3] }
 0x583   :  { %787 = vrot.lane.b32.xlu1 %v731_v20, %s3244_s5 }
 0x584   :  { %v2982_v24 = vpop.eup %2981 }
 0x585   :  { %v600_v25 = vmul.f32 %v2982_v24, %v598_v23  ;;  %vm605_vm2 = vweird.f32 %v2982_v24  ;;  %v2984_v31 = vpop.eup %2983 }
 0x586   :  { %vm606_vm4 = vmor %vm604_vm3, %vm605_vm2  ;;  %v769_v34 = vadd.f32 1.0, %v2984_v31 }
 0x587   :  { %v601_v27 = vsub.f32 1.0, %v600_v25 }
 0x588   :  { %2985 = vrcp.f32 %v769_v34  ;;  %v781_v46 = vand.u32 2147483648, %v769_v34  ;;  %vm775_vm7 = vweird.f32 %v769_v34  ;;  %v779_v47 = vand.u32 2147483647, %v769_v34 }
 0x589   :  { %v602_v28 = vmul.f32 %v2982_v24, %v601_v27 }
 0x58a   :  { %v782_v49 = vor.u32 1.1754944e-38, %v781_v46  ;;  %vm780_vm9 = vcmp.eq.f32.partialorder %v779_v47, 8.507059e+37 }
 0x58b   :  { %v603_v29 = vadd.f32 %v2982_v24, %v602_v28 }
 0x58d   :  { %v607_v33 = vsel %vm606_vm4, %v2982_v24, %v603_v29  ;;  %v694_v24 = vld [vmem:[#allocation8] sm:$0x3] }
 0x58e   :  { %v612_v37 = vsel %vm609_vm5, %v611_v35, %v607_v33  ;;  %v2986_v39 = vpop.eup %2985  ;;  %v703_v25 = vsel %vm401_vm14, %v694_v24, 0 }
 0x58f   :  { %v771_v41 = vmul.f32 %v2986_v39, %v769_v34  ;;  %vm776_vm6 = vweird.f32 %v2986_v39  ;;  %712 = vmatpush.bf16.msra.mxu1 %v703_v25 }
 0x590   :  { %vm777_vm8 = vmor %vm775_vm7, %vm776_vm6 }
 0x591   :  { %v772_v42 = vsub.f32 1.0, %v771_v41 }
 0x593   :  { %v773_v44 = vmul.f32 %v2986_v39, %v772_v42 }
 0x595   :  { %v774_v45 = vadd.f32 %v2986_v39, %v773_v44 }
 0x597   :  { %v778_v48 = vsel %vm777_vm8, %v2986_v39, %v774_v45 }
 0x598   :  { %v783_v51 = vsel %vm780_vm9, %v782_v49, %v778_v48 }
 0x5cf   :  { %v622_v36 = vpop.permute.xlu2 %621 }
 0x5d0   :  { %v624_v38 = vmul.f32 %v622_v36, %v612_v37  ;;  %v2938_v36 = vld [vmem:[%s3809_s3 + $0x1] ss:$0 sm:$0xff] }
 0x5d2   :  { %626 = vrot.lane.b32.xlu0 %v624_v38, %s3244_s5 }
 0x5d7   :  { %v617_v53 = vpop.permute.xlu2 %616 }
 0x5d8   :  { %v619_v54 = vmul.f32 %v617_v53, %v612_v37 }
 0x5d9   :  { %v3400_v40 = vpop.f32.mrf.mxu0 }
 0x5e1   :  { %v416_v43 = vpop.f32.mrf.mxu0 }
 0x5ed   :  { %v793_v50 = vpop.permute.xlu1 %792 }
 0x5ee   :  { %v795_v52 = vmul.f32 %v793_v50, %v783_v51 }
 0x5f0   :  { %797 = vrot.lane.b32.xlu2 %v795_v52, %s3244_s5 }
 0x5f5   :  { %v788_v57 = vpop.permute.xlu1 %787 }
 0x5f6   :  { %v790_v58 = vmul.f32 %v788_v57, %v783_v51 }
 0x644   :  { %v627_v55 = vpop.permute.xlu0 %626 }
 0x645   :  { %v629_v56 = vadd.f32 %v627_v55, %v619_v54 }
 0x647   :  { %2987 = vtanh.f32 %v629_v56 }
 0x64a   :  { %v798_v59 = vpop.permute.xlu2 %797 }
 0x64b   :  { %v800_v60 = vadd.f32 %v798_v59, %v790_v58 }
 0x64d   :  { %v2988_v61 = vpop.eup %2987  ;;  %2989 = vtanh.f32 %v800_v60 }
 0x64e   :  { %632 = vrot.lane.b32.xlu0 %v2988_v61, %s3238_s21 }
 0x653   :  { %v2990_v62 = vpop.eup %2989 }
 0x654   :  { %803 = vrot.lane.b32.xlu1 %v2990_v62, %s3238_s21 }
 0x6c0   :  { %v633_v0 = vpop.permute.xlu0 %632 }
 0x6c1   :  { %v635_v1 = vmul.f32 %v633_v0, %v612_v37 }
 0x6c3   :  { %637 = vrot.lane.b32.xlu2 %v635_v1, %s3244_s5  ;;  %v646_v2 = vpack.c.bf16 %v635_v1, %v635_v1 }
 0x6c5   :  { %652 = vrot.lane.b32.xlu0 %v646_v2, %s3244_s5 }
 0x6c6   :  { %v804_v4 = vpop.permute.xlu1 %803 }
 0x6c7   :  { %v806_v5 = vmul.f32 %v804_v4, %v783_v51 }
 0x6c9   :  { %v817_v6 = vpack.c.bf16 %v806_v5, %v806_v5 }
 0x6cb   :  { %858 = vrot.lane.b32.xlu1 %v817_v6, %s3244_s5  ;;  %808 = vrot.lane.b32.xlu2 %v806_v5, %s3244_s5 }
 0x6cd   :  { %642 = vrot.lane.b32.xlu0 %v629_v56, %s3246_s22 }
 0x6d3   :  { %813 = vrot.lane.b32.xlu2 %v800_v60, %s3246_s22 }
 0x71d   :  { %v638_v12 = vpop.permute.xlu2 %637 }
 0x71e   :  { %640 = vst.msk [vmem:[#allocation2 + $0x2] sm:$0x3] %vm115_vm0, %v638_v12 }
 0x725   :  { %v809_v15 = vpop.permute.xlu2 %808  ;;  %v818_v16 = vld [vmem:[#allocation2 + $0x2] sm:$0x3] }
 0x726   :  { %811 = vst.msk [vmem:[#allocation2] sm:$0x3] %vm115_vm0, %v809_v15  ;;  %v820_v17 = vpack.c.bf16 %v818_v16, %v818_v16 }
 0x728   :  { %2628 = vmatmul.msk.bf16.vlgmr.msra.gmra.mxu3 %vm142_vm1, %v820_v17 }
 0x72d   :  { %v814_v18 = vpop.permute.xlu2 %813  ;;  %v1028_v19 = vld [vmem:[#allocation2] sm:$0x3] }
 0x72e   :  { %816 = vst.msk [vmem:[#allocation3] sm:$0x3] %vm115_vm0, %v814_v18  ;;  %v1030_v20 = vpack.c.bf16 %v1028_v19, %v1028_v19 }
 0x735   :  { %v1029_v41 = vld [vmem:[#allocation3] sm:$0x3] }
 0x737   :  { %v653_v21 = vpop.permute.xlu0 %652 }
 0x738   :  { %2606 = vmatmul.msk.bf16.vlgmr.msra.gmra.mxu0 %vm142_vm1, %v653_v21  ;;  %2660 = vmatmul.msk.bf16.vlgmr.msrb.gmra.mxu3 %vm142_vm1, %v1030_v20 }
 0x73d   :  { %v859_v23 = vpop.permute.xlu1 %858 }
 0x73f   :  { %v643_v22 = vpop.permute.xlu0 %642 }
 0x740   :  { %645 = vst.msk [vmem:[#allocation3 + $0x2] sm:$0x3] %vm115_vm0, %v643_v22 }
 0x747   :  { %v819_v44 = vld [vmem:[#allocation3 + $0x2] sm:$0x3] }
 0x748   :  { %2637 = vmatmul.msk.bf16.vlgmr.msrb.gmra.mxu0 %vm142_vm1, %v859_v23 }
 0x7ab   :  { %v849_v26 = vpop.f32.mrf.mxu3 }
 0x7b3   :  { %v851_v27 = vpop.f32.mrf.mxu3 }
 0x7b5   :  { %v3426_v28 = vpop.f32.mrf.mxu0 }
 0x7b6   :  { %v693_v29 = vpack.c.bf16 %v3426_v28, %v3426_v28 }
 0x7b8   :  { %2607 = vmatmul.msk.bf16.vlgmr.msra.gmra.mxu1 %vm397_vm15, %v693_v29 }
 0x7bb   :  { %v1059_v31 = vpop.f32.mrf.mxu3 }
 0x7bc   :  { %v1063_v32 = vadd.f32 %v2651_v30, %v1059_v31  ;;  %v2888_v31 = vld [vmem:[#allocation6 + $0x18] sm:$0xff] }
 0x7bd   :  { %v680_v33 = vpop.f32.mrf.mxu0  ;;  %1144 = vmatpush.bf16.msra.mxu0 %v2888_v31 }
 0x7be   :  { %2991 = vtanh.f32 %v1063_v32  ;;  %v2661_v45 = vmul.f32 -1.442695, %v1063_v32  ;;  %v2887_v32 = vld [vmem:[#allocation6 + $0x10] sm:$0xff] }
 0x7bf   :  { %v2884_v33 = vld [vmem:[%s3810_s4 + $0x8] sm:$0xff] }
 0x7c0   :  { %973 = vmatpush.bf16.msrb.mxu1 %v2884_v33 }
 0x7c1   :  { %1145 = vmatpush.bf16.msra.mxu0 %v2887_v32 }
 0x7c3   :  { %v1061_v34 = vpop.f32.mrf.mxu3 }
 0x7c4   :  { %v2992_v35 = vpop.eup %2991  ;;  %v2883_v34 = vld [vmem:[%s3810_s4] sm:$0xff] }
 0x7c5   :  { %1090 = vrot.lane.b32.xlu0 %v2992_v35, %s3238_s21  ;;  %v884_v37 = vpop.f32.mrf.mxu0  ;;  %974 = vmatpush.bf16.msrb.mxu1 %v2883_v34  ;;  %v2890_v35 = vld [vmem:[#allocation4 + $0x8] sm:$0xff] }
 0x7c6   :  { %v885_v38 = vadd.f32 %v884_v37, %v849_v26 }
 0x7c8   :  { %v892_v39 = vadd.f32 %v2938_v36, %v885_v38  ;;  %v2889_v36 = vld [vmem:[#allocation4] sm:$0xff] }
 0x7c9   :  { %1179 = vmatpush.bf16.msra.mxu1 %v2890_v35 }
 0x7ca   :  { %2993 = vtanh.f32 %v892_v39  ;;  %v2639_v47 = vmul.f32 -1.442695, %v892_v39 }
 0x7cb   :  { %2995 = vpow2.f32 %v2661_v45 }
 0x7cc   :  { %2997 = vpow2.f32 %v2639_v47 }
 0x7cd   :  { %1085 = vrot.lane.b32.xlu0 %v1029_v41, %s3244_s5  ;;  %v886_v42 = vpop.f32.mrf.mxu0  ;;  %1180 = vmatpush.bf16.msra.mxu1 %v2889_v36 }
 0x7d0   :  { %v2994_v43 = vpop.eup %2993 }
 0x7d1   :  { %919 = vrot.lane.b32.xlu1 %v2994_v43, %s3238_s21  ;;  %v2996_v46 = vpop.eup %2995  ;;  %v2894_v43 = vld [vmem:[#allocation6 + $0x8] sm:$0xff] }
 0x7d2   :  { %v1067_v48 = vadd.f32 1.0, %v2996_v46  ;;  %v2998_v49 = vpop.eup %2997  ;;  %1354 = vmatpush.bf16.msrb.mxu0 %v2894_v43 }
 0x7d3   :  { %v896_v51 = vadd.f32 1.0, %v2998_v49 }
 0x7d4   :  { %2999 = vrcp.f32 %v1067_v48  ;;  %v1079_v58 = vand.u32 2147483648, %v1067_v48  ;;  %vm1073_vm11 = vweird.f32 %v1067_v48  ;;  %v1077_v59 = vand.u32 2147483647, %v1067_v48 }
 0x7d5   :  { %3001 = vrcp.f32 %v896_v51  ;;  %v908_v7 = vand.u32 2147483648, %v896_v51  ;;  %vm902_vm3 = vweird.f32 %v896_v51  ;;  %v906_v8 = vand.u32 2147483647, %v896_v51 }
 0x7d6   :  { %v1080_v63 = vor.u32 1.1754944e-38, %v1079_v58  ;;  %vm1078_vm13 = vcmp.eq.f32.partialorder %v1077_v59, 8.507059e+37 }
 0x7d7   :  { %v909_v10 = vor.u32 1.1754944e-38, %v908_v7  ;;  %vm907_vm5 = vcmp.eq.f32.partialorder %v906_v8, 8.507059e+37 }
 0x7d9   :  { %914 = vrot.lane.b32.xlu1 %v819_v44, %s3244_s5  ;;  %v2893_v44 = vld [vmem:[#allocation6] sm:$0xff] }
 0x7da   :  { %v3000_v50 = vpop.eup %2999  ;;  %1355 = vmatpush.bf16.msrb.mxu0 %v2893_v44 }
 0x7db   :  { %v1069_v52 = vmul.f32 %v3000_v50, %v1067_v48  ;;  %v3002_v55 = vpop.eup %3001  ;;  %vm1074_vm10 = vweird.f32 %v3000_v50 }
 0x7dc   :  { %v898_v57 = vmul.f32 %v3002_v55, %v896_v51  ;;  %vm1075_vm12 = vmor %vm1073_vm11, %vm1074_vm10  ;;  %vm903_vm2 = vweird.f32 %v3002_v55 }
 0x7dd   :  { %v1070_v53 = vsub.f32 1.0, %v1069_v52  ;;  %vm904_vm4 = vmor %vm902_vm3, %vm903_vm2 }
 0x7de   :  { %v899_v61 = vsub.f32 1.0, %v898_v57  ;;  %v2940_v57 = vld [vmem:[%s3809_s3 + $0x1] ss:$0 sm:$0xff] }
 0x7df   :  { %v1071_v54 = vmul.f32 %v3000_v50, %v1070_v53 }
 0x7e0   :  { %v900_v4 = vmul.f32 %v3002_v55, %v899_v61  ;;  %v2693_v61 = vld [vmem:[%s3806_s0 + $0x8] sm:$0x3] }
 0x7e1   :  { %v1072_v56 = vadd.f32 %v3000_v50, %v1071_v54 }
 0x7e2   :  { %v901_v5 = vadd.f32 %v3002_v55, %v900_v4 }
 0x7e3   :  { %v1076_v60 = vsel %vm1075_vm12, %v3000_v50, %v1072_v56  ;;  %v992_v50 = vld [vmem:[#allocation8] sm:$0x3] }
 0x7e4   :  { %v1081_v0 = vsel %vm1078_vm13, %v1080_v63, %v1076_v60  ;;  %v905_v9 = vsel %vm904_vm4, %v3002_v55, %v901_v5  ;;  %v1001_v51 = vsel %vm401_vm14, %v992_v50, 0 }
 0x7e5   :  { %v910_v12 = vsel %vm907_vm5, %v909_v10, %v905_v9  ;;  %1010 = vmatpush.bf16.msrb.mxu2 %v1001_v51 }
 0x835   :  { %v3441_v62 = vpop.f32.mrf.mxu1 }
 0x837   :  { %v1091_v1 = vpop.permute.xlu0 %1090 }
 0x838   :  { %v1093_v2 = vmul.f32 %v1091_v1, %v1081_v0 }
 0x83a   :  { %1095 = vrot.lane.b32.xlu1 %v1093_v2, %s3244_s5 }
 0x83d   :  { %v716_v6 = vpop.f32.mrf.mxu1 }
 0x83f   :  { %v1086_v18 = vpop.permute.xlu0 %1085 }
 0x840   :  { %v1088_v20 = vmul.f32 %v1086_v18, %v1081_v0 }
 0x843   :  { %v920_v11 = vpop.permute.xlu1 %919 }
 0x844   :  { %v922_v13 = vmul.f32 %v920_v11, %v910_v12 }
 0x846   :  { %924 = vrot.lane.b32.xlu2 %v922_v13, %s3244_s5 }
 0x84b   :  { %v915_v14 = vpop.permute.xlu1 %914 }
 0x84c   :  { %v917_v15 = vmul.f32 %v915_v14, %v910_v12 }
 0x8a0   :  { %v925_v16 = vpop.permute.xlu2 %924 }
 0x8a1   :  { %v927_v17 = vadd.f32 %v925_v16, %v917_v15 }
 0x8a3   :  { %3003 = vtanh.f32 %v927_v17 }
 0x8a9   :  { %v3004_v19 = vpop.eup %3003 }
 0x8aa   :  { %930 = vrot.lane.b32.xlu2 %v3004_v19, %s3238_s21 }
 0x8ac   :  { %v1096_v21 = vpop.permute.xlu1 %1095 }
 0x8ad   :  { %v1098_v22 = vadd.f32 %v1096_v21, %v1088_v20 }
 0x8af   :  { %3005 = vtanh.f32 %v1098_v22 }
 0x8b5   :  { %v3006_v23 = vpop.eup %3005 }
 0x8b6   :  { %1101 = vrot.lane.b32.xlu0 %v3006_v23, %s3238_s21 }
 0x904   :  { %v931_v24 = vpop.permute.xlu2 %930 }
 0x905   :  { %v933_v25 = vmul.f32 %v931_v24, %v910_v12 }
 0x907   :  { %935 = vrot.lane.b32.xlu2 %v933_v25, %s3244_s5  ;;  %v944_v26 = vpack.c.bf16 %v933_v25, %v933_v25 }
 0x909   :  { %950 = vrot.lane.b32.xlu1 %v944_v26, %s3244_s5 }
 0x90f   :  { %940 = vrot.lane.b32.xlu2 %v927_v17, %s3246_s22 }
 0x928   :  { %v1102_v27 = vpop.permute.xlu0 %1101 }
 0x929   :  { %v1104_v29 = vmul.f32 %v1102_v27, %v1081_v0 }
 0x92b   :  { %1106 = vrot.lane.b32.xlu1 %v1104_v29, %s3244_s5  ;;  %v1115_v30 = vpack.c.bf16 %v1104_v29, %v1104_v29 }
 0x92d   :  { %1156 = vrot.lane.b32.xlu0 %v1115_v30, %s3244_s5 }
 0x933   :  { %1111 = vrot.lane.b32.xlu1 %v1098_v22, %s3246_s22 }
 0x961   :  { %v936_v37 = vpop.permute.xlu2 %935 }
 0x962   :  { %938 = vst.msk [vmem:[#allocation2 + $0x2] sm:$0x3] %vm115_vm0, %v936_v37 }
 0x969   :  { %v941_v38 = vpop.permute.xlu2 %940  ;;  %v1116_v39 = vld [vmem:[#allocation2 + $0x2] sm:$0x3] }
 0x96a   :  { %943 = vst.msk [vmem:[#allocation3 + $0x2] sm:$0x3] %vm115_vm0, %v941_v38  ;;  %v1118_v41 = vpack.c.bf16 %v1116_v39, %v1116_v39 }
 0x96c   :  { %2670 = vmatmul.msk.bf16.vlgmr.msra.gmra.mxu0 %vm142_vm1, %v1118_v41 }
 0x971   :  { %v1117_v6 = vld [vmem:[#allocation3 + $0x2] sm:$0x3] }
 0x97b   :  { %v951_v42 = vpop.permute.xlu1 %950 }
 0x97c   :  { %2648 = vmatmul.msk.bf16.vlgmr.msrb.gmra.mxu1 %vm142_vm1, %v951_v42 }
 0x99d   :  { %v1107_v45 = vpop.permute.xlu1 %1106 }
 0x99e   :  { %1109 = vst.msk [vmem:[#allocation2] sm:$0x3] %vm115_vm0, %v1107_v45 }
 0x99f   :  { %v1157_v46 = vpop.permute.xlu0 %1156 }
 0x9a0   :  { %2679 = vmatmul.msk.bf16.vlgmr.msra.gmra.mxu1 %vm142_vm1, %v1157_v46 }
 0x9a5   :  { %v1112_v47 = vpop.permute.xlu1 %1111  ;;  %v1326_v48 = vld [vmem:[#allocation2] sm:$0x3] }
 0x9a6   :  { %1114 = vst.msk [vmem:[#allocation3] sm:$0x3] %vm115_vm0, %v1112_v47  ;;  %v1328_v49 = vpack.c.bf16 %v1326_v48, %v1326_v48 }
 0x9a8   :  { %2702 = vmatmul.msk.bf16.vlgmr.msrb.gmra.mxu0 %vm142_vm1, %v1328_v49 }
 0x9ad   :  { %v1327_v7 = vld [vmem:[#allocation3] sm:$0x3] }
 0x9e9   :  { %v1147_v52 = vpop.f32.mrf.mxu0 }
 0x9f1   :  { %v1149_v53 = vpop.f32.mrf.mxu0 }
 0x9f9   :  { %v3468_v54 = vpop.f32.mrf.mxu1 }
 0x9fa   :  { %v991_v55 = vpack.c.bf16 %v3468_v54, %v3468_v54 }
 0x9fc   :  { %2649 = vmatmul.msk.bf16.vlgmr.msrb.gmra.mxu2 %vm397_vm15, %v991_v55 }
 0xa01   :  { %v978_v56 = vpop.f32.mrf.mxu1 }
 0xa1d   :  { %v1182_v58 = vpop.f32.mrf.mxu1 }
 0xa1e   :  { %v1183_v59 = vadd.f32 %v1182_v58, %v1147_v52 }
 0xa20   :  { %v1190_v60 = vadd.f32 %v2940_v57, %v1183_v59  ;;  %v2892_v59 = vld [vmem:[%s3810_s4 + $0x8] sm:$0xff] }
 0xa21   :  { %1271 = vmatpush.bf16.msra.mxu2 %v2892_v59 }
 0xa22   :  { %3007 = vtanh.f32 %v1190_v60  ;;  %v2681_v11 = vmul.f32 -1.442695, %v1190_v60  ;;  %v2891_v60 = vld [vmem:[%s3810_s4] sm:$0xff] }
 0xa25   :  { %v1184_v63 = vpop.f32.mrf.mxu1  ;;  %v1357_v0 = vpop.f32.mrf.mxu0  ;;  %1272 = vmatpush.bf16.msra.mxu2 %v2891_v60 }
 0xa26   :  { %v1361_v1 = vadd.f32 %v2693_v61, %v1357_v0  ;;  %v2896_v61 = vld [vmem:[#allocation6 + $0x18] sm:$0xff]  ;;  %v2895_v0 = vld [vmem:[#allocation6 + $0x10] sm:$0xff] }
 0xa27   :  { %v2898_v63 = vld [vmem:[#allocation4 + $0x8] sm:$0xff]  ;;  %1442 = vmatpush.bf16.msrb.mxu1 %v2896_v61 }
 0xa28   :  { %v3008_v2 = vpop.eup %3007  ;;  %3009 = vtanh.f32 %v1361_v1  ;;  %v2703_v8 = vmul.f32 -1.442695, %v1361_v1  ;;  %v2897_v1 = vld [vmem:[#allocation4] sm:$0xff] }
 0xa29   :  { %1217 = vrot.lane.b32.xlu0 %v3008_v2, %s3238_s21  ;;  %1477 = vmatpush.bf16.msrb.mxu2 %v2898_v63  ;;  %v2902_v2 = vld [vmem:[#allocation6 + $0x8] sm:$0xff] }
 0xa2a   :  { %3011 = vpow2.f32 %v2703_v8 }
 0xa2b   :  { %1443 = vmatpush.bf16.msrb.mxu1 %v2895_v0 }
 0xa2d   :  { %v1359_v4 = vpop.f32.mrf.mxu0  ;;  %1478 = vmatpush.bf16.msrb.mxu2 %v2897_v1 }
 0xa2e   :  { %v3010_v5 = vpop.eup %3009  ;;  %v2901_v4 = vld [vmem:[#allocation6] sm:$0xff] }
 0xa2f   :  { %1388 = vrot.lane.b32.xlu2 %v3010_v5, %s3238_s21  ;;  %1652 = vmatpush.bf16.msra.mxu1 %v2902_v2 }
 0xa30   :  { %v3012_v9 = vpop.eup %3011 }
 0xa31   :  { %1212 = vrot.lane.b32.xlu0 %v1117_v6, %s3244_s5  ;;  %v1365_v10 = vadd.f32 1.0, %v3012_v9 }
 0xa33   :  { %3013 = vrcp.f32 %v1365_v10  ;;  %v1377_v20 = vand.u32 2147483648, %v1365_v10  ;;  %vm1371_vm7 = vweird.f32 %v1365_v10  ;;  %v1375_v21 = vand.u32 2147483647, %v1365_v10  ;;  %1653 = vmatpush.bf16.msra.mxu1 %v2901_v4 }
 0xa34   :  { %3015 = vpow2.f32 %v2681_v11 }
 0xa35   :  { %v1378_v25 = vor.u32 1.1754944e-38, %v1377_v20  ;;  %vm1376_vm9 = vcmp.eq.f32.partialorder %v1375_v21, 8.507059e+37 }
 0xa37   :  { %1383 = vrot.lane.b32.xlu2 %v1327_v7, %s3244_s5 }
 0xa39   :  { %v3014_v12 = vpop.eup %3013 }
 0xa3a   :  { %v1367_v13 = vmul.f32 %v3014_v12, %v1365_v10  ;;  %v3016_v14 = vpop.eup %3015  ;;  %vm1372_vm6 = vweird.f32 %v3014_v12 }
 0xa3b   :  { %v1194_v16 = vadd.f32 1.0, %v3016_v14  ;;  %vm1373_vm8 = vmor %vm1371_vm7, %vm1372_vm6 }
 0xa3c   :  { %v1368_v15 = vsub.f32 1.0, %v1367_v13 }
 0xa3d   :  { %3017 = vrcp.f32 %v1194_v16  ;;  %v1206_v34 = vand.u32 2147483648, %v1194_v16  ;;  %vm1200_vm11 = vweird.f32 %v1194_v16  ;;  %v1204_v35 = vand.u32 2147483647, %v1194_v16 }
 0xa3e   :  { %v1369_v17 = vmul.f32 %v3014_v12, %v1368_v15  ;;  %v1290_v15 = vld [vmem:[#allocation8] sm:$0x3] }
 0xa3f   :  { %v1207_v37 = vor.u32 1.1754944e-38, %v1206_v34  ;;  %vm1205_vm13 = vcmp.eq.f32.partialorder %v1204_v35, 8.507059e+37 }
 0xa40   :  { %v1370_v19 = vadd.f32 %v3014_v12, %v1369_v17 }
 0xa42   :  { %v1374_v23 = vsel %vm1373_vm8, %v3014_v12, %v1370_v19 }
 0xa43   :  { %v3018_v22 = vpop.eup %3017  ;;  %v1379_v29 = vsel %vm1376_vm9, %v1378_v25, %v1374_v23  ;;  %v2942_v23 = vld [vmem:[%s3809_s3 + $0x1] ss:$0 sm:$0xff]  ;;  %v2735_v25 = vld [vmem:[%s3806_s0 + $0xa] sm:$0x3] }
 0xa44   :  { %v1196_v26 = vmul.f32 %v3018_v22, %v1194_v16  ;;  %vm1201_vm10 = vweird.f32 %v3018_v22  ;;  %v1299_v16 = vsel %vm401_vm14, %v1290_v15, 0 }
 0xa45   :  { %vm1202_vm12 = vmor %vm1200_vm11, %vm1201_vm10  ;;  %1308 = vmatpush.bf16.msra.mxu3 %v1299_v16 }
 0xa46   :  { %v1197_v31 = vsub.f32 1.0, %v1196_v26 }
 0xa48   :  { %v1198_v32 = vmul.f32 %v3018_v22, %v1197_v31 }
 0xa4a   :  { %v1199_v33 = vadd.f32 %v3018_v22, %v1198_v32 }
 0xa4c   :  { %v1203_v36 = vsel %vm1202_vm12, %v3018_v22, %v1199_v33 }
 0xa4d   :  { %v1208_v39 = vsel %vm1205_vm13, %v1207_v37, %v1203_v36 }
 0xa7f   :  { %v3483_v18 = vpop.f32.mrf.mxu2 }
 0xa87   :  { %v1014_v24 = vpop.f32.mrf.mxu2 }
 0xa89   :  { %v1389_v27 = vpop.permute.xlu2 %1388 }
 0xa8a   :  { %v1391_v30 = vmul.f32 %v1389_v27, %v1379_v29 }
 0xa8c   :  { %1393 = vrot.lane.b32.xlu0 %v1391_v30, %s3244_s5 }
 0xa91   :  { %v1384_v43 = vpop.permute.xlu2 %1383 }
 0xa92   :  { %v1386_v44 = vmul.f32 %v1384_v43, %v1379_v29 }
 0xa9b   :  { %v1218_v38 = vpop.permute.xlu0 %1217 }
 0xa9c   :  { %v1220_v41 = vmul.f32 %v1218_v38, %v1208_v39 }
 0xa9e   :  { %1222 = vrot.lane.b32.xlu1 %v1220_v41, %s3244_s5 }
 0xaa3   :  { %v1213_v42 = vpop.permute.xlu0 %1212 }
 0xaa4   :  { %v1215_v48 = vmul.f32 %v1213_v42, %v1208_v39 }
 0xafe   :  { %v1394_v45 = vpop.permute.xlu0 %1393 }
 0xaff   :  { %v1396_v46 = vadd.f32 %v1394_v45, %v1386_v44 }
 0xb01   :  { %3019 = vtanh.f32 %v1396_v46 }
 0xb07   :  { %v3020_v47 = vpop.eup %3019 }
 0xb08   :  { %1399 = vrot.lane.b32.xlu2 %v3020_v47, %s3238_s21 }
 0xb10   :  { %v1223_v49 = vpop.permute.xlu1 %1222 }
 0xb11   :  { %v1225_v50 = vadd.f32 %v1223_v49, %v1215_v48 }
 0xb13   :  { %3021 = vtanh.f32 %v1225_v50 }
 0xb19   :  { %v3022_v51 = vpop.eup %3021 }
 0xb1a   :  { %1228 = vrot.lane.b32.xlu1 %v3022_v51, %s3238_s21 }
 0xb62   :  { %v1400_v52 = vpop.permute.xlu2 %1399 }
 0xb63   :  { %v1402_v53 = vmul.f32 %v1400_v52, %v1379_v29 }
 0xb65   :  { %v1413_v55 = vpack.c.bf16 %v1402_v53, %v1402_v53 }
 0xb67   :  { %1454 = vrot.lane.b32.xlu2 %v1413_v55, %s3244_s5 }
 0xb8c   :  { %v1229_v56 = vpop.permute.xlu1 %1228 }
 0xb8d   :  { %v1231_v57 = vmul.f32 %v1229_v56, %v1208_v39 }
 0xb8f   :  { %1233 = vrot.lane.b32.xlu1 %v1231_v57, %s3244_s5  ;;  %v1242_v58 = vpack.c.bf16 %v1231_v57, %v1231_v57 }
 0xb91   :  { %1248 = vrot.lane.b32.xlu0 %v1242_v58, %s3244_s5 }
 0xb97   :  { %1238 = vrot.lane.b32.xlu1 %v1225_v50, %s3246_s22 }
 0xb99   :  { %1404 = vrot.lane.b32.xlu0 %v1402_v53, %s3244_s5 }
 0xba1   :  { %1409 = vrot.lane.b32.xlu0 %v1396_v46, %s3246_s22 }
 0xbc1   :  { %v1455_v11 = vpop.permute.xlu2 %1454 }
 0xc01   :  { %v1234_v5 = vpop.permute.xlu1 %1233 }
 0xc02   :  { %1236 = vst.msk [vmem:[#allocation2 + $0x2] sm:$0x3] %vm115_vm0, %v1234_v5 }
 0xc03   :  { %v1249_v6 = vpop.permute.xlu0 %1248 }
 0xc04   :  { %2690 = vmatmul.msk.bf16.vlgmr.msra.gmra.mxu2 %vm142_vm1, %v1249_v6 }
 0xc09   :  { %v1239_v7 = vpop.permute.xlu1 %1238  ;;  %v1414_v8 = vld [vmem:[#allocation2 + $0x2] sm:$0x3] }
 0xc0a   :  { %1241 = vst.msk [vmem:[#allocation3 + $0x2] sm:$0x3] %vm115_vm0, %v1239_v7  ;;  %v1416_v9 = vpack.c.bf16 %v1414_v8, %v1414_v8 }
 0xc0b   :  { %v1405_v10 = vpop.permute.xlu0 %1404 }
 0xc0c   :  { %1407 = vst.msk [vmem:[#allocation2] sm:$0x3] %vm115_vm0, %v1405_v10  ;;  %2712 = vmatmul.msk.bf16.vlgmr.msrb.gmra.mxu1 %vm142_vm1, %v1416_v9 }
 0xc11   :  { %v1415_v35 = vld [vmem:[#allocation3 + $0x2] sm:$0x3] }
 0xc13   :  { %v1410_v12 = vpop.permute.xlu0 %1409  ;;  %v1624_v13 = vld [vmem:[#allocation2] sm:$0x3] }
 0xc14   :  { %1412 = vst.msk [vmem:[#allocation3] sm:$0x3] %vm115_vm0, %v1410_v12  ;;  %2721 = vmatmul.msk.bf16.vlgmr.msrb.gmra.mxu2 %vm142_vm1, %v1455_v11  ;;  %v1626_v14 = vpack.c.bf16 %v1624_v13, %v1624_v13 }
 0xc1b   :  { %v1625_v36 = vld [vmem:[#allocation3] sm:$0x3] }
 0xc1c   :  { %2744 = vmatmul.msk.bf16.vlgmr.msra.gmra.mxu1 %vm142_vm1, %v1626_v14 }
 0xc87   :  { %v3510_v17 = vpop.f32.mrf.mxu2 }
 0xc88   :  { %v1289_v19 = vpack.c.bf16 %v3510_v17, %v3510_v17 }
 0xc89   :  { %v1445_v20 = vpop.f32.mrf.mxu1 }
 0xc8a   :  { %2691 = vmatmul.msk.bf16.vlgmr.msra.gmra.mxu3 %vm397_vm15, %v1289_v19 }
 0xc8f   :  { %v1276_v21 = vpop.f32.mrf.mxu2 }
 0xc90   :  { %v2900_v21 = vld [vmem:[%s3810_s4 + $0x8] sm:$0xff] }
 0xc91   :  { %v1447_v22 = vpop.f32.mrf.mxu1  ;;  %1569 = vmatpush.bf16.msrb.mxu3 %v2900_v21 }
 0xc92   :  { %v2899_v22 = vld [vmem:[%s3810_s4] sm:$0xff] }
 0xc95   :  { %1570 = vmatpush.bf16.msrb.mxu3 %v2899_v22 }
 0xc97   :  { %v1480_v24 = vpop.f32.mrf.mxu2 }
 0xc98   :  { %v1481_v26 = vadd.f32 %v1480_v24, %v1445_v20 }
 0xc99   :  { %v1655_v27 = vpop.f32.mrf.mxu1 }
 0xc9a   :  { %v1488_v29 = vadd.f32 %v2942_v23, %v1481_v26  ;;  %v1659_v30 = vadd.f32 %v2735_v25, %v1655_v27 }
 0xc9c   :  { %3023 = vtanh.f32 %v1488_v29  ;;  %v2723_v37 = vmul.f32 -1.442695, %v1488_v29  ;;  %v2745_v42 = vmul.f32 -1.442695, %v1659_v30 }
 0xc9d   :  { %3025 = vtanh.f32 %v1659_v30  ;;  %v2904_v30 = vld [vmem:[#allocation6 + $0x18] sm:$0xff] }
 0xc9e   :  { %3027 = vpow2.f32 %v2723_v37  ;;  %1740 = vmatpush.bf16.msra.mxu2 %v2904_v30 }
 0xc9f   :  { %v1482_v31 = vpop.f32.mrf.mxu2 }
 0xca0   :  { %v2906_v31 = vld [vmem:[#allocation4 + $0x8] sm:$0xff] }
 0xca1   :  { %v1657_v32 = vpop.f32.mrf.mxu1  ;;  %1775 = vmatpush.bf16.msra.mxu3 %v2906_v31 }
 0xca2   :  { %v3024_v33 = vpop.eup %3023  ;;  %v2905_v32 = vld [vmem:[#allocation4] sm:$0xff] }
 0xca3   :  { %v3026_v34 = vpop.eup %3025  ;;  %1515 = vrot.lane.b32.xlu2 %v3024_v33, %s3238_s21  ;;  %v2903_v33 = vld [vmem:[#allocation6 + $0x10] sm:$0xff] }
 0xca4   :  { %1686 = vrot.lane.b32.xlu1 %v3026_v34, %s3238_s21  ;;  %v3028_v38 = vpop.eup %3027  ;;  %1741 = vmatpush.bf16.msra.mxu2 %v2903_v33 }
 0xca5   :  { %v1492_v39 = vadd.f32 1.0, %v3028_v38  ;;  %1776 = vmatpush.bf16.msra.mxu3 %v2905_v32 }
 0xca7   :  { %3029 = vrcp.f32 %v1492_v39  ;;  %v1504_v49 = vand.u32 2147483648, %v1492_v39  ;;  %vm1498_vm3 = vweird.f32 %v1492_v39  ;;  %v1502_v50 = vand.u32 2147483647, %v1492_v39 }
 0xca8   :  { %3031 = vpow2.f32 %v2745_v42 }
 0xca9   :  { %v1505_v52 = vor.u32 1.1754944e-38, %v1504_v49  ;;  %vm1503_vm5 = vcmp.eq.f32.partialorder %v1502_v50, 8.507059e+37 }
 0xcab   :  { %1510 = vrot.lane.b32.xlu2 %v1415_v35, %s3244_s5  ;;  %v2910_v35 = vld [vmem:[#allocation6 + $0x8] sm:$0xff] }
 0xcac   :  { %1681 = vrot.lane.b32.xlu1 %v1625_v36, %s3244_s5  ;;  %1950 = vmatpush.bf16.msrb.mxu2 %v2910_v35  ;;  %v2909_v36 = vld [vmem:[#allocation6] sm:$0xff] }
 0xcad   :  { %v3030_v41 = vpop.eup %3029 }
 0xcae   :  { %v1494_v43 = vmul.f32 %v3030_v41, %v1492_v39  ;;  %v3032_v46 = vpop.eup %3031  ;;  %vm1499_vm2 = vweird.f32 %v3030_v41 }
 0xcaf   :  { %v1663_v47 = vadd.f32 1.0, %v3032_v46  ;;  %vm1500_vm4 = vmor %vm1498_vm3, %vm1499_vm2 }
 0xcb0   :  { %v1495_v44 = vsub.f32 1.0, %v1494_v43  ;;  %1951 = vmatpush.bf16.msrb.mxu2 %v2909_v36 }
 0xcb1   :  { %3033 = vrcp.f32 %v1663_v47  ;;  %v1675_v0 = vand.u32 2147483648, %v1663_v47  ;;  %vm1669_vm7 = vweird.f32 %v1663_v47  ;;  %v1673_v1 = vand.u32 2147483647, %v1663_v47 }
 0xcb2   :  { %v1496_v45 = vmul.f32 %v3030_v41, %v1495_v44 }
 0xcb3   :  { %v1676_v4 = vor.u32 1.1754944e-38, %v1675_v0  ;;  %vm1674_vm9 = vcmp.eq.f32.partialorder %v1673_v1, 8.507059e+37 }
 0xcb4   :  { %v1497_v48 = vadd.f32 %v3030_v41, %v1496_v45 }
 0xcb6   :  { %v1501_v51 = vsel %vm1500_vm4, %v3030_v41, %v1497_v48 }
 0xcb7   :  { %v1506_v55 = vsel %vm1503_vm5, %v1505_v52, %v1501_v51  ;;  %v3034_v57 = vpop.eup %3033 }
 0xcb8   :  { %v1665_v58 = vmul.f32 %v3034_v57, %v1663_v47  ;;  %vm1670_vm6 = vweird.f32 %v3034_v57  ;;  %v1588_v47 = vld [vmem:[#allocation8] sm:$0x3] }
 0xcb9   :  { %vm1671_vm8 = vmor %vm1669_vm7, %vm1670_vm6  ;;  %v1597_v48 = vsel %vm401_vm14, %v1588_v47, 0 }
 0xcba   :  { %v1666_v59 = vsub.f32 1.0, %v1665_v58  ;;  %1606 = vmatpush.bf16.msra.mxu0 %v1597_v48 }
 0xcbc   :  { %v1667_v60 = vmul.f32 %v3034_v57, %v1666_v59 }
 0xcbe   :  { %v1668_v63 = vadd.f32 %v3034_v57, %v1667_v60 }
 0xcc0   :  { %v1672_v2 = vsel %vm1671_vm8, %v3034_v57, %v1668_v63  ;;  %v2777_v63 = vld [vmem:[%s3806_s0 + $0xc] sm:$0x3] }
 0xcc1   :  { %v1677_v7 = vsel %vm1674_vm9, %v1676_v4, %v1672_v2 }
 0xcfd   :  { %v1516_v53 = vpop.permute.xlu2 %1515 }
 0xcfe   :  { %v1518_v56 = vmul.f32 %v1516_v53, %v1506_v55  ;;  %v2944_v53 = vld [vmem:[%s3809_s3 + $0x1] ss:$0 sm:$0xff] }
 0xd00   :  { %1520 = vrot.lane.b32.xlu0 %v1518_v56, %s3244_s5 }
 0xd05   :  { %v1511_v9 = vpop.permute.xlu2 %1510 }
 0xd06   :  { %v1513_v11 = vmul.f32 %v1511_v9, %v1506_v55 }
 0xd0d   :  { %v3526_v61 = vpop.f32.mrf.mxu3 }
 0xd15   :  { %v1312_v5 = vpop.f32.mrf.mxu3 }
 0xd16   :  { %v1687_v6 = vpop.permute.xlu1 %1686 }
 0xd17   :  { %v1689_v8 = vmul.f32 %v1687_v6, %v1677_v7 }
 0xd19   :  { %1691 = vrot.lane.b32.xlu2 %v1689_v8, %s3244_s5 }
 0xd1e   :  { %v1682_v10 = vpop.permute.xlu1 %1681 }
 0xd1f   :  { %v1684_v12 = vmul.f32 %v1682_v10, %v1677_v7 }
 0xd72   :  { %v1521_v13 = vpop.permute.xlu0 %1520 }
 0xd73   :  { %v1692_v14 = vpop.permute.xlu2 %1691  ;;  %v1523_v15 = vadd.f32 %v1521_v13, %v1513_v11 }
 0xd74   :  { %v1694_v16 = vadd.f32 %v1692_v14, %v1684_v12 }
 0xd75   :  { %3035 = vtanh.f32 %v1523_v15 }
 0xd76   :  { %3037 = vtanh.f32 %v1694_v16 }
 0xd7b   :  { %v3036_v19 = vpop.eup %3035 }
 0xd7c   :  { %v3038_v20 = vpop.eup %3037  ;;  %1526 = vrot.lane.b32.xlu0 %v3036_v19, %s3238_s21 }
 0xd7d   :  { %1697 = vrot.lane.b32.xlu1 %v3038_v20, %s3238_s21 }
 0xdee   :  { %v1527_v23 = vpop.permute.xlu0 %1526 }
 0xdef   :  { %v1698_v24 = vpop.permute.xlu1 %1697  ;;  %v1529_v25 = vmul.f32 %v1527_v23, %v1506_v55 }
 0xdf0   :  { %v1700_v26 = vmul.f32 %v1698_v24, %v1677_v7 }
 0xdf1   :  { %1531 = vrot.lane.b32.xlu0 %v1529_v25, %s3244_s5  ;;  %v1540_v27 = vpack.c.bf16 %v1529_v25, %v1529_v25 }
 0xdf2   :  { %v1711_v29 = vpack.c.bf16 %v1700_v26, %v1700_v26 }
 0xdf3   :  { %1546 = vrot.lane.b32.xlu2 %v1540_v27, %s3244_s5 }
 0xdf4   :  { %1752 = vrot.lane.b32.xlu1 %v1711_v29, %s3244_s5 }
 0xdf9   :  { %1536 = vrot.lane.b32.xlu0 %v1523_v15, %s3246_s22 }
 0xdfb   :  { %1702 = vrot.lane.b32.xlu2 %v1700_v26, %s3244_s5 }
 0xe03   :  { %1707 = vrot.lane.b32.xlu2 %v1694_v16, %s3246_s22 }
 0xe4d   :  { %v1547_v34 = vpop.permute.xlu2 %1546 }
 0xe4e   :  { %2732 = vmatmul.msk.bf16.vlgmr.msrb.gmra.mxu3 %vm142_vm1, %v1547_v34 }
 0xe55   :  { %v1703_v37 = vpop.permute.xlu2 %1702 }
 0xe56   :  { %1705 = vst.msk [vmem:[#allocation2] sm:$0x3] %vm115_vm0, %v1703_v37 }
 0xe5d   :  { %v1708_v38 = vpop.permute.xlu2 %1707  ;;  %v1922_v45 = vld [vmem:[#allocation2] sm:$0x3] }
 0xe5e   :  { %1710 = vst.msk [vmem:[#allocation3] sm:$0x3] %vm115_vm0, %v1708_v38  ;;  %v1924_v46 = vpack.c.bf16 %v1922_v45, %v1922_v45 }
 0xe63   :  { %v1532_v39 = vpop.permute.xlu0 %1531 }
 0xe64   :  { %1534 = vst.msk [vmem:[#allocation2 + $0x2] sm:$0x3] %vm115_vm0, %v1532_v39 }
 0xe65   :  { %v1923_v6 = vld [vmem:[#allocation3] sm:$0x3] }
 0xe66   :  { %v1753_v41 = vpop.permute.xlu1 %1752 }
 0xe67   :  { %2763 = vmatmul.msk.bf16.vlgmr.msra.gmra.mxu3 %vm142_vm1, %v1753_v41 }
 0xe6b   :  { %v1537_v42 = vpop.permute.xlu0 %1536  ;;  %v1712_v43 = vld [vmem:[#allocation2 + $0x2] sm:$0x3] }
 0xe6c   :  { %1539 = vst.msk [vmem:[#allocation3 + $0x2] sm:$0x3] %vm115_vm0, %v1537_v42  ;;  %v1714_v44 = vpack.c.bf16 %v1712_v43, %v1712_v43 }
 0xe6e   :  { %2754 = vmatmul.msk.bf16.vlgmr.msra.gmra.mxu2 %vm142_vm1, %v1714_v44 }
 0xe73   :  { %v1713_v2 = vld [vmem:[#allocation3 + $0x2] sm:$0x3] }
 0xe7e   :  { %2786 = vmatmul.msk.bf16.vlgmr.msrb.gmra.mxu2 %vm142_vm1, %v1924_v46 }
 0xed1   :  { %v3552_v49 = vpop.f32.mrf.mxu3 }
 0xed2   :  { %v1587_v50 = vpack.c.bf16 %v3552_v49, %v3552_v49 }
 0xed4   :  { %2733 = vmatmul.msk.bf16.vlgmr.msra.gmra.mxu0 %vm397_vm15, %v1587_v50 }
 0xed9   :  { %v1574_v51 = vpop.f32.mrf.mxu3 }
 0xeea   :  { %v1778_v52 = vpop.f32.mrf.mxu3 }
 0xef1   :  { %v1743_v55 = vpop.f32.mrf.mxu2 }
 0xef2   :  { %v1779_v56 = vadd.f32 %v1778_v52, %v1743_v55  ;;  %v1780_v57 = vpop.f32.mrf.mxu3 }
 0xef4   :  { %v1786_v58 = vadd.f32 %v2944_v53, %v1779_v56 }
 0xef6   :  { %3039 = vtanh.f32 %v1786_v58  ;;  %v2765_v7 = vmul.f32 -1.442695, %v1786_v58  ;;  %v2908_v58 = vld [vmem:[%s3810_s4 + $0x8] sm:$0xff] }
 0xef7   :  { %1867 = vmatpush.bf16.msrb.mxu0 %v2908_v58 }
 0xef9   :  { %v1745_v59 = vpop.f32.mrf.mxu2 }
 0xefa   :  { %v2907_v59 = vld [vmem:[%s3810_s4] sm:$0xff] }
 0xefb   :  { %1868 = vmatpush.bf16.msrb.mxu0 %v2907_v59 }
 0xefc   :  { %v3040_v60 = vpop.eup %3039 }
 0xefd   :  { %1813 = vrot.lane.b32.xlu1 %v3040_v60, %s3238_s21 }
 0xf01   :  { %v1953_v0 = vpop.f32.mrf.mxu2 }
 0xf02   :  { %v1957_v1 = vadd.f32 %v2777_v63, %v1953_v0 }
 0xf04   :  { %3041 = vtanh.f32 %v1957_v1  ;;  %v2787_v10 = vmul.f32 -1.442695, %v1957_v1  ;;  %v2912_v1 = vld [vmem:[#allocation6 + $0x18] sm:$0xff] }
 0xf05   :  { %1808 = vrot.lane.b32.xlu1 %v1713_v2, %s3244_s5  ;;  %3043 = vpow2.f32 %v2765_v7  ;;  %2038 = vmatpush.bf16.msrb.mxu3 %v2912_v1  ;;  %v2911_v2 = vld [vmem:[#allocation6 + $0x10] sm:$0xff] }
 0xf09   :  { %v1955_v4 = vpop.f32.mrf.mxu2  ;;  %2039 = vmatpush.bf16.msrb.mxu3 %v2911_v2 }
 0xf0a   :  { %v3042_v5 = vpop.eup %3041 }
 0xf0b   :  { %1984 = vrot.lane.b32.xlu0 %v3042_v5, %s3238_s21  ;;  %v3044_v8 = vpop.eup %3043  ;;  %v2914_v5 = vld [vmem:[#allocation4 + $0x8] sm:$0xff] }
 0xf0c   :  { %v1790_v9 = vadd.f32 1.0, %v3044_v8  ;;  %2073 = vmatpush.bf16.msra.mxu0 %v2914_v5 }
 0xf0e   :  { %3045 = vrcp.f32 %v1790_v9  ;;  %v1802_v23 = vand.u32 2147483648, %v1790_v9  ;;  %vm1796_vm11 = vweird.f32 %v1790_v9  ;;  %v1800_v24 = vand.u32 2147483647, %v1790_v9 }
 0xf0f   :  { %3047 = vpow2.f32 %v2787_v10 }
 0xf10   :  { %v1803_v27 = vor.u32 1.1754944e-38, %v1802_v23  ;;  %vm1801_vm13 = vcmp.eq.f32.partialorder %v1800_v24, 8.507059e+37 }
 0xf13   :  { %1979 = vrot.lane.b32.xlu0 %v1923_v6, %s3244_s5  ;;  %v2913_v6 = vld [vmem:[#allocation4] sm:$0xff] }
 0xf14   :  { %v3046_v12 = vpop.eup %3045  ;;  %2074 = vmatpush.bf16.msra.mxu0 %v2913_v6 }
 0xf15   :  { %v3048_v14 = vpop.eup %3047  ;;  %v1792_v15 = vmul.f32 %v3046_v12, %v1790_v9  ;;  %vm1797_vm10 = vweird.f32 %v3046_v12 }
 0xf16   :  { %v1961_v16 = vadd.f32 1.0, %v3048_v14  ;;  %vm1798_vm12 = vmor %vm1796_vm11, %vm1797_vm10 }
 0xf17   :  { %v1793_v19 = vsub.f32 1.0, %v1792_v15 }
 0xf18   :  { %3049 = vrcp.f32 %v1961_v16  ;;  %v1973_v35 = vand.u32 2147483648, %v1961_v16  ;;  %vm1967_vm3 = vweird.f32 %v1961_v16  ;;  %v1971_v36 = vand.u32 2147483647, %v1961_v16 }
 0xf19   :  { %v1794_v20 = vmul.f32 %v3046_v12, %v1793_v19 }
 0xf1a   :  { %v1974_v38 = vor.u32 1.1754944e-38, %v1973_v35  ;;  %vm1972_vm5 = vcmp.eq.f32.partialorder %v1971_v36, 8.507059e+37  ;;  %v2819_v35 = vld [vmem:[%s3806_s0 + $0xe] sm:$0x3] }
 0xf1b   :  { %v1795_v22 = vadd.f32 %v3046_v12, %v1794_v20 }
 0xf1d   :  { %v1799_v26 = vsel %vm1798_vm12, %v3046_v12, %v1795_v22  ;;  %v2918_v12 = vld [vmem:[#allocation6 + $0x8] sm:$0xff] }
 0xf1e   :  { %v3050_v21 = vpop.eup %3049  ;;  %v1804_v31 = vsel %vm1801_vm13, %v1803_v27, %v1799_v26  ;;  %2248 = vmatpush.bf16.msra.mxu3 %v2918_v12 }
 0xf1f   :  { %v1963_v25 = vmul.f32 %v3050_v21, %v1961_v16  ;;  %vm1968_vm2 = vweird.f32 %v3050_v21 }
 0xf20   :  { %vm1969_vm4 = vmor %vm1967_vm3, %vm1968_vm2 }
 0xf21   :  { %v1964_v29 = vsub.f32 1.0, %v1963_v25 }
 0xf23   :  { %v1965_v33 = vmul.f32 %v3050_v21, %v1964_v29  ;;  %v2946_v29 = vld [vmem:[%s3809_s3 + $0x1] ss:$0 sm:$0xff] }
 0xf25   :  { %v1966_v34 = vadd.f32 %v3050_v21, %v1965_v33 }
 0xf27   :  { %v1970_v37 = vsel %vm1969_vm4, %v3050_v21, %v1966_v34  ;;  %v1886_v21 = vld [vmem:[#allocation8] sm:$0x3] }
 0xf28   :  { %v1975_v41 = vsel %vm1972_vm5, %v1974_v38, %v1970_v37  ;;  %v1895_v22 = vsel %vm401_vm14, %v1886_v21, 0 }
 0xf29   :  { %1904 = vmatpush.bf16.msrb.mxu1 %v1895_v22 }
 0xf51   :  { %v3567_v11 = vpop.f32.mrf.mxu0 }
 0xf59   :  { %v1610_v13 = vpop.f32.mrf.mxu0 }
 0xf5a   :  { %v2917_v13 = vld [vmem:[#allocation6] sm:$0xff] }
 0xf5b   :  { %2249 = vmatpush.bf16.msra.mxu3 %v2917_v13 }
 0xf6f   :  { %v1814_v30 = vpop.permute.xlu1 %1813 }
 0xf70   :  { %v1816_v32 = vmul.f32 %v1814_v30, %v1804_v31 }
 0xf72   :  { %1818 = vrot.lane.b32.xlu2 %v1816_v32, %s3244_s5 }
 0xf77   :  { %v1809_v43 = vpop.permute.xlu1 %1808 }
 0xf78   :  { %v1811_v44 = vmul.f32 %v1809_v43, %v1804_v31 }
 0xf7d   :  { %v1985_v39 = vpop.permute.xlu0 %1984 }
 0xf7e   :  { %v1987_v42 = vmul.f32 %v1985_v39, %v1975_v41 }
 0xf80   :  { %1989 = vrot.lane.b32.xlu1 %v1987_v42, %s3244_s5 }
 0xf85   :  { %v1980_v48 = vpop.permute.xlu0 %1979 }
 0xf86   :  { %v1982_v50 = vmul.f32 %v1980_v48, %v1975_v41 }
 0xfcc   :  { %v1819_v45 = vpop.permute.xlu2 %1818 }
 0xfcd   :  { %v1821_v46 = vadd.f32 %v1819_v45, %v1811_v44 }
 0xfcf   :  { %3051 = vtanh.f32 %v1821_v46 }
 0xfd5   :  { %v3052_v47 = vpop.eup %3051 }
 0xfd6   :  { %1824 = vrot.lane.b32.xlu2 %v3052_v47, %s3238_s21 }
 0xff2   :  { %v1990_v51 = vpop.permute.xlu1 %1989 }
 0xff3   :  { %v1992_v52 = vadd.f32 %v1990_v51, %v1982_v50 }
 0xff5   :  { %3053 = vtanh.f32 %v1992_v52 }
 0xffb   :  { %v3054_v53 = vpop.eup %3053 }
 0xffc   :  { %1995 = vrot.lane.b32.xlu0 %v3054_v53, %s3238_s21 }
0x1030   :  { %v1825_v55 = vpop.permute.xlu2 %1824 }
0x1031   :  { %v1827_v56 = vmul.f32 %v1825_v55, %v1804_v31 }
0x1033   :  { %1829 = vrot.lane.b32.xlu1 %v1827_v56, %s3244_s5  ;;  %v1838_v57 = vpack.c.bf16 %v1827_v56, %v1827_v56 }
0x1035   :  { %1844 = vrot.lane.b32.xlu2 %v1838_v57, %s3244_s5 }
0x103d   :  { %1834 = vrot.lane.b32.xlu2 %v1821_v46, %s3246_s22 }
0x106e   :  { %v1996_v60 = vpop.permute.xlu0 %1995 }
0x106f   :  { %v1998_v63 = vmul.f32 %v1996_v60, %v1975_v41 }
0x1071   :  { %2000 = vrot.lane.b32.xlu1 %v1998_v63, %s3244_s5  ;;  %v2009_v0 = vpack.c.bf16 %v1998_v63, %v1998_v63 }
0x1073   :  { %2050 = vrot.lane.b32.xlu0 %v2009_v0, %s3244_s5 }
0x1079   :  { %2005 = vrot.lane.b32.xlu1 %v1992_v52, %s3246_s22 }
0x108f   :  { %v1845_v4 = vpop.permute.xlu2 %1844 }
0x1090   :  { %2774 = vmatmul.msk.bf16.vlgmr.msrb.gmra.mxu0 %vm142_vm1, %v1845_v4 }
0x1097   :  { %v1835_v7 = vpop.permute.xlu2 %1834 }
0x1098   :  { %1837 = vst.msk [vmem:[#allocation3 + $0x2] sm:$0x3] %vm115_vm0, %v1835_v7 }
0x109f   :  { %v2011_v38 = vld [vmem:[#allocation3 + $0x2] sm:$0x3] }
0x10a5   :  { %v1830_v8 = vpop.permute.xlu1 %1829 }
0x10a6   :  { %1832 = vst.msk [vmem:[#allocation2 + $0x2] sm:$0x3] %vm115_vm0, %v1830_v8 }
0x10ad   :  { %v2010_v9 = vld [vmem:[#allocation2 + $0x2] sm:$0x3] }
0x10ae   :  { %v2012_v10 = vpack.c.bf16 %v2010_v9, %v2010_v9 }
0x10b0   :  { %2796 = vmatmul.msk.bf16.vlgmr.msrb.gmra.mxu3 %vm142_vm1, %v2012_v10 }
0x10e3   :  { %v2001_v14 = vpop.permute.xlu1 %2000 }
0x10e4   :  { %2003 = vst.msk [vmem:[#allocation2] sm:$0x3] %vm115_vm0, %v2001_v14 }
0x10e5   :  { %v2051_v15 = vpop.permute.xlu0 %2050 }
0x10e6   :  { %2805 = vmatmul.msk.bf16.vlgmr.msra.gmra.mxu0 %vm142_vm1, %v2051_v15 }
0x10eb   :  { %v2006_v16 = vpop.permute.xlu1 %2005  ;;  %v2220_v19 = vld [vmem:[#allocation2] sm:$0x3] }
0x10ec   :  { %2008 = vst.msk [vmem:[#allocation3] sm:$0x3] %vm115_vm0, %v2006_v16  ;;  %v2222_v20 = vpack.c.bf16 %v2220_v19, %v2220_v19 }
0x10ee   :  { %2828 = vmatmul.msk.bf16.vlgmr.msra.gmra.mxu3 %vm142_vm1, %v2222_v20 }
0x10f3   :  { %v2221_v42 = vld [vmem:[#allocation3] sm:$0x3] }
0x110d   :  { %v3594_v23 = vpop.f32.mrf.mxu0 }
0x110e   :  { %v1885_v24 = vpack.c.bf16 %v3594_v23, %v3594_v23 }
0x1110   :  { %2775 = vmatmul.msk.bf16.vlgmr.msrb.gmra.mxu1 %vm397_vm15, %v1885_v24 }
0x1115   :  { %v1872_v25 = vpop.f32.mrf.mxu0 }
0x1133   :  { %v2041_v26 = vpop.f32.mrf.mxu3 }
0x113b   :  { %v2043_v27 = vpop.f32.mrf.mxu3 }
0x1163   :  { %v2076_v30 = vpop.f32.mrf.mxu0 }
0x1164   :  { %v2077_v31 = vadd.f32 %v2076_v30, %v2041_v26 }
0x1166   :  { %v2084_v32 = vadd.f32 %v2946_v29, %v2077_v31 }
0x1168   :  { %3055 = vtanh.f32 %v2084_v32  ;;  %v2807_v47 = vmul.f32 -1.442695, %v2084_v32 }
0x116b   :  { %v2078_v33 = vpop.f32.mrf.mxu0 }
0x116e   :  { %v3056_v34 = vpop.eup %3055 }
0x116f   :  { %2111 = vrot.lane.b32.xlu0 %v3056_v34, %s3238_s21 }
0x1171   :  { %v2251_v36 = vpop.f32.mrf.mxu3 }
0x1172   :  { %v2255_v37 = vadd.f32 %v2819_v35, %v2251_v36 }
0x1174   :  { %3057 = vtanh.f32 %v2255_v37  ;;  %v2829_v45 = vmul.f32 -1.442695, %v2255_v37  ;;  %v2916_v37 = vld [vmem:[%s3810_s4 + $0x8] sm:$0xff] }
0x1175   :  { %2165 = vmatpush.bf16.msra.mxu1 %v2916_v37 }
0x1176   :  { %3059 = vpow2.f32 %v2829_v45 }
0x1177   :  { %2106 = vrot.lane.b32.xlu0 %v2011_v38, %s3244_s5  ;;  %3061 = vpow2.f32 %v2807_v47  ;;  %v2915_v38 = vld [vmem:[%s3810_s4] sm:$0xff] }
0x1179   :  { %v2253_v39 = vpop.f32.mrf.mxu3  ;;  %2166 = vmatpush.bf16.msra.mxu1 %v2915_v38 }
0x117a   :  { %v3058_v41 = vpop.eup %3057  ;;  %v2920_v39 = vld [vmem:[#allocation6 + $0x18] sm:$0xff] }
0x117b   :  { %2282 = vrot.lane.b32.xlu2 %v3058_v41, %s3238_s21  ;;  %v2922_v41 = vld [vmem:[#allocation4 + $0x8] sm:$0xff]  ;;  %2336 = vmatpush.bf16.msrb.mxu0 %v2920_v39 }
0x117c   :  { %v3060_v46 = vpop.eup %3059 }
0x117d   :  { %v2259_v48 = vadd.f32 1.0, %v3060_v46  ;;  %v3062_v50 = vpop.eup %3061  ;;  %2371 = vmatpush.bf16.msrb.mxu1 %v2922_v41 }
0x117e   :  { %v2088_v52 = vadd.f32 1.0, %v3062_v50 }
0x117f   :  { %3063 = vrcp.f32 %v2259_v48  ;;  %v2271_v60 = vand.u32 2147483648, %v2259_v48  ;;  %vm2265_vm7 = vweird.f32 %v2259_v48  ;;  %v2269_v63 = vand.u32 2147483647, %v2259_v48 }
0x1180   :  { %3065 = vrcp.f32 %v2088_v52  ;;  %v2100_v9 = vand.u32 2147483648, %v2088_v52  ;;  %vm2094_vm11 = vweird.f32 %v2088_v52  ;;  %v2098_v10 = vand.u32 2147483647, %v2088_v52 }
0x1181   :  { %v2272_v2 = vor.u32 1.1754944e-38, %v2271_v60  ;;  %vm2270_vm9 = vcmp.eq.f32.partialorder %v2269_v63, 8.507059e+37  ;;  %v2948_v60 = vld [vmem:[%s3809_s3 + $0x1] ss:$0 sm:$0xff] }
0x1182   :  { %v2101_v13 = vor.u32 1.1754944e-38, %v2100_v9  ;;  %vm2099_vm13 = vcmp.eq.f32.partialorder %v2098_v10, 8.507059e+37 }
0x1183   :  { %2277 = vrot.lane.b32.xlu2 %v2221_v42, %s3244_s5  ;;  %v2919_v42 = vld [vmem:[#allocation6 + $0x10] sm:$0xff] }
0x1184   :  { %2337 = vmatpush.bf16.msrb.mxu0 %v2919_v42 }
0x1185   :  { %v3064_v51 = vpop.eup %3063 }
0x1186   :  { %v2261_v53 = vmul.f32 %v3064_v51, %v2259_v48  ;;  %v3066_v57 = vpop.eup %3065  ;;  %vm2266_vm6 = vweird.f32 %v3064_v51 }
0x1187   :  { %v2090_v59 = vmul.f32 %v3066_v57, %v2088_v52  ;;  %vm2267_vm8 = vmor %vm2265_vm7, %vm2266_vm6  ;;  %vm2095_vm10 = vweird.f32 %v3066_v57  ;;  %vm379_vm6 = vcmask 25600   ;;  %vm428_vm7 = vcmask 8192  }
0x1188   :  { %v2262_v55 = vsub.f32 1.0, %v2261_v53  ;;  %vm2096_vm12 = vmor %vm2094_vm11, %vm2095_vm10  ;;  %v2184_v53 = vld [vmem:[#allocation8] sm:$0x3] }
0x1189   :  { %v2091_v1 = vsub.f32 1.0, %v2090_v59 }
0x118a   :  { %v2263_v56 = vmul.f32 %v3064_v51, %v2262_v55  ;;  %v2193_v55 = vsel %vm401_vm14, %v2184_v53, 0 }
0x118b   :  { %v2092_v7 = vmul.f32 %v3066_v57, %v2091_v1  ;;  %2202 = vmatpush.bf16.msra.mxu2 %v2193_v55  ;;  %v2923_v55 = vld [vmem:[%s3810_s4] sm:$0xff] }
0x118c   :  { %v2264_v58 = vadd.f32 %v3064_v51, %v2263_v56 }
0x118d   :  { %v3609_v43 = vpop.f32.mrf.mxu1  ;;  %v2093_v8 = vadd.f32 %v3066_v57, %v2092_v7 }
0x118e   :  { %v2268_v0 = vsel %vm2267_vm8, %v3064_v51, %v2264_v58 }
0x118f   :  { %v2273_v4 = vsel %vm2270_vm9, %v2272_v2, %v2268_v0  ;;  %v2097_v12 = vsel %vm2096_vm12, %v3066_v57, %v2093_v8 }
0x1190   :  { %v2102_v15 = vsel %vm2099_vm13, %v2101_v13, %v2097_v12 }
0x1195   :  { %v1908_v44 = vpop.f32.mrf.mxu1 }
0x1196   :  { %v2921_v44 = vld [vmem:[#allocation4] sm:$0xff] }
0x1197   :  { %2372 = vmatpush.bf16.msrb.mxu1 %v2921_v44 }
0x11d5   :  { %v2283_v5 = vpop.permute.xlu2 %2282 }
0x11d6   :  { %v2285_v6 = vmul.f32 %v2283_v5, %v2273_v4 }
0x11d8   :  { %2287 = vrot.lane.b32.xlu0 %v2285_v6, %s3244_s5 }
0x11dd   :  { %v2278_v20 = vpop.permute.xlu2 %2277 }
0x11de   :  { %v2280_v21 = vmul.f32 %v2278_v20, %v2273_v4 }
0x11e1   :  { %v2112_v14 = vpop.permute.xlu0 %2111 }
0x11e2   :  { %v2114_v16 = vmul.f32 %v2112_v14, %v2102_v15 }
0x11e4   :  { %2116 = vrot.lane.b32.xlu1 %v2114_v16, %s3244_s5 }
0x11e9   :  { %v2107_v19 = vpop.permute.xlu0 %2106 }
0x11ea   :  { %v2109_v26 = vmul.f32 %v2107_v19, %v2102_v15 }
0x124a   :  { %v2288_v22 = vpop.permute.xlu0 %2287 }
0x124b   :  { %v3613_v24 = vadd.f32 %v2288_v22, %v2280_v21 }
0x124d   :  { %3067 = vtanh.f32 %v3613_v24 }
0x1253   :  { %v3068_v25 = vpop.eup %3067 }
0x1254   :  { %2293 = vrot.lane.b32.xlu2 %v3068_v25, %s3238_s21 }
0x1256   :  { %v2117_v27 = vpop.permute.xlu1 %2116 }
0x1257   :  { %v2119_v29 = vadd.f32 %v2117_v27, %v2109_v26 }
0x1259   :  { %3069 = vtanh.f32 %v2119_v29 }
0x125f   :  { %v3070_v30 = vpop.eup %3069 }
0x1260   :  { %2122 = vrot.lane.b32.xlu1 %v3070_v30, %s3238_s21 }
0x12ae   :  { %v2294_v31 = vpop.permute.xlu2 %2293 }
0x12af   :  { %v3618_v32 = vmul.f32 %v2294_v31, %v2273_v4 }
0x12b1   :  { %v2307_v33 = vpack.c.bf16 %v3618_v32, %v3618_v32 }
0x12b3   :  { %2348 = vrot.lane.b32.xlu2 %v2307_v33, %s3244_s5 }
0x12d2   :  { %v2123_v34 = vpop.permute.xlu1 %2122 }
0x12d3   :  { %v2125_v35 = vmul.f32 %v2123_v34, %v2102_v15 }
0x12d5   :  { %2127 = vrot.lane.b32.xlu1 %v2125_v35, %s3244_s5  ;;  %v2136_v36 = vpack.c.bf16 %v2125_v35, %v2125_v35 }
0x12d7   :  { %2142 = vrot.lane.b32.xlu0 %v2136_v36, %s3244_s5 }
0x12df   :  { %2132 = vrot.lane.b32.xlu0 %v2119_v29, %s3246_s22  ;;  %v380_v29 = vsel %vm379_vm6, %v3384_v3, -inf }
0x130d   :  { %v2349_v51 = vpop.permute.xlu2 %2348 }
0x1347   :  { %v2128_v45 = vpop.permute.xlu1 %2127 }
0x1348   :  { %2130 = vst.msk [vmem:[#allocation2 + $0x2] sm:$0x3] %vm115_vm0, %v2128_v45 }
0x1349   :  { %v2143_v46 = vpop.permute.xlu0 %2142 }
0x134a   :  { %2816 = vmatmul.msk.bf16.vlgmr.msra.gmra.mxu1 %vm142_vm1, %v2143_v46 }
0x134f   :  { %v2308_v47 = vld [vmem:[#allocation2 + $0x2] sm:$0x3] }
0x1350   :  { %v2310_v48 = vpack.c.bf16 %v2308_v47, %v2308_v47  ;;  %v2937_v47 = vld [vmem:[#allocation9] ss:$0 sm:$0xff] }
0x1351   :  { %v2133_v50 = vpop.permute.xlu0 %2132 }
0x1352   :  { %2135 = vst.msk [vmem:[#allocation3 + $0x2] sm:$0x3] %vm115_vm0, %v2133_v50  ;;  %2838 = vmatmul.msk.bf16.vlgmr.msrb.gmra.mxu0 %vm142_vm1, %v2310_v48  ;;  %v415_v50 = vadd.f32 %v2937_v47, %v3400_v40  ;;  %v980_v40 = vsel %vm379_vm6, %v3468_v54, -inf }
0x1359   :  { %v2309_v52 = vld [vmem:[#allocation3 + $0x2] sm:$0x3] }
0x135a   :  { %2404 = vrot.lane.b32.xlu2 %v2309_v52, %s3244_s5  ;;  %2847 = vmatmul.msk.bf16.vlgmr.msrb.gmra.mxu1 %vm142_vm1, %v2349_v51 }
0x13b4   :  { %v2405_v30 = vpop.permute.xlu2 %2404 }
0x13c7   :  { %v3639_v56 = vpop.f32.mrf.mxu1 }
0x13c8   :  { %v2183_v57 = vpack.c.bf16 %v3639_v56, %v3639_v56 }
0x13ca   :  { %2817 = vmatmul.msk.bf16.vlgmr.msra.gmra.mxu2 %vm397_vm15, %v2183_v57  ;;  %v682_v57 = vsel %vm379_vm6, %v3426_v28, -inf }
0x13cf   :  { %v2170_v58 = vpop.f32.mrf.mxu1  ;;  %v2339_v59 = vpop.f32.mrf.mxu0 }
0x13d0   :  { %v1278_v58 = vsel %vm379_vm6, %v3510_v17, -inf }
0x13d7   :  { %v2341_v63 = vpop.f32.mrf.mxu0  ;;  %v2374_v0 = vpop.f32.mrf.mxu1 }
0x13d8   :  { %v2375_v1 = vadd.f32 %v2374_v0, %v2339_v59  ;;  %v1576_v59 = vsel %vm379_vm6, %v3552_v49, -inf  ;;  %v1874_v63 = vsel %vm379_vm6, %v3594_v23, -inf  ;;  %v424_v0 = vlaneseq }
0x13da   :  { %v2382_v2 = vadd.f32 %v2948_v60, %v2375_v1  ;;  %v3687_v1 = vand.u32 127, %v424_v0 }
0x13dc   :  { %3071 = vtanh.f32 %v2382_v2  ;;  %v2849_v6 = vmul.f32 -1.442695, %v2382_v2 }
0x13de   :  { %3073 = vpow2.f32 %v2849_v6 }
0x13df   :  { %v2376_v4 = vpop.f32.mrf.mxu1 }
0x13e2   :  { %v3072_v5 = vpop.eup %3071 }
0x13e3   :  { %2409 = vrot.lane.b32.xlu1 %v3072_v5, %s3238_s21 }
0x13e4   :  { %v3074_v7 = vpop.eup %3073 }
0x13e5   :  { %v2386_v8 = vadd.f32 1.0, %v3074_v7 }
0x13e7   :  { %3075 = vrcp.f32 %v2386_v8  ;;  %v2398_v16 = vand.u32 2147483648, %v2386_v8  ;;  %vm2392_vm3 = vweird.f32 %v2386_v8  ;;  %v2396_v19 = vand.u32 2147483647, %v2386_v8 }
0x13e9   :  { %v2399_v21 = vor.u32 1.1754944e-38, %v2398_v16  ;;  %vm2397_vm5 = vcmp.eq.f32.partialorder %v2396_v19, 8.507059e+37 }
0x13ed   :  { %v3076_v9 = vpop.eup %3075 }
0x13ee   :  { %v2388_v10 = vmul.f32 %v3076_v9, %v2386_v8  ;;  %vm2393_vm2 = vweird.f32 %v3076_v9 }
0x13ef   :  { %vm2394_vm4 = vmor %vm2392_vm3, %vm2393_vm2 }
0x13f0   :  { %v2389_v12 = vsub.f32 1.0, %v2388_v10 }
0x13f2   :  { %v2390_v13 = vmul.f32 %v3076_v9, %v2389_v12 }
0x13f4   :  { %v2391_v15 = vadd.f32 %v3076_v9, %v2390_v13  ;;  %v2482_v13 = vld [vmem:[#allocation8] sm:$0x3] }
0x13f5   :  { %v2491_v16 = vsel %vm401_vm14, %v2482_v13, 0  ;;  %v2947_v13 = vld [vmem:[#allocation9] ss:$0 sm:$0xff] }
0x13f6   :  { %v2395_v20 = vsel %vm2394_vm4, %v3076_v9, %v2391_v15  ;;  %2500 = vmatpush.bf16.msrb.mxu3 %v2491_v16 }
0x13f7   :  { %v2400_v26 = vsel %vm2397_vm5, %v2399_v21, %v2395_v20 }
0x13f8   :  { %v2407_v31 = vmul.f32 %v2405_v30, %v2400_v26 }
0x144d   :  { %v3648_v14 = vpop.f32.mrf.mxu2 }
0x1455   :  { %v2206_v22 = vpop.f32.mrf.mxu2  ;;  %v2410_v25 = vpop.permute.xlu1 %2409 }
0x1456   :  { %v2412_v27 = vmul.f32 %v2410_v25, %v2400_v26 }
0x1458   :  { %2414 = vrot.lane.b32.xlu0 %v2412_v27, %s3244_s5 }
0x1482   :  { %381 = vmax.xlane.f32.xlu0 %v380_v29 }
0x14ca   :  { %v2415_v33 = vpop.permute.xlu0 %2414 }
0x14cb   :  { %v3653_v34 = vadd.f32 %v2415_v33, %v2407_v31 }
0x14cd   :  { %3077 = vtanh.f32 %v3653_v34 }
0x14d3   :  { %v3078_v35 = vpop.eup %3077 }
0x14d4   :  { %2420 = vrot.lane.b32.xlu1 %v3078_v35, %s3238_s21 }
0x14f5   :  { %v382_v36 = vpop.xlane.xlu0 %381 }
0x14f6   :  { %v383_v37 = vsub.f32 %v3384_v3, %v382_v36  ;;  %v2924_v3 = vld [vmem:[%s3810_s4 + $0x8] sm:$0xff] }
0x14f7   :  { %2463 = vmatpush.bf16.msrb.mxu2 %v2924_v3 }
0x14f8   :  { %v384_v38 = vmul.f32 1.442695, %v383_v37 }
0x14fa   :  { %3079 = vpow2.f32 %v384_v38 }
0x14fb   :  { %2464 = vmatpush.bf16.msrb.mxu2 %v2923_v55 }
0x1500   :  { %v3080_v39 = vpop.eup %3079 }
0x1501   :  { %v386_v41 = vsel %vm379_vm6, %v3080_v39, 0.0 }
0x1502   :  { %387 = vadd.xlane.f32.xlu1 %v386_v41 }
0x1546   :  { %v2421_v42 = vpop.permute.xlu1 %2420 }
0x1547   :  { %v3659_v44 = vmul.f32 %v2421_v42, %v2400_v26  ;;  %v2939_v42 = vld [vmem:[#allocation9] ss:$0 sm:$0xff] }
0x1549   :  { %v2434_v45 = vpack.c.bf16 %v3659_v44, %v3659_v44 }
0x154b   :  { %2440 = vrot.lane.b32.xlu2 %v2434_v45, %s3244_s5 }
0x1575   :  { %v388_v46 = vpop.xlane.xlu1 %387 }
0x1576   :  { %3081 = vrcp.f32 %v388_v46  ;;  %v715_v46 = vadd.f32 %v2939_v42, %v3441_v62 }
0x157c   :  { %v3082_v48 = vpop.eup %3081 }
0x157d   :  { %v390_v51 = vmul.f32 %v3082_v48, %v3080_v39 }
0x157f   :  { %418 = vst.msk [vmem:[%s3815_s9] sm:$0x3] %vm379_vm6, %v390_v51  ;;  %v419_v52 = vmul.f32 %v415_v50, %v390_v51  ;;  %v2941_v50 = vld [vmem:[#allocation9] ss:$0 sm:$0xff] }
0x1581   :  { %v420_v53 = vsel %vm379_vm6, %v419_v52, 0.0 }
0x1582   :  { %421 = vadd.xlane.f32.xlu2 %v420_v53  ;;  %v1013_v53 = vadd.f32 %v2941_v50, %v3483_v18 }
0x158a   :  { %683 = vmax.xlane.f32.xlu2 %v682_v57 }
0x1592   :  { %981 = vmax.xlane.f32.xlu2 %v980_v40  ;;  %v2943_v40 = vld [vmem:[#allocation9] ss:$0 sm:$0xff] }
0x159a   :  { %1279 = vmax.xlane.f32.xlu2 %v1278_v58 }
0x15a2   :  { %1577 = vmax.xlane.f32.xlu2 %v1576_v59 }
0x15a5   :  { %v2441_v60 = vpop.permute.xlu2 %2440 }
0x15a6   :  { %2858 = vmatmul.msk.bf16.vlgmr.msrb.gmra.mxu2 %vm142_vm1, %v2441_v60  ;;  %v1311_v60 = vadd.f32 %v2943_v40, %v3526_v61 }
0x15aa   :  { %1875 = vmax.xlane.f32.xlu2 %v1874_v63 }
0x15f5   :  { %v422_v2 = vpop.xlane.xlu2 %421 }
0x15f6   :  { %v426_v4 = vperm.slane %v422_v2, %v3687_v1  ;;  %v2945_v2 = vld [vmem:[#allocation9] ss:$0 sm:$0xff] }
0x15f8   :  { %429 = vst.msk [vmem:[%s3816_s10] sm:$0x1] %vm428_vm7, %v426_v4 }
0x15fd   :  { %v684_v5 = vpop.xlane.xlu2 %683 }
0x15fe   :  { %v685_v6 = vsub.f32 %v3426_v28, %v684_v5 }
0x1600   :  { %v686_v7 = vmul.f32 1.442695, %v685_v6  ;;  %v1609_v6 = vadd.f32 %v2945_v2, %v3567_v11  ;;  %v1907_v11 = vadd.f32 %v2947_v13, %v3609_v43 }
0x1602   :  { %3083 = vpow2.f32 %v686_v7 }
0x1605   :  { %v982_v8 = vpop.xlane.xlu2 %981 }
0x1606   :  { %v983_v9 = vsub.f32 %v3468_v54, %v982_v8 }
0x1608   :  { %v3084_v10 = vpop.eup %3083  ;;  %v984_v12 = vmul.f32 1.442695, %v983_v9 }
0x1609   :  { %v688_v15 = vsel %vm379_vm6, %v3084_v10, 0.0 }
0x160a   :  { %3085 = vpow2.f32 %v984_v12  ;;  %689 = vadd.xlane.f32.xlu0 %v688_v15 }
0x160d   :  { %v1280_v19 = vpop.xlane.xlu2 %1279 }
0x160e   :  { %v1281_v20 = vsub.f32 %v3510_v17, %v1280_v19 }
0x1610   :  { %v3086_v21 = vpop.eup %3085  ;;  %v1282_v28 = vmul.f32 1.442695, %v1281_v20 }
0x1611   :  { %v986_v22 = vsel %vm379_vm6, %v3086_v21, 0.0 }
0x1612   :  { %3087 = vpow2.f32 %v1282_v28  ;;  %987 = vadd.xlane.f32.xlu0 %v986_v22 }
0x1615   :  { %v1578_v54 = vpop.xlane.xlu2 %1577 }
0x1616   :  { %v1579_v25 = vsub.f32 %v3552_v49, %v1578_v54  ;;  %v2172_v49 = vsel %vm379_vm6, %v3639_v56, -inf }
0x1618   :  { %v3088_v26 = vpop.eup %3087  ;;  %v1580_v27 = vmul.f32 1.442695, %v1579_v25 }
0x1619   :  { %v1284_v29 = vsel %vm379_vm6, %v3088_v26, 0.0 }
0x161a   :  { %3089 = vpow2.f32 %v1580_v27  ;;  %1285 = vadd.xlane.f32.xlu0 %v1284_v29 }
0x161d   :  { %v1876_v30 = vpop.xlane.xlu2 %1875 }
0x161e   :  { %v1877_v31 = vsub.f32 %v3594_v23, %v1876_v30 }
0x1620   :  { %v3090_v33 = vpop.eup %3089  ;;  %v1878_v17 = vmul.f32 1.442695, %v1877_v31 }
0x1621   :  { %v1582_v35 = vsel %vm379_vm6, %v3090_v33, 0.0 }
0x1622   :  { %3091 = vpow2.f32 %v1878_v17  ;;  %1583 = vadd.xlane.f32.xlu0 %v1582_v35  ;;  %v2949_v35 = vld [vmem:[#allocation9] ss:$0 sm:$0xff] }
0x1628   :  { %v3092_v36 = vpop.eup %3091 }
0x1629   :  { %v3704_v37 = vpop.f32.mrf.mxu2  ;;  %v1880_v38 = vsel %vm379_vm6, %v3092_v36, 0.0 }
0x162a   :  { %v2481_v39 = vpack.c.bf16 %v3704_v37, %v3704_v37  ;;  %2173 = vmax.xlane.f32.xlu0 %v2172_v49  ;;  %1881 = vadd.xlane.f32.xlu2 %v1880_v38  ;;  %v2470_v54 = vsel %vm379_vm6, %v3704_v37, -inf  ;;  %v2205_v49 = vadd.f32 %v2949_v35, %v3648_v14 }
0x162c   :  { %2859 = vmatmul.msk.bf16.vlgmr.msrb.gmra.mxu3 %vm397_vm15, %v2481_v39 }
0x1631   :  { %v2468_v23 = vpop.f32.mrf.mxu2 }
0x167d   :  { %v690_v41 = vpop.xlane.xlu0 %689 }
0x167e   :  { %3093 = vrcp.f32 %v690_v41 }
0x1684   :  { %v3094_v45 = vpop.eup %3093 }
0x1685   :  { %v988_v47 = vpop.xlane.xlu0 %987  ;;  %v692_v3 = vmul.f32 %v3094_v45, %v3084_v10 }
0x1686   :  { %3095 = vrcp.f32 %v988_v47 }
0x1687   :  { %v720_v48 = vmul.f32 %v715_v46, %v692_v3  ;;  %2608 = vst.msk [vmem:[%s3815_s9 + $0x2] sm:$0x3] %vm379_vm6, %v692_v3 }
0x1689   :  { %v721_v51 = vsel %vm379_vm6, %v720_v48, 0.0 }
0x168a   :  { %722 = vadd.xlane.f32.xlu1 %v721_v51 }
0x168c   :  { %v3096_v52 = vpop.eup %3095 }
0x168d   :  { %v1286_v55 = vpop.xlane.xlu0 %1285  ;;  %v990_v57 = vmul.f32 %v3096_v52, %v3086_v21 }
0x168e   :  { %3097 = vrcp.f32 %v1286_v55 }
0x168f   :  { %v1018_v62 = vmul.f32 %v1013_v53, %v990_v57  ;;  %2650 = vst.msk [vmem:[%s3815_s9 + $0x4] sm:$0x3] %vm379_vm6, %v990_v57  ;;  %v2950_v53 = vld [vmem:[#allocation9] ss:$0 sm:$0xff] }
0x1691   :  { %v1019_v58 = vsel %vm379_vm6, %v1018_v62, 0.0 }
0x1692   :  { %1020 = vadd.xlane.f32.xlu1 %v1019_v58 }
0x1694   :  { %v3098_v59 = vpop.eup %3097 }
0x1695   :  { %v1584_v63 = vpop.xlane.xlu0 %1583  ;;  %v1288_v0 = vmul.f32 %v3098_v59, %v3088_v26 }
0x1696   :  { %3099 = vrcp.f32 %v1584_v63 }
0x1697   :  { %v1316_v18 = vmul.f32 %v1311_v60, %v1288_v0  ;;  %2692 = vst.msk [vmem:[%s3815_s9 + $0x6] sm:$0x3] %vm379_vm6, %v1288_v0 }
0x1699   :  { %v1317_v4 = vsel %vm379_vm6, %v1316_v18, 0.0 }
0x169a   :  { %1318 = vadd.xlane.f32.xlu1 %v1317_v4 }
0x169c   :  { %v3100_v5 = vpop.eup %3099 }
0x169d   :  { %v2174_v7 = vpop.xlane.xlu0 %2173  ;;  %v1882_v8 = vpop.xlane.xlu2 %1881  ;;  %v1586_v9 = vmul.f32 %v3100_v5, %v3090_v33 }
0x169e   :  { %v2175_v61 = vsub.f32 %v3639_v56, %v2174_v7  ;;  %3101 = vrcp.f32 %v1882_v8 }
0x169f   :  { %v1614_v10 = vmul.f32 %v1609_v6, %v1586_v9  ;;  %2734 = vst.msk [vmem:[%s3815_s9 + $0x8] sm:$0x3] %vm379_vm6, %v1586_v9 }
0x16a0   :  { %v2176_v12 = vmul.f32 1.442695, %v2175_v61 }
0x16a1   :  { %v1615_v15 = vsel %vm379_vm6, %v1614_v10, 0.0 }
0x16a2   :  { %3103 = vpow2.f32 %v2176_v12  ;;  %1616 = vadd.xlane.f32.xlu1 %v1615_v15 }
0x16a4   :  { %v3102_v16 = vpop.eup %3101 }
0x16a5   :  { %v1884_v19 = vmul.f32 %v3102_v16, %v3092_v36 }
0x16a7   :  { %v1912_v20 = vmul.f32 %v1907_v11, %v1884_v19  ;;  %2776 = vst.msk [vmem:[%s3815_s9 + $0xa] sm:$0x3] %vm379_vm6, %v1884_v19 }
0x16a8   :  { %v3104_v56 = vpop.eup %3103 }
0x16a9   :  { %v2178_v21 = vsel %vm379_vm6, %v3104_v56, 0.0  ;;  %v1913_v28 = vsel %vm379_vm6, %v1912_v20, 0.0 }
0x16aa   :  { %2179 = vadd.xlane.f32.xlu1 %v2178_v21  ;;  %1914 = vadd.xlane.f32.xlu0 %v1913_v28 }
0x16af   :  { %v2502_v22 = vpop.f32.mrf.mxu3 }
0x16b0   :  { %v2503_v57 = vadd.f32 %v2950_v53, %v2502_v22 }
0x16b2   :  { %2471 = vmax.xlane.f32.xlu1 %v2470_v54 }
0x16b7   :  { %v2504_v43 = vpop.f32.mrf.mxu3 }
0x16be   :  { %2298 = vrot.lane.b32.xlu0 %v3618_v32, %s3244_s5 }
0x16c6   :  { %2430 = vrot.lane.b32.xlu0 %v3653_v34, %s3246_s22 }
0x16cb   :  { %2303 = vrot.lane.b32.xlu1 %v3613_v24, %s3246_s22 }
0x16fd   :  { %v723_v25 = vpop.xlane.xlu1 %722 }
0x16fe   :  { %v725_v26 = vperm.slane %v723_v25, %v3687_v1 }
0x1700   :  { %727 = vst.msk [vmem:[%s3816_s10 + $0x1] sm:$0x1] %vm428_vm7, %v725_v26 }
0x1705   :  { %v1021_v27 = vpop.xlane.xlu1 %1020 }
0x1706   :  { %v1023_v29 = vperm.slane %v1021_v27, %v3687_v1 }
0x1708   :  { %1025 = vst.msk [vmem:[%s3816_s10 + $0x2] sm:$0x1] %vm428_vm7, %v1023_v29 }
0x170d   :  { %v1319_v32 = vpop.xlane.xlu1 %1318 }
0x170e   :  { %v1321_v34 = vperm.slane %v1319_v32, %v3687_v1 }
0x1710   :  { %1323 = vst.msk [vmem:[%s3816_s10 + $0x3] sm:$0x1] %vm428_vm7, %v1321_v34 }
0x1715   :  { %v1617_v24 = vpop.xlane.xlu1 %1616 }
0x1716   :  { %v1619_v30 = vperm.slane %v1617_v24, %v3687_v1 }
0x1718   :  { %1621 = vst.msk [vmem:[%s3816_s10 + $0x4] sm:$0x1] %vm428_vm7, %v1619_v30 }
0x171d   :  { %v2180_v31 = vpop.xlane.xlu1 %2179  ;;  %v1915_v33 = vpop.xlane.xlu0 %1914 }
0x171e   :  { %3105 = vrcp.f32 %v2180_v31  ;;  %v1917_v17 = vperm.slane %v1915_v33, %v3687_v1 }
0x1720   :  { %1919 = vst.msk [vmem:[%s3816_s10 + $0x5] sm:$0x1] %vm428_vm7, %v1917_v17 }
0x1724   :  { %v3106_v36 = vpop.eup %3105 }
0x1725   :  { %v2472_v38 = vpop.xlane.xlu1 %2471  ;;  %v2182_v39 = vmul.f32 %v3106_v36, %v3104_v56 }
0x1726   :  { %v2473_v23 = vsub.f32 %v3704_v37, %v2472_v38 }
0x1727   :  { %2818 = vst.msk [vmem:[%s3815_s9 + $0xc] sm:$0x3] %vm379_vm6, %v2182_v39  ;;  %v2210_v41 = vmul.f32 %v2205_v49, %v2182_v39 }
0x1728   :  { %v2474_v42 = vmul.f32 1.442695, %v2473_v23 }
0x1729   :  { %v2211_v45 = vsel %vm379_vm6, %v2210_v41, 0.0 }
0x172a   :  { %3107 = vpow2.f32 %v2474_v42  ;;  %2212 = vadd.xlane.f32.xlu2 %v2211_v45 }
0x1730   :  { %v3108_v46 = vpop.eup %3107  ;;  %v2299_v47 = vpop.permute.xlu0 %2298 }
0x1731   :  { %2301 = vst.msk [vmem:[#allocation2] sm:$0x3] %vm115_vm0, %v2299_v47  ;;  %v2476_v14 = vsel %vm379_vm6, %v3108_v46, 0.0 }
0x1732   :  { %2477 = vadd.xlane.f32.xlu1 %v2476_v14 }
0x1738   :  { %v2431_v3 = vpop.permute.xlu0 %2430 }
0x1739   :  { %2433 = vst.msk [vmem:[#allocation3 + $0x2] sm:$0x3] %vm115_vm0, %v2431_v3 }
0x173d   :  { %v2304_v37 = vpop.permute.xlu1 %2303 }
0x173e   :  { %2306 = vst.msk [vmem:[#allocation3] sm:$0x3] %vm115_vm0, %v2304_v37 }
0x1742   :  { %2425 = vrot.lane.b32.xlu2 %v3659_v44, %s3244_s5 }
0x179d   :  { %v2213_v48 = vpop.xlane.xlu2 %2212 }
0x179e   :  { %v2215_v50 = vperm.slane %v2213_v48, %v3687_v1 }
0x17a0   :  { %2217 = vst.msk [vmem:[%s3816_s10 + $0x6] sm:$0x1] %vm428_vm7, %v2215_v50 }
0x17a5   :  { %v2478_v51 = vpop.xlane.xlu1 %2477  ;;  %v2426_v52 = vpop.permute.xlu2 %2425 }
0x17a6   :  { %3109 = vrcp.f32 %v2478_v51  ;;  %2428 = vst.msk [vmem:[#allocation2 + $0x2] sm:$0x3] %vm115_vm0, %v2426_v52 }
0x17ac   :  { %v3110_v55 = vpop.eup %3109 }
0x17ad   :  { %v2480_v62 = vmul.f32 %v3110_v55, %v3108_v46 }
0x17af   :  { %2860 = vst.msk [vmem:[%s3815_s9 + $0xe] sm:$0x3] %vm379_vm6, %v2480_v62  ;;  %v2508_v44 = vmul.f32 %v2503_v57, %v2480_v62 }
0x17b1   :  { %v2509_v40 = vsel %vm379_vm6, %v2508_v44, 0.0 }
0x17b2   :  { %2510 = vadd.xlane.f32.xlu0 %v2509_v40 }
0x1825   :  { %v2511_v58 = vpop.xlane.xlu0 %2510 }
0x1826   :  { %v2513_v59 = vperm.slane %v2511_v58, %v3687_v1 }
0x1828   :  { %2515 = vst.msk [vmem:[%s3816_s10 + $0x7] sm:$0x1] %vm428_vm7, %v2513_v59 }
0x1829   :  { %2524 = vsyncpa [#allocation5], 1 }
0x182a   :  { %2525 = vsyncpa [#allocation7], 1 }
0x182b   :  { %2526 = vsyncpa [#allocation10], 1 }

</bundles_post_ra>
